<compile_context>
chip_gen: v7x
topology: tpu7x:2x2x1
jax: 0.10.0
libtpu: 0.0.40
codegen_flags: <defaults>
</compile_context>

<pallas_src>
import numpy as np
import jax
import jax.numpy as jnp
from jax import lax
from jax.experimental import pallas as pl
from jax.experimental.pallas import tpu as pltpu

EPS = 1e-5  # nn.InstanceNorm2d default eps (affine=False, no running stats)


# ---------------------------------------------------------------------------
# In-kernel helpers (traced inside the Pallas kernel body, all data in VMEM)
# ---------------------------------------------------------------------------
def _reflect_pad_hw(x3, H, W):
    """x3: (C, H, W) -> (C, H+2, W+2); PyTorch Conv2d padding_mode='reflect'."""
    xp = jnp.concatenate([x3[:, 1:2, :], x3, x3[:, H - 2:H - 1, :]], axis=1)
    xp = jnp.concatenate([xp[:, :, 1:2], xp, xp[:, :, W - 2:W - 1]], axis=2)
    return xp


def _conv3x3_im2col(x_flat, w2d, b, C, H, W):
    """3x3 conv (reflect pad, stride 1) as a single im2col matmul.

    x_flat: (C, H*W) f32 activation (lane-dense)
    w2d   : (O, 9*C) bf16 im2col weights (tap-major: kh, kw, c)
    b     : (O, 1)  f32 bias
    returns (O, H*W) f32
    """
    HW = H * W
    xp = _reflect_pad_hw(x_flat.reshape(C, H, W), H, W)          # (C, H+2, W+2)
    taps = [xp[:, kh:kh + H, kw:kw + W].reshape(C, HW)
            for kh in range(3) for kw in range(3)]
    patches = jnp.concatenate(taps, axis=0).astype(jnp.bfloat16)  # (9C, HW)
    y = jnp.dot(w2d, patches, preferred_element_type=jnp.float32)  # MXU, f32 acc
    return y + b


def _instance_norm(y, inv_hw):
    """Single-pass InstanceNorm (affine=False, biased variance), f32 stats.
    y: (C, H*W) f32."""
    s = jnp.sum(y, axis=1, keepdims=True)
    ss = jnp.sum(y * y, axis=1, keepdims=True)
    mean = s * inv_hw
    var = jnp.maximum(ss * inv_hw - mean * mean, 0.0)
    return (y - mean) * lax.rsqrt(var + EPS)


# ---------------------------------------------------------------------------
# Fused resnet-block kernel: conv1 -> IN -> ReLU -> conv2 -> IN -> + residual
# ---------------------------------------------------------------------------
def _make_block_kernel(C, H, W):
    HW = H * W
    inv_hw = 1.0 / float(HW)

    def kernel(x_ref, w1_ref, b1_ref, w2_ref, b2_ref, o_ref):
        x = x_ref[0]                                             # (C, HW) f32
        h = _conv3x3_im2col(x, w1_ref[...], b1_ref[...], C, H, W)
        h = _instance_norm(h, inv_hw)
        h = jnp.maximum(h, 0.0)
        h = _conv3x3_im2col(h, w2_ref[...], b2_ref[...], C, H, W)
        h = _instance_norm(h, inv_hw)
        o_ref[0] = (h + x).astype(o_ref.dtype)

    return kernel


def _resnet_block_call(xf, w1, b1, w2, b2, C, H, W):
    """xf: (N, C, H*W) f32 lane-dense activation. Returns same shape/dtype."""
    N = xf.shape[0]
    HW = H * W
    return pl.pallas_call(
        _make_block_kernel(C, H, W),
        out_shape=jax.ShapeDtypeStruct((N, C, HW), jnp.float32),
        grid_spec=pltpu.PrefetchScalarGridSpec(
            num_scalar_prefetch=0,
            grid=(N,),
            in_specs=[
                pl.BlockSpec((1, C, HW), lambda n: (n, 0, 0)),    # activation
                pl.BlockSpec((C, 9 * C), lambda n: (0, 0)),       # w1 (bf16)
                pl.BlockSpec((C, 1), lambda n: (0, 0)),           # b1
                pl.BlockSpec((C, 9 * C), lambda n: (0, 0)),       # w2 (bf16)
                pl.BlockSpec((C, 1), lambda n: (0, 0)),           # b2
            ],
            out_specs=pl.BlockSpec((1, C, HW), lambda n: (n, 0, 0)),
        ),
        # Output lands back in the activation's HBM buffer (no fresh buffer).
        input_output_aliases={0: 0},
        compiler_params=pltpu.CompilerParams(
            dimension_semantics=("parallel",)),
    )(xf, w1, b1, w2, b2)


def resnet_blocks_forward(x, kparams):
    """x: (N, C, H, W) f32. kparams: list of (w1_2d, b1, w2_2d, b2) with
    w*_2d (O, 9C) bf16 (spectrally normalized, im2col layout), b* (O, 1) f32."""
    N, C, H, W = x.shape
    xf = x.reshape(N, C, H * W)            # lane-dense layout for the kernels
    for (w1, b1, w2, b2) in kparams:
        xf = _resnet_block_call(xf, w1, b1, w2, b2, C, H, W)
    return xf.reshape(N, C, H, W)


# ---------------------------------------------------------------------------
# Parameter construction (deterministic, synthetic)
# ---------------------------------------------------------------------------
def _spectral_normalize(w):
    # PyTorch's spectral_norm divides the weight by its largest singular value
    # (estimated by power iteration on the (O, C*kh*kw) view).
    # TODO(synk): PyTorch's persistent power-iteration buffers (u, v) are not
    # reproduced; we use the exact converged sigma instead of a 1-step estimate.
    mat = np.asarray(w).reshape(w.shape[0], -1)
    sigma = float(np.linalg.svd(mat, compute_uv=False)[0])
    return w / sigma


def init_params(key, num_blocks, dim):
    """Torch-layout params: w (O, C, 3, 3) f32, b (O,) f32 (already SN'd)."""
    params = []
    for _ in range(num_blocks):
        key, k1, k2, k3, k4 = jax.random.split(key, 5)
        w1 = jax.random.normal(k1, (dim, dim, 3, 3), jnp.float32) * 0.2
        b1 = jax.random.normal(k2, (dim,), jnp.float32) * 0.05
        w2 = jax.random.normal(k3, (dim, dim, 3, 3), jnp.float32) * 0.2
        b2 = jax.random.normal(k4, (dim,), jnp.float32) * 0.05
        params.append((_spectral_normalize(w1), b1,
                       _spectral_normalize(w2), b2))
    return params


def prepare_kernel_params(params):
    """(O, C, 3, 3) f32 -> (O, 9C) bf16 im2col weights (tap-major kh, kw, c);
    bias -> (O, 1) f32."""
    kparams = []
    for (w1, b1, w2, b2) in params:
        O = w1.shape[0]
        kparams.append((
            jnp.transpose(w1, (0, 2, 3, 1)).reshape(O, -1).astype(jnp.bfloat16),
            b1.reshape(O, 1).astype(jnp.float32),
            jnp.transpose(w2, (0, 2, 3, 1)).reshape(O, -1).astype(jnp.bfloat16),
            b2.reshape(O, 1).astype(jnp.float32),
        ))
    return kparams


# ---------------------------------------------------------------------------
# Pure-JAX reference (same semantics and same bf16-operand / f32-accumulate
# matmul numerics as the kernel) for the correctness check.
# ---------------------------------------------------------------------------
def _ref_conv3x3(x, w, b):
    H, W = x.shape[2], x.shape[3]
    xp = jnp.pad(x, ((0, 0), (0, 0), (1, 1), (1, 1)), mode="reflect")
    xb = xp.astype(jnp.bfloat16)
    wb = w.astype(jnp.bfloat16)
    out = jnp.zeros((x.shape[0], w.shape[0], H, W), jnp.float32)
    for kh in range(3):
        for kw in range(3):
            out = out + jnp.einsum("oc,nchw->nohw", wb[:, :, kh, kw],
                                   xb[:, :, kh:kh + H, kw:kw + W],
                                   preferred_element_type=jnp.float32)
    return out + b[None, :, None, None]


def _ref_instance_norm(y):
    mean = jnp.mean(y, axis=(2, 3), keepdims=True)
    var = jnp.mean((y - mean) ** 2, axis=(2, 3), keepdims=True)
    return (y - mean) * lax.rsqrt(var + EPS)


def ref_forward(x, params):
    for (w1, b1, w2, b2) in params:
        h = _ref_conv3x3(x, w1, b1)
        h = _ref_instance_norm(h)
        h = jnp.maximum(h, 0.0)
        h = _ref_conv3x3(h, w2, b2)
        h = _ref_instance_norm(h)
        x = h + x
    return x


# ---------------------------------------------------------------------------
if __name__ == "__main__":
    N, C, H, W = 2, 4, 16, 16
    NUM_BLOCKS = 2

    key = jax.random.PRNGKey(0)
    key, kx, kp = jax.random.split(key, 3)
    x = jax.random.normal(kx, (N, C, H, W), jnp.float32)
    params = init_params(kp, NUM_BLOCKS, C)      # torch-layout (for reference)
    kparams = prepare_kernel_params(params)      # im2col bf16 (for kernel)

    fwd = jax.jit(resnet_blocks_forward)
    out = jax.block_until_ready(fwd(x, kparams))

    ref = jax.block_until_ready(ref_forward(x, params))
    np.testing.assert_allclose(np.asarray(out), np.asarray(ref),
                               rtol=2e-3, atol=2e-3)

    print("KERNEL_OK")
</pallas_src>

<mosaic_0001>
module attributes {stable_mosaic.version = 11 : i64} {
  func.func @kernel(%arg0: i32, %arg1: memref<1x4x256xf32, #tpu.memory_space<vmem>>, %arg2: memref<4x36xbf16, #tpu.memory_space<vmem>>, %arg3: memref<4x1xf32, #tpu.memory_space<vmem>>, %arg4: memref<4x36xbf16, #tpu.memory_space<vmem>>, %arg5: memref<4x1xf32, #tpu.memory_space<vmem>>, %arg6: memref<1x4x256xf32, #tpu.memory_space<vmem>>) attributes {dimension_semantics = [#tpu.dimension_semantics<parallel>], iteration_bounds = array<i64: 2>, scalar_prefetch = 0 : i64, scratch_operands = 0 : i64, tpu.core_type = #tpu.core_type<tc>, window_params = [{transform_indices = @transform_0, window_bounds = array<i64: 1, 4, 256>}, {pipeline_mode = #tpu.pipeline_mode<synchronous>, transform_indices = @transform_1, window_bounds = array<i64: 4, 36>}, {pipeline_mode = #tpu.pipeline_mode<synchronous>, transform_indices = @transform_2, window_bounds = array<i64: 4, 1>}, {pipeline_mode = #tpu.pipeline_mode<synchronous>, transform_indices = @transform_3, window_bounds = array<i64: 4, 36>}, {pipeline_mode = #tpu.pipeline_mode<synchronous>, transform_indices = @transform_4, window_bounds = array<i64: 4, 1>}, {transform_indices = @transform_5, window_bounds = array<i64: 1, 4, 256>}]} {
    %c0 = arith.constant 0 : index
    %c0_0 = arith.constant 0 : index
    %c0_1 = arith.constant 0 : index
    %0 = vector.load %arg1[%c0, %c0_0, %c0_1] : memref<1x4x256xf32, #tpu.memory_space<vmem>>, vector<1x4x256xf32>
    %1 = vector.shape_cast %0 : vector<1x4x256xf32> to vector<4x256xf32>
    %c0_2 = arith.constant 0 : index
    %c0_3 = arith.constant 0 : index
    %2 = vector.load %arg2[%c0_2, %c0_3] : memref<4x36xbf16, #tpu.memory_space<vmem>>, vector<4x36xbf16>
    %c0_4 = arith.constant 0 : index
    %c0_5 = arith.constant 0 : index
    %3 = vector.load %arg3[%c0_4, %c0_5] : memref<4x1xf32, #tpu.memory_space<vmem>>, vector<4x1xf32>
    %4 = vector.shape_cast %1 : vector<4x256xf32> to vector<4x16x16xf32>
    %5 = vector.extract_strided_slice %4 {offsets = [0, 1, 0], sizes = [4, 1, 16], strides = [1, 1, 1]} : vector<4x16x16xf32> to vector<4x1x16xf32>
    %6 = vector.extract_strided_slice %4 {offsets = [0, 14, 0], sizes = [4, 1, 16], strides = [1, 1, 1]} : vector<4x16x16xf32> to vector<4x1x16xf32>
    %7 = tpu.concatenate %5, %4, %6 in 1 : vector<4x1x16xf32>, vector<4x16x16xf32>, vector<4x1x16xf32> -> vector<4x18x16xf32>
    %8 = vector.extract_strided_slice %7 {offsets = [0, 0, 1], sizes = [4, 18, 1], strides = [1, 1, 1]} : vector<4x18x16xf32> to vector<4x18x1xf32>
    %9 = vector.extract_strided_slice %7 {offsets = [0, 0, 14], sizes = [4, 18, 1], strides = [1, 1, 1]} : vector<4x18x16xf32> to vector<4x18x1xf32>
    %10 = tpu.concatenate %8, %7, %9 in 2 : vector<4x18x1xf32>, vector<4x18x16xf32>, vector<4x18x1xf32> -> vector<4x18x18xf32>
    %11 = vector.extract_strided_slice %10 {offsets = [0, 0, 0], sizes = [4, 16, 16], strides = [1, 1, 1]} : vector<4x18x18xf32> to vector<4x16x16xf32>
    %12 = vector.shape_cast %11 : vector<4x16x16xf32> to vector<4x256xf32>
    %13 = vector.extract_strided_slice %10 {offsets = [0, 0, 1], sizes = [4, 16, 16], strides = [1, 1, 1]} : vector<4x18x18xf32> to vector<4x16x16xf32>
    %14 = vector.shape_cast %13 : vector<4x16x16xf32> to vector<4x256xf32>
    %15 = vector.extract_strided_slice %10 {offsets = [0, 0, 2], sizes = [4, 16, 16], strides = [1, 1, 1]} : vector<4x18x18xf32> to vector<4x16x16xf32>
    %16 = vector.shape_cast %15 : vector<4x16x16xf32> to vector<4x256xf32>
    %17 = vector.extract_strided_slice %10 {offsets = [0, 1, 0], sizes = [4, 16, 16], strides = [1, 1, 1]} : vector<4x18x18xf32> to vector<4x16x16xf32>
    %18 = vector.shape_cast %17 : vector<4x16x16xf32> to vector<4x256xf32>
    %19 = vector.extract_strided_slice %10 {offsets = [0, 1, 1], sizes = [4, 16, 16], strides = [1, 1, 1]} : vector<4x18x18xf32> to vector<4x16x16xf32>
    %20 = vector.shape_cast %19 : vector<4x16x16xf32> to vector<4x256xf32>
    %21 = vector.extract_strided_slice %10 {offsets = [0, 1, 2], sizes = [4, 16, 16], strides = [1, 1, 1]} : vector<4x18x18xf32> to vector<4x16x16xf32>
    %22 = vector.shape_cast %21 : vector<4x16x16xf32> to vector<4x256xf32>
    %23 = vector.extract_strided_slice %10 {offsets = [0, 2, 0], sizes = [4, 16, 16], strides = [1, 1, 1]} : vector<4x18x18xf32> to vector<4x16x16xf32>
    %24 = vector.shape_cast %23 : vector<4x16x16xf32> to vector<4x256xf32>
    %25 = vector.extract_strided_slice %10 {offsets = [0, 2, 1], sizes = [4, 16, 16], strides = [1, 1, 1]} : vector<4x18x18xf32> to vector<4x16x16xf32>
    %26 = vector.shape_cast %25 : vector<4x16x16xf32> to vector<4x256xf32>
    %27 = vector.extract_strided_slice %10 {offsets = [0, 2, 2], sizes = [4, 16, 16], strides = [1, 1, 1]} : vector<4x18x18xf32> to vector<4x16x16xf32>
    %28 = vector.shape_cast %27 : vector<4x16x16xf32> to vector<4x256xf32>
    %29 = tpu.concatenate %12, %14, %16, %18, %20, %22, %24, %26, %28 in 0 : vector<4x256xf32>, vector<4x256xf32>, vector<4x256xf32>, vector<4x256xf32>, vector<4x256xf32>, vector<4x256xf32>, vector<4x256xf32>, vector<4x256xf32>, vector<4x256xf32> -> vector<36x256xf32>
    %30 = arith.truncf %29 : vector<36x256xf32> to vector<36x256xbf16>
    %cst = arith.constant dense<0.000000e+00> : vector<4x256xf32>
    %31 = tpu.matmul %2, %30, %cst {dimension_numbers = #tpu.dot_dimension_numbers<[1], [0], [0], [1], [0, 0, 1, 1], [], []>} : vector<4x36xbf16>, vector<36x256xbf16>, vector<4x256xf32> -> vector<4x256xf32>
    %32 = vector.broadcast %3 : vector<4x1xf32> to vector<4x256xf32>
    %33 = arith.addf %31, %32 : vector<4x256xf32>
    %cst_6 = arith.constant dense<0.000000e+00> : vector<4xf32>
    %34 = vector.multi_reduction <add>, %33, %cst_6 [1] : vector<4x256xf32> to vector<4xf32>
    %35 = vector.shape_cast %34 : vector<4xf32> to vector<4x1xf32>
    %36 = arith.mulf %33, %33 : vector<4x256xf32>
    %cst_7 = arith.constant dense<0.000000e+00> : vector<4xf32>
    %37 = vector.multi_reduction <add>, %36, %cst_7 [1] : vector<4x256xf32> to vector<4xf32>
    %38 = vector.shape_cast %37 : vector<4xf32> to vector<4x1xf32>
    %cst_8 = arith.constant 3.906250e-03 : f32
    %39 = vector.broadcast %cst_8 : f32 to vector<4x1xf32>
    %40 = arith.mulf %35, %39 : vector<4x1xf32>
    %cst_9 = arith.constant 3.906250e-03 : f32
    %41 = vector.broadcast %cst_9 : f32 to vector<4x1xf32>
    %42 = arith.mulf %38, %41 : vector<4x1xf32>
    %43 = arith.mulf %40, %40 : vector<4x1xf32>
    %44 = arith.subf %42, %43 : vector<4x1xf32>
    %cst_10 = arith.constant 0.000000e+00 : f32
    %45 = vector.broadcast %cst_10 : f32 to vector<4x1xf32>
    %46 = arith.maximumf %44, %45 : vector<4x1xf32>
    %47 = vector.broadcast %40 : vector<4x1xf32> to vector<4x256xf32>
    %48 = arith.subf %33, %47 : vector<4x256xf32>
    %cst_11 = arith.constant 9.99999974E-6 : f32
    %49 = vector.broadcast %cst_11 : f32 to vector<4x1xf32>
    %50 = arith.addf %46, %49 : vector<4x1xf32>
    %51 = math.rsqrt %50 : vector<4x1xf32>
    %52 = vector.broadcast %51 : vector<4x1xf32> to vector<4x256xf32>
    %53 = arith.mulf %48, %52 : vector<4x256xf32>
    %cst_12 = arith.constant 0.000000e+00 : f32
    %54 = vector.broadcast %cst_12 : f32 to vector<4x256xf32>
    %55 = arith.maximumf %53, %54 : vector<4x256xf32>
    %c0_13 = arith.constant 0 : index
    %c0_14 = arith.constant 0 : index
    %56 = vector.load %arg4[%c0_13, %c0_14] : memref<4x36xbf16, #tpu.memory_space<vmem>>, vector<4x36xbf16>
    %c0_15 = arith.constant 0 : index
    %c0_16 = arith.constant 0 : index
    %57 = vector.load %arg5[%c0_15, %c0_16] : memref<4x1xf32, #tpu.memory_space<vmem>>, vector<4x1xf32>
    %58 = vector.shape_cast %55 : vector<4x256xf32> to vector<4x16x16xf32>
    %59 = vector.extract_strided_slice %58 {offsets = [0, 1, 0], sizes = [4, 1, 16], strides = [1, 1, 1]} : vector<4x16x16xf32> to vector<4x1x16xf32>
    %60 = vector.extract_strided_slice %58 {offsets = [0, 14, 0], sizes = [4, 1, 16], strides = [1, 1, 1]} : vector<4x16x16xf32> to vector<4x1x16xf32>
    %61 = tpu.concatenate %59, %58, %60 in 1 : vector<4x1x16xf32>, vector<4x16x16xf32>, vector<4x1x16xf32> -> vector<4x18x16xf32>
    %62 = vector.extract_strided_slice %61 {offsets = [0, 0, 1], sizes = [4, 18, 1], strides = [1, 1, 1]} : vector<4x18x16xf32> to vector<4x18x1xf32>
    %63 = vector.extract_strided_slice %61 {offsets = [0, 0, 14], sizes = [4, 18, 1], strides = [1, 1, 1]} : vector<4x18x16xf32> to vector<4x18x1xf32>
    %64 = tpu.concatenate %62, %61, %63 in 2 : vector<4x18x1xf32>, vector<4x18x16xf32>, vector<4x18x1xf32> -> vector<4x18x18xf32>
    %65 = vector.extract_strided_slice %64 {offsets = [0, 0, 0], sizes = [4, 16, 16], strides = [1, 1, 1]} : vector<4x18x18xf32> to vector<4x16x16xf32>
    %66 = vector.shape_cast %65 : vector<4x16x16xf32> to vector<4x256xf32>
    %67 = vector.extract_strided_slice %64 {offsets = [0, 0, 1], sizes = [4, 16, 16], strides = [1, 1, 1]} : vector<4x18x18xf32> to vector<4x16x16xf32>
    %68 = vector.shape_cast %67 : vector<4x16x16xf32> to vector<4x256xf32>
    %69 = vector.extract_strided_slice %64 {offsets = [0, 0, 2], sizes = [4, 16, 16], strides = [1, 1, 1]} : vector<4x18x18xf32> to vector<4x16x16xf32>
    %70 = vector.shape_cast %69 : vector<4x16x16xf32> to vector<4x256xf32>
    %71 = vector.extract_strided_slice %64 {offsets = [0, 1, 0], sizes = [4, 16, 16], strides = [1, 1, 1]} : vector<4x18x18xf32> to vector<4x16x16xf32>
    %72 = vector.shape_cast %71 : vector<4x16x16xf32> to vector<4x256xf32>
    %73 = vector.extract_strided_slice %64 {offsets = [0, 1, 1], sizes = [4, 16, 16], strides = [1, 1, 1]} : vector<4x18x18xf32> to vector<4x16x16xf32>
    %74 = vector.shape_cast %73 : vector<4x16x16xf32> to vector<4x256xf32>
    %75 = vector.extract_strided_slice %64 {offsets = [0, 1, 2], sizes = [4, 16, 16], strides = [1, 1, 1]} : vector<4x18x18xf32> to vector<4x16x16xf32>
    %76 = vector.shape_cast %75 : vector<4x16x16xf32> to vector<4x256xf32>
    %77 = vector.extract_strided_slice %64 {offsets = [0, 2, 0], sizes = [4, 16, 16], strides = [1, 1, 1]} : vector<4x18x18xf32> to vector<4x16x16xf32>
    %78 = vector.shape_cast %77 : vector<4x16x16xf32> to vector<4x256xf32>
    %79 = vector.extract_strided_slice %64 {offsets = [0, 2, 1], sizes = [4, 16, 16], strides = [1, 1, 1]} : vector<4x18x18xf32> to vector<4x16x16xf32>
    %80 = vector.shape_cast %79 : vector<4x16x16xf32> to vector<4x256xf32>
    %81 = vector.extract_strided_slice %64 {offsets = [0, 2, 2], sizes = [4, 16, 16], strides = [1, 1, 1]} : vector<4x18x18xf32> to vector<4x16x16xf32>
    %82 = vector.shape_cast %81 : vector<4x16x16xf32> to vector<4x256xf32>
    %83 = tpu.concatenate %66, %68, %70, %72, %74, %76, %78, %80, %82 in 0 : vector<4x256xf32>, vector<4x256xf32>, vector<4x256xf32>, vector<4x256xf32>, vector<4x256xf32>, vector<4x256xf32>, vector<4x256xf32>, vector<4x256xf32>, vector<4x256xf32> -> vector<36x256xf32>
    %84 = arith.truncf %83 : vector<36x256xf32> to vector<36x256xbf16>
    %cst_17 = arith.constant dense<0.000000e+00> : vector<4x256xf32>
    %85 = tpu.matmul %56, %84, %cst_17 {dimension_numbers = #tpu.dot_dimension_numbers<[1], [0], [0], [1], [0, 0, 1, 1], [], []>} : vector<4x36xbf16>, vector<36x256xbf16>, vector<4x256xf32> -> vector<4x256xf32>
    %86 = vector.broadcast %57 : vector<4x1xf32> to vector<4x256xf32>
    %87 = arith.addf %85, %86 : vector<4x256xf32>
    %cst_18 = arith.constant dense<0.000000e+00> : vector<4xf32>
    %88 = vector.multi_reduction <add>, %87, %cst_18 [1] : vector<4x256xf32> to vector<4xf32>
    %89 = vector.shape_cast %88 : vector<4xf32> to vector<4x1xf32>
    %90 = arith.mulf %87, %87 : vector<4x256xf32>
    %cst_19 = arith.constant dense<0.000000e+00> : vector<4xf32>
    %91 = vector.multi_reduction <add>, %90, %cst_19 [1] : vector<4x256xf32> to vector<4xf32>
    %92 = vector.shape_cast %91 : vector<4xf32> to vector<4x1xf32>
    %cst_20 = arith.constant 3.906250e-03 : f32
    %93 = vector.broadcast %cst_20 : f32 to vector<4x1xf32>
    %94 = arith.mulf %89, %93 : vector<4x1xf32>
    %cst_21 = arith.constant 3.906250e-03 : f32
    %95 = vector.broadcast %cst_21 : f32 to vector<4x1xf32>
    %96 = arith.mulf %92, %95 : vector<4x1xf32>
    %97 = arith.mulf %94, %94 : vector<4x1xf32>
    %98 = arith.subf %96, %97 : vector<4x1xf32>
    %cst_22 = arith.constant 0.000000e+00 : f32
    %99 = vector.broadcast %cst_22 : f32 to vector<4x1xf32>
    %100 = arith.maximumf %98, %99 : vector<4x1xf32>
    %101 = vector.broadcast %94 : vector<4x1xf32> to vector<4x256xf32>
    %102 = arith.subf %87, %101 : vector<4x256xf32>
    %cst_23 = arith.constant 9.99999974E-6 : f32
    %103 = vector.broadcast %cst_23 : f32 to vector<4x1xf32>
    %104 = arith.addf %100, %103 : vector<4x1xf32>
    %105 = math.rsqrt %104 : vector<4x1xf32>
    %106 = vector.broadcast %105 : vector<4x1xf32> to vector<4x256xf32>
    %107 = arith.mulf %102, %106 : vector<4x256xf32>
    %108 = arith.addf %107, %1 : vector<4x256xf32>
    %c0_24 = arith.constant 0 : index
    %c0_25 = arith.constant 0 : index
    %c0_26 = arith.constant 0 : index
    %109 = vector.load %arg6[%c0_24, %c0_25, %c0_26] : memref<1x4x256xf32, #tpu.memory_space<vmem>>, vector<1x4x256xf32>
    %110 = vector.shape_cast %109 : vector<1x4x256xf32> to vector<4x256xf32>
    %111 = vector.shape_cast %108 : vector<4x256xf32> to vector<1x4x256xf32>
    tpu.vector_store %arg6[%c0_24, %c0_25, %c0_26], %111 {strides = array<i32>} : memref<1x4x256xf32, #tpu.memory_space<vmem>>, vector<1x4x256xf32>,
    return
  }
  func.func @transform_0(%arg0: i32) -> (i32, i32, i32) {
    %c0_i32 = arith.constant 0 : i32
    %c0_i32_0 = arith.constant 0 : i32
    %c0_i32_1 = arith.constant 0 : i32
    return %arg0, %c0_i32, %c0_i32_0 : i32, i32, i32
  }
  func.func @transform_1(%arg0: i32) -> (i32, i32) {
    %c0_i32 = arith.constant 0 : i32
    %c0_i32_0 = arith.constant 0 : i32
    %c0_i32_1 = arith.constant 0 : i32
    return %c0_i32, %c0_i32_0 : i32, i32
  }
  func.func @transform_2(%arg0: i32) -> (i32, i32) {
    %c0_i32 = arith.constant 0 : i32
    %c0_i32_0 = arith.constant 0 : i32
    %c0_i32_1 = arith.constant 0 : i32
    return %c0_i32, %c0_i32_0 : i32, i32
  }
  func.func @transform_3(%arg0: i32) -> (i32, i32) {
    %c0_i32 = arith.constant 0 : i32
    %c0_i32_0 = arith.constant 0 : i32
    %c0_i32_1 = arith.constant 0 : i32
    return %c0_i32, %c0_i32_0 : i32, i32
  }
  func.func @transform_4(%arg0: i32) -> (i32, i32) {
    %c0_i32 = arith.constant 0 : i32
    %c0_i32_0 = arith.constant 0 : i32
    %c0_i32_1 = arith.constant 0 : i32
    return %c0_i32, %c0_i32_0 : i32, i32
  }
  func.func @transform_5(%arg0: i32) -> (i32, i32, i32) {
    %c0_i32 = arith.constant 0 : i32
    %c0_i32_0 = arith.constant 0 : i32
    %c0_i32_1 = arith.constant 0 : i32
    return %arg0, %c0_i32, %c0_i32_0 : i32, i32, i32
  }
}

</mosaic_0001>

<bundles_post_ra>
// kernel: resnet_blocks_forward.2
= control target key start
LH: loop header
LB: loop body
LE: loop exit
PB: predicated region body
PF: predicated region fallthrough
CT: control target
= control target key end

     0   :  { %s6189_s18 = smov 0   ;;  %s9474_s0 = inlined_call_operand.vmem [shape: f32[2,4,256], index: 0, kind: input, shape index: {}, may-alias: {0,5}]   ;;  %s9475_s1 = inlined_call_operand.vmem [shape: bf16[4,36], index: 1, kind: input, shape index: {}]   ;;  %s9476_s2 = inlined_call_operand.vmem [shape: f32[4,1], index: 2, kind: input, shape index: {}]   ;;  %s9477_s3 = inlined_call_operand.vmem [shape: bf16[4,36], index: 3, kind: input, shape index: {}]   ;;  %s9478_s4 = inlined_call_operand.vmem [shape: f32[4,1], index: 4, kind: input, shape index: {}]   ;;  %s9479_s5 = inlined_call_operand.vmem [shape: f32[2,4,256], index: 5, kind: output, shape index: {}, may-alias: {0,5}]  }
   0x1 LB: > { %s5454_s19 = sadd.s32 4294967295, %s6142_s18   ;;  %p5458_p0 = scmp.ge.s32.totalorder %s6142_s18, 1  ;;  %s6142_s18 = sphi %s6189_s18, %s15_s18  }
   0x2   : > { %p187_p1 = scmp.lt.s32.totalorder %s6142_s18, 3 }
   0x4   : > { %p188_p2 = pnand %p5458_p0, %p187_p1 }
   0x6   : > { %191 = sbr.rel (%p188_p2) target bundleno = 2207 (0x89f), region = 40 }
   0xd   : > { %p215_p3 = scmp.lt.s32.totalorder %s5454_s19, 1  ;;  %s6144_s24 = smov 80   ;;  %v6151_v2 = vmov 1983009808   ;;  %v271_v4 = vlaneseq  ;;  %v6152_v14 = vmov 1934713408  }
   0xe   : > { %s6145_s25 = smov 112   ;;  %s6146_s26 = smov 64   ;;  %v269_v3 = vunpack.c.l.s4 %v6151_v2  ;;  %v286_v15 = vunpack.c.l.s4 %v6152_v14  ;;  %vm447_vm0 = vcmask 1040384   ;;  %vm625_vm1 = vcmask 138240  }
   0xf   : > { %s9594_s19 = smov (!%p215_p3, %s5454_s19), 1  ;;  %s6147_s27 = smov 96   ;;  %v6215_v7 = vshrl.u32 %v271_v4, 7  ;;  %vm612_vm2 = vcmask 7168   ;;  %vm1323_vm3 = vcmask 1046528   ;;  %vm2018_vm4 = vcmask 1045504  }
  0x10   : > { %s5473_s20 = sshll.u32 %s9594_s19, 3  ;;  %s6148_s28 = smov 32   ;;  %v270_v6 = vunpack.c.0.s8 %v269_v3  ;;  %v287_v25 = vunpack.c.0.s8 %v286_v15  ;;  %vm830_vm5 = vcmask 130048   ;;  %vm832_vm6 = vcmask 261120  }
  0x11   : > { %s6205_s23 = scalar_lea.vmem %s9474_s0, %s5473_s20  ;;  %s6149_s29 = smov 48   ;;  %v409_v49 = vsub.s32 1, %v6215_v7  ;;  %vm834_vm7 = vcmask 392192   ;;  %vm836_vm8 = vcmask 523264   ;;  %vm838_vm9 = vcmask 654336  }
  0x12   : > { %v226_v0 = vld [vmem:[%s6205_s23] sm:$0xff]  ;;  %s6150_s30 = smov 16   ;;  %v6218_v17 = vsub.s32 %v270_v6, %v6215_v7  ;;  %v6225_v36 = vsub.s32 %v287_v25, %v6215_v7  ;;  %s6154_s6 = smov 127   ;;  %vm840_vm10 = vcmask 785408   ;;  %vm842_vm11 = vcmask 916480  }
  0x13   : > { %240 = vrot.lane.b32.xlu1 %v226_v0, %s6144_s24  ;;  %232 = vrot.lane.b32.xlu0 %v226_v0, %s6145_s25  ;;  %v230_v10 = vrot.slane %v226_v0, 4  ;;  %s6155_s7 = smov 1   ;;  %s6156_s8 = smov 3   ;;  %vm2737_vm12 = vcmask 1043456   ;;  %vm2761_vm13 = vcmask 1041408   ;;  %vm2757_vm14 = vcmask 293888  }
  0x14   : > { %s6157_s9 = smov 126  }
  0x17   : > { %244 = vrot.lane.b32.xlu1 %v226_v0, %s6146_s26  ;;  %236 = vrot.lane.b32.xlu0 %v226_v0, %s6147_s27 }
  0x1b   : > { %252 = vrot.lane.b32.xlu1 %v226_v0, %s6148_s28  ;;  %248 = vrot.lane.b32.xlu0 %v226_v0, %s6149_s29 }
  0x1f   : > { %256 = vrot.lane.b32.xlu0 %v226_v0, %s6150_s30 }
  0x85   : > { %v241_v1 = vpop.permute.xlu1 %240  ;;  %v233_v5 = vpop.permute.xlu0 %232 }
  0x86   : > { %v242_v12 = vrot.slane %v241_v1, 4  ;;  %v234_v13 = vrot.slane %v233_v5, 4  ;;  %v275_v18 = vcombine.low %v233_v5, %v241_v1 }
  0x88   : > { %v343_v24 = vcombine.low %v234_v13, %v242_v12  ;;  %v282_v28 = vrot.slane %v275_v18, %v6218_v17 }
  0x89   : > { %v245_v8 = vpop.permute.xlu1 %244  ;;  %v237_v9 = vpop.permute.xlu0 %236 }
  0x8a   : > { %v238_v11 = vrot.slane %v237_v9, 4  ;;  %v267_v16 = vcombine.low %v226_v0, %v237_v9  ;;  %v246_v22 = vrot.slane %v245_v8, 4  ;;  %v350_v35 = vrot.slane %v343_v24, %v6218_v17 }
  0x8b   : > { %v9480_v0 = vmov 0.0  }
  0x8c   : > { %v335_v19 = vcombine.low %v230_v10, %v238_v11  ;;  %v274_v26 = vrot.slane %v267_v16, %v6218_v17 }
  0x8d   : > { %v253_v20 = vpop.permute.xlu1 %252  ;;  %v249_v21 = vpop.permute.xlu0 %248 }
  0x8e   : > { %v254_v23 = vrot.slane %v253_v20, 4  ;;  %v301_v27 = vcombine.low %v245_v8, %v253_v20  ;;  %v342_v29 = vrot.slane %v335_v19, %v6218_v17  ;;  %v250_v32 = vrot.slane %v249_v21, 4 }
  0x8f   : > { %v283_v37 = vcombine.low %v274_v26, %v282_v28  ;;  %v284_v47 = vcombine.high %v274_v26, %v282_v28 }
  0x90   : > { %v369_v31 = vcombine.low %v246_v22, %v254_v23  ;;  %v308_v38 = vrot.slane %v301_v27, %v6218_v17  ;;  %v351_v41 = vcombine.low %v342_v29, %v350_v35  ;;  %v352_v42 = vcombine.high %v342_v29, %v350_v35 }
  0x91   : > { %v257_v30 = vpop.permute.xlu0 %256  ;;  %v291_v48 = vrot.slane %v283_v37, %v6225_v36  ;;  %v298_v60 = vrot.slane %v284_v47, %v6225_v36  ;;  %v470_v23 = vsub.s32 2, %v6215_v7 }
  0x92   : > { %v258_v33 = vrot.slane %v257_v30, 4  ;;  %v309_v34 = vcombine.low %v249_v21, %v257_v30  ;;  %v376_v43 = vrot.slane %v369_v31, %v6218_v17  ;;  %v359_v53 = vrot.slane %v351_v41, %v6225_v36 }
  0x93   : > { %v366_v55 = vrot.slane %v352_v42, %v6225_v36  ;;  %v410_v61 = vrot.slane %v291_v48, %v409_v49  ;;  %v299_v1 = vcombine.high %v291_v48, %v9480_v0  ;;  %v418_v16 = vrot.slane %v298_v60, %v409_v49 }
  0x94   : > { %v316_v39 = vrot.slane %v309_v34, %v6218_v17  ;;  %v377_v40 = vcombine.low %v250_v32, %v258_v33  ;;  %v300_v18 = vcombine.high %v298_v60, %v9480_v0 }
  0x95   : > { %v414_v10 = vrot.slane %v299_v1, %v409_v49 }
  0x96   : > { %v317_v44 = vcombine.low %v308_v38, %v316_v39  ;;  %v318_v45 = vcombine.high %v308_v38, %v316_v39  ;;  %v384_v46 = vrot.slane %v377_v40, %v6218_v17  ;;  %v422_v20 = vrot.slane %v300_v18, %v409_v49 }
  0x98   : > { %v385_v50 = vcombine.low %v376_v43, %v384_v46  ;;  %v386_v51 = vcombine.high %v376_v43, %v384_v46  ;;  %v325_v52 = vrot.slane %v317_v44, %v6225_v36  ;;  %v332_v54 = vrot.slane %v318_v45, %v6225_v36 }
  0x9a   : > { %v393_v56 = vrot.slane %v385_v50, %v6225_v36  ;;  %v400_v57 = vrot.slane %v386_v51, %v6225_v36  ;;  %v439_v58 = vcombine.low %v291_v48, %v325_v52  ;;  %v5463_v59 = vcombine.high %v291_v48, %v325_v52 }
  0x9b   : > { %v5465_v3 = vcombine.high %v298_v60, %v332_v54  ;;  %v443_v8 = vcombine.low %v298_v60, %v332_v54 }
  0x9c   : > { %v6240_v62 = vrot.slane %v439_v58, 7  ;;  %v5464_v63 = vcombine.high %v359_v53, %v393_v56  ;;  %v5466_v2 = vcombine.high %v366_v55, %v400_v57  ;;  %v451_v5 = vrot.slane %v5463_v59, 7 }
  0x9d   : > { %v457_v13 = vrot.slane %v5465_v3, 7  ;;  %v454_v14 = vrot.slane %v443_v8, 7  ;;  %v440_v21 = vcombine.low %v359_v53, %v393_v56  ;;  %v401_v25 = vcombine.high %v393_v56, %v9480_v0 }
  0x9e   : > { %v488_v4 = vsel %vm447_vm0, %v410_v61, %v6240_v62  ;;  %v452_v6 = vrot.slane %v5464_v63, 7  ;;  %v458_v11 = vrot.slane %v5466_v2, 7  ;;  %v489_v12 = vsel %vm447_vm0, %v414_v10, %v451_v5 }
  0x9f   : > { %504 = vrot.lane.b32.xlu1 %v488_v4, %s6154_s6  ;;  %v490_v19 = vsel %vm447_vm0, %v418_v16, %v454_v14  ;;  %v491_v22 = vsel %vm447_vm0, %v422_v20, %v457_v13  ;;  %v449_v24 = vrot.slane %v440_v21, 7  ;;  %v471_v26 = vrot.slane %v393_v56, %v470_v23 }
  0xa0   : > { %v453_v9 = vsel %vm447_vm0, %v451_v5, %v452_v6  ;;  %v459_v15 = vsel %vm447_vm0, %v457_v13, %v458_v11  ;;  %v475_v28 = vrot.slane %v401_v25, %v470_v23  ;;  %v444_v29 = vcombine.low %v366_v55, %v400_v57 }
  0xa1   : > { %512 = vrot.lane.b32.xlu0 %v453_v9, %s6154_s6  ;;  %v492_v27 = vsel %vm447_vm0, %v449_v24, %v471_v26  ;;  %v402_v31 = vcombine.high %v400_v57, %v9480_v0  ;;  %v479_v32 = vrot.slane %v400_v57, %v470_v23  ;;  %v450_v37 = vsel %vm447_vm0, %v6240_v62, %v449_v24 }
  0xa2   : > { %v493_v7 = vsel %vm447_vm0, %v452_v6, %v475_v28  ;;  %v455_v30 = vrot.slane %v444_v29, 7 }
  0xa3   : > { %510 = vrot.lane.b32.xlu1 %v489_v12, %s6154_s6  ;;  %v483_v34 = vrot.slane %v402_v31, %v470_v23 }
  0xa4   : > { %v494_v33 = vsel %vm447_vm0, %v455_v30, %v479_v32  ;;  %v456_v38 = vsel %vm447_vm0, %v454_v14, %v455_v30 }
  0xa5   : > { %524 = vrot.lane.b32.xlu0 %v459_v15, %s6154_s6  ;;  %v495_v35 = vsel %vm447_vm0, %v458_v11, %v483_v34 }
  0xa7   : > { %516 = vrot.lane.b32.xlu1 %v490_v19, %s6154_s6 }
  0xa9   : > { %548 = vrot.lane.b32.xlu0 %v453_v9, %s6155_s7 }
  0xab   : > { %522 = vrot.lane.b32.xlu1 %v491_v22, %s6154_s6 }
  0xad   : > { %560 = vrot.lane.b32.xlu0 %v459_v15, %s6155_s7 }
  0xaf   : > { %540 = vrot.lane.b32.xlu1 %v488_v4, %s6155_s7 }
  0xb1   : > { %508 = vrot.lane.b32.xlu0 %v492_v27, %s6154_s6 }
  0xb3   : > { %546 = vrot.lane.b32.xlu1 %v489_v12, %s6155_s7 }
  0xb5   : > { %514 = vrot.lane.b32.xlu0 %v493_v7, %s6154_s6 }
  0xb7   : > { %552 = vrot.lane.b32.xlu1 %v490_v19, %s6155_s7 }
  0xb9   : > { %520 = vrot.lane.b32.xlu0 %v494_v33, %s6154_s6 }
  0xbb   : > { %558 = vrot.lane.b32.xlu1 %v491_v22, %s6155_s7 }
  0xbd   : > { %526 = vrot.lane.b32.xlu0 %v495_v35, %s6154_s6 }
  0xbf   : > { %576 = vrot.lane.b32.xlu1 %v488_v4, %s6156_s8 }
  0xc1   : > { %544 = vrot.lane.b32.xlu0 %v492_v27, %s6155_s7 }
  0xc3   : > { %582 = vrot.lane.b32.xlu1 %v489_v12, %s6156_s8 }
  0xc5   : > { %550 = vrot.lane.b32.xlu0 %v493_v7, %s6155_s7 }
  0xc7   : > { %588 = vrot.lane.b32.xlu1 %v490_v19, %s6156_s8 }
  0xc9   : > { %556 = vrot.lane.b32.xlu0 %v494_v33, %s6155_s7 }
  0xcb   : > { %594 = vrot.lane.b32.xlu1 %v491_v22, %s6156_s8 }
  0xcd   : > { %562 = vrot.lane.b32.xlu0 %v495_v35, %s6155_s7 }
  0xcf   : > { %506 = vrot.lane.b32.xlu1 %v450_v37, %s6154_s6 }
  0xd1   : > { %584 = vrot.lane.b32.xlu0 %v453_v9, %s6156_s8 }
  0xd3   : > { %518 = vrot.lane.b32.xlu1 %v456_v38, %s6154_s6 }
  0xd5   : > { %596 = vrot.lane.b32.xlu0 %v459_v15, %s6156_s8 }
  0xd7   : > { %542 = vrot.lane.b32.xlu1 %v450_v37, %s6155_s7 }
  0xd9   : > { %580 = vrot.lane.b32.xlu0 %v492_v27, %s6156_s8 }
  0xdb   : > { %554 = vrot.lane.b32.xlu1 %v456_v38, %s6155_s7 }
  0xdd   : > { %586 = vrot.lane.b32.xlu0 %v493_v7, %s6156_s8 }
  0xdf   : > { %578 = vrot.lane.b32.xlu1 %v450_v37, %s6156_s8 }
  0xe1   : > { %592 = vrot.lane.b32.xlu0 %v494_v33, %s6156_s8 }
  0xe3   : > { %590 = vrot.lane.b32.xlu1 %v456_v38, %s6156_s8 }
  0xe5   : > { %598 = vrot.lane.b32.xlu0 %v495_v35, %s6156_s8 }
 0x111   : > { %v505_v39 = vpop.permute.xlu1 %504 }
 0x113   : > { %v513_v40 = vpop.permute.xlu0 %512 }
 0x115   : > { %v511_v41 = vpop.permute.xlu1 %510 }
 0x117   : > { %v525_v42 = vpop.permute.xlu0 %524 }
 0x119   : > { %v517_v43 = vpop.permute.xlu1 %516 }
 0x11b   : > { %v549_v44 = vpop.permute.xlu0 %548 }
 0x11c   : > { %v617_v19 = vsel %vm612_vm2, %v513_v40, %v549_v44 }
 0x11d   : > { %v523_v45 = vpop.permute.xlu1 %522 }
 0x11f   : > { %v561_v46 = vpop.permute.xlu0 %560 }
 0x120   : > { %v623_v27 = vsel %vm612_vm2, %v525_v42, %v561_v46 }
 0x121   : > { %v541_v47 = vpop.permute.xlu1 %540 }
 0x122   : > { %v613_v55 = vsel %vm612_vm2, %v505_v39, %v541_v47 }
 0x123   : > { %v6297_v48 = vpop.permute.xlu0 %508 }
 0x125   : > { %v547_v49 = vpop.permute.xlu1 %546 }
 0x126   : > { %v616_v59 = vsel %vm612_vm2, %v511_v41, %v547_v49 }
 0x127   : > { %v6299_v50 = vpop.permute.xlu0 %514 }
 0x129   : > { %v553_v51 = vpop.permute.xlu1 %552 }
 0x12a   : > { %v619_v63 = vsel %vm612_vm2, %v517_v43, %v553_v51 }
 0x12b   : > { %v6301_v52 = vpop.permute.xlu0 %520 }
 0x12d   : > { %v559_v53 = vpop.permute.xlu1 %558 }
 0x12e   : > { %v622_v6 = vsel %vm612_vm2, %v523_v45, %v559_v53 }
 0x12f   : > { %v6303_v54 = vpop.permute.xlu0 %526 }
 0x131   : > { %v577_v56 = vpop.permute.xlu1 %576 }
 0x132   : > { %v6307_v57 = vsel %vm625_vm1, %v613_v55, %v577_v56 }
 0x133   : > { %v6309_v58 = vpop.permute.xlu0 %544  ;;  %859 = vrot.lane.b32.xlu1 %v6307_v57, %s6154_s6  ;;  %v1324_v49 = vrot.slane %v6307_v57, 1  ;;  %v2019_v51 = vrot.slane %v6307_v57, 2 }
 0x134   : > { %v615_v53 = vsel %vm612_vm2, %v6297_v48, %v6309_v58 }
 0x135   : > { %v583_v60 = vpop.permute.xlu1 %582 }
 0x136   : > { %v6315_v61 = vsel %vm625_vm1, %v616_v59, %v583_v60 }
 0x137   : > { %863 = vrot.lane.b32.xlu0 %v6315_v61, %s6154_s6  ;;  %v551_v62 = vpop.permute.xlu0 %550  ;;  %v1329_v30 = vrot.slane %v6315_v61, 1 }
 0x138   : > { %v618_v43 = vsel %vm612_vm2, %v6299_v50, %v551_v62 }
 0x139   : > { %v589_v1 = vpop.permute.xlu1 %588 }
 0x13a   : > { %v6321_v2 = vsel %vm625_vm1, %v619_v63, %v589_v1 }
 0x13b   : > { %v638_v3 = vcombine.low %v6307_v57, %v6321_v2  ;;  %v639_v4 = vcombine.high %v6307_v57, %v6321_v2  ;;  %v557_v5 = vpop.permute.xlu0 %556  ;;  %867 = vrot.lane.b32.xlu1 %v6321_v2, %s6154_s6  ;;  %v1334_v56 = vrot.slane %v6321_v2, 1 }
 0x13c   : > { %v621_v59 = vsel %vm612_vm2, %v6301_v52, %v557_v5 }
 0x13d   : > { %v595_v8 = vpop.permute.xlu1 %594  ;;  %v6342_v14 = vrot.slane %v639_v4, %v6218_v17  ;;  %v6348_v16 = vrot.slane %v638_v3, %v6218_v17 }
 0x13e   : > { %v6331_v9 = vsel %vm625_vm1, %v622_v6, %v595_v8 }
 0x13f   : > { %v654_v10 = vcombine.low %v6315_v61, %v6331_v9  ;;  %v655_v11 = vcombine.high %v6315_v61, %v6331_v9  ;;  %871 = vrot.lane.b32.xlu0 %v6331_v9, %s6154_s6  ;;  %v563_v12 = vpop.permute.xlu0 %562  ;;  %1089 = vrot.lane.b32.xlu1 %v6307_v57, %s6157_s9  ;;  %v1339_v35 = vrot.slane %v6331_v9, 1 }
 0x140   : > { %v624_v60 = vsel %vm612_vm2, %v6303_v54, %v563_v12 }
 0x141   : > { %v507_v13 = vpop.permute.xlu1 %506  ;;  %v6345_v15 = vrot.slane %v655_v11, %v6218_v17  ;;  %v6351_v18 = vrot.slane %v654_v10, %v6218_v17 }
 0x143   : > { %1093 = vrot.lane.b32.xlu0 %v6315_v61, %s6157_s9  ;;  %v585_v20 = vpop.permute.xlu0 %584  ;;  %1097 = vrot.lane.b32.xlu1 %v6321_v2, %s6157_s9  ;;  %v686_v21 = vcombine.low %v6342_v14, %v6345_v15  ;;  %v670_v22 = vcombine.low %v6348_v16, %v6351_v18  ;;  %v671_v23 = vcombine.high %v6348_v16, %v6351_v18 }
 0x144   : > { %v6365_v24 = vsel %vm625_vm1, %v617_v19, %v585_v20  ;;  %v687_v25 = vcombine.high %v6342_v14, %v6345_v15 }
 0x145   : > { %v519_v26 = vpop.permute.xlu1 %518  ;;  %v1330_v29 = vrot.slane %v6365_v24, 1  ;;  %v2025_v48 = vrot.slane %v6365_v24, 2 }
 0x147   : > { %1101 = vrot.lane.b32.xlu0 %v6331_v9, %s6157_s9  ;;  %v597_v28 = vpop.permute.xlu0 %596  ;;  %v6386_v38 = vsel %vm1323_vm3, %v1329_v30, %v1330_v29 }
 0x148   : > { %v6374_v7 = vsel %vm625_vm1, %v623_v27, %v597_v28 }
 0x149   : > { %v722_v31 = vcombine.low %v6365_v24, %v6374_v7  ;;  %v723_v32 = vcombine.high %v6365_v24, %v6374_v7  ;;  %v543_v33 = vpop.permute.xlu1 %542  ;;  %v1340_v34 = vrot.slane %v6374_v7, 1  ;;  %v2035_v54 = vrot.slane %v6374_v7, 2 }
 0x14a   : > { %v614_v46 = vsel %vm612_vm2, %v507_v13, %v543_v33 }
 0x14b   : > { %865 = vrot.lane.b32.xlu0 %v6365_v24, %s6154_s6  ;;  %v581_v37 = vpop.permute.xlu0 %580  ;;  %v6391_v39 = vsel %vm1323_vm3, %v1339_v35, %v1340_v34  ;;  %v6423_v58 = vrot.slane %v722_v31, %v6218_v17  ;;  %v6426_v1 = vrot.slane %v723_v32, %v6218_v17 }
 0x14c   : > { %v1368_v40 = vcombine.low %v6386_v38, %v6391_v39  ;;  %v1369_v41 = vcombine.high %v6386_v38, %v6391_v39  ;;  %v628_v62 = vsel %vm625_vm1, %v615_v53, %v581_v37 }
 0x14d   : > { %v555_v42 = vpop.permute.xlu1 %554  ;;  %v1327_v10 = vrot.slane %v628_v62, 1  ;;  %v2022_v11 = vrot.slane %v628_v62, 2 }
 0x14e   : > { %v620_v3 = vsel %vm612_vm2, %v519_v26, %v555_v42 }
 0x14f   : > { %873 = vrot.lane.b32.xlu0 %v6374_v7, %s6154_s6  ;;  %v587_v44 = vpop.permute.xlu0 %586 }
 0x150   : > { %v631_v45 = vsel %vm625_vm1, %v618_v43, %v587_v44 }
 0x151   : > { %v579_v47 = vpop.permute.xlu1 %578  ;;  %v1332_v55 = vrot.slane %v631_v45, 1  ;;  %v2027_v52 = vrot.slane %v631_v45, 2 }
 0x152   : > { %v6409_v50 = vsel %vm625_vm1, %v614_v46, %v579_v47 }
 0x153   : > { %1095 = vrot.lane.b32.xlu0 %v6365_v24, %s6157_s9  ;;  %v593_v63 = vpop.permute.xlu0 %592  ;;  %861 = vrot.lane.b32.xlu1 %v6409_v50, %s6154_s6  ;;  %v1325_v6 = vrot.slane %v6409_v50, 1  ;;  %v2020_v8 = vrot.slane %v6409_v50, 2  ;;  %v6435_v13 = vsel %vm1323_vm3, %v1330_v29, %v1332_v55  ;;  %v6446_v29 = vsel %vm2018_vm4, %v2025_v48, %v2027_v52 }
 0x154   : > { %v634_v4 = vsel %vm625_vm1, %v621_v59, %v593_v63 }
 0x155   : > { %v591_v5 = vpop.permute.xlu1 %590  ;;  %v1337_v30 = vrot.slane %v634_v4, 1  ;;  %v2032_v31 = vrot.slane %v634_v4, 2  ;;  %v6449_v37 = vsel %vm1323_vm3, %v1325_v6, %v1327_v10  ;;  %v6452_v42 = vsel %vm2018_vm4, %v2020_v8, %v2022_v11 }
 0x156   : > { %v633_v12 = vsel %vm625_vm1, %v620_v3, %v591_v5 }
 0x157   : > { %v706_v19 = vcombine.low %v6409_v50, %v633_v12  ;;  %v707_v20 = vcombine.high %v6409_v50, %v633_v12  ;;  %1103 = vrot.lane.b32.xlu0 %v6374_v7, %s6157_s9  ;;  %v599_v26 = vpop.permute.xlu0 %598  ;;  %869 = vrot.lane.b32.xlu1 %v633_v12, %s6154_s6  ;;  %v1335_v27 = vrot.slane %v633_v12, 1  ;;  %v2030_v28 = vrot.slane %v633_v12, 2 }
 0x158   : > { %v637_v32 = vsel %vm625_vm1, %v624_v60, %v599_v26 }
 0x159   : > { %v1342_v33 = vrot.slane %v637_v32, 1  ;;  %v2037_v35 = vrot.slane %v637_v32, 2  ;;  %v6455_v43 = vrot.slane %v706_v19, %v6218_v17  ;;  %v6458_v44 = vsel %vm1323_vm3, %v1335_v27, %v1337_v30 }
 0x15a   : > { %v6461_v45 = vsel %vm2018_vm4, %v2030_v28, %v2032_v31  ;;  %v6464_v46 = vsel %vm1323_vm3, %v1334_v56, %v1335_v27  ;;  %v1420_v55 = vcombine.low %v6449_v37, %v6458_v44  ;;  %v2029_v56 = vrot.slane %v6321_v2, 2 }
 0x15b   : > { %1794 = vrot.lane.b32.xlu0 %v6435_v13, %s6157_s9  ;;  %1091 = vrot.lane.b32.xlu1 %v6409_v50, %s6157_s9  ;;  %v1343_v47 = vsel %vm1323_vm3, %v1340_v34, %v1342_v33  ;;  %v6476_v53 = vsel %vm2018_vm4, %v2035_v54, %v2037_v35  ;;  %v1421_v62 = vcombine.high %v6449_v37, %v6458_v44 }
 0x15c   : > { %v1436_v59 = vcombine.low %v6435_v13, %v1343_v47  ;;  %v1437_v60 = vcombine.high %v6435_v13, %v1343_v47  ;;  %v2131_v50 = vcombine.low %v6446_v29, %v6476_v53  ;;  %v2132_v34 = vcombine.high %v6446_v29, %v6476_v53 }
 0x15d   : > { %v2115_v63 = vcombine.low %v6452_v42, %v6461_v45  ;;  %v2116_v52 = vcombine.high %v6452_v42, %v6461_v45  ;;  %v6494_v2 = vsel %vm2018_vm4, %v2029_v56, %v2030_v28  ;;  %v6497_v3 = vrot.slane %v707_v20, %v6218_v17 }
 0x15e   : > { %v6500_v4 = vrot.slane %v1436_v59, %v6218_v17  ;;  %v6503_v5 = vrot.slane %v2131_v50, %v6218_v17  ;;  %v6506_v10 = vrot.slane %v1420_v55, %v6218_v17  ;;  %v6516_v19 = vsel %vm1323_vm3, %v1324_v49, %v1325_v6 }
 0x15f   : > { %1802 = vrot.lane.b32.xlu0 %v1343_v47, %s6157_s9  ;;  %1099 = vrot.lane.b32.xlu1 %v633_v12, %s6157_s9  ;;  %v6511_v11 = vrot.slane %v2115_v63, %v6218_v17  ;;  %v6521_v20 = vsel %vm2018_vm4, %v2019_v51, %v2020_v8  ;;  %v6524_v26 = vrot.slane %v1437_v60, %v6218_v17  ;;  %v2034_v49 = vrot.slane %v6331_v9, 2 }
 0x160   : > { %v1353_v12 = vcombine.high %v6516_v19, %v6464_v46  ;;  %v1453_v51 = vcombine.high %v6506_v10, %v6500_v4  ;;  %v739_v6 = vcombine.high %v6455_v43, %v6423_v58  ;;  %v6544_v8 = vrot.slane %v1369_v41, %v6218_v17 }
 0x161   : > { %v754_v31 = vcombine.low %v6497_v3, %v6426_v1  ;;  %v6556_v32 = vrot.slane %v1421_v62, %v6218_v17  ;;  %v6573_v59 = vrot.slane %v2132_v34, %v6218_v17  ;;  %v6576_v60 = vrot.slane %v2116_v52, %v6218_v17 }
 0x162   : > { %v6547_v30 = vrot.slane %v1353_v12, %v6218_v17  ;;  %v2024_v52 = vrot.slane %v6315_v61, 2  ;;  %v6608_v34 = vsel %vm2018_vm4, %v2034_v49, %v2035_v54  ;;  %v1352_v9 = vcombine.low %v6516_v19, %v6464_v46 }
 0x163   : > { %2259 = vrot.lane.b32.xlu0 %v6446_v29, %s6154_s6  ;;  %1790 = vrot.lane.b32.xlu1 %v6449_v37, %s6157_s9  ;;  %v1468_v35 = vcombine.low %v6556_v32, %v6524_v26 }
 0x164   : > { %v1401_v33 = vcombine.high %v6547_v30, %v6544_v8  ;;  %v1400_v41 = vcombine.low %v6547_v30, %v6544_v8  ;;  %v6598_v12 = vsel %vm2018_vm4, %v2024_v52, %v2025_v48  ;;  %v1360_v48 = vrot.slane %v1352_v9, %v6218_v17 }
 0x165   : > { %v6733_v8 = vrot.slane %v687_v25, %v6225_v36 }
 0x167   : > { %2267 = vrot.lane.b32.xlu0 %v6476_v53, %s6154_s6  ;;  %1798 = vrot.lane.b32.xlu1 %v6458_v44, %s6157_s9 }
 0x16b   : > { %1792 = vrot.lane.b32.xlu0 %v6386_v38, %s6157_s9  ;;  %2255 = vrot.lane.b32.xlu1 %v6452_v42, %s6154_s6 }
 0x16f   : > { %1800 = vrot.lane.b32.xlu0 %v6391_v39, %s6157_s9  ;;  %2263 = vrot.lane.b32.xlu1 %v6461_v45, %s6154_s6 }
 0x173   : > { %2257 = vrot.lane.b32.xlu0 %v6598_v12, %s6154_s6  ;;  %1788 = vrot.lane.b32.xlu1 %v6516_v19, %s6157_s9 }
 0x177   : > { %2265 = vrot.lane.b32.xlu0 %v6608_v34, %s6154_s6  ;;  %1796 = vrot.lane.b32.xlu1 %v6464_v46, %s6157_s9 }
 0x17b   : > { %1564 = vrot.lane.b32.xlu0 %v6435_v13, %s6154_s6  ;;  %2253 = vrot.lane.b32.xlu1 %v6521_v20, %s6154_s6 }
 0x17f   : > { %1572 = vrot.lane.b32.xlu0 %v1343_v47, %s6154_s6  ;;  %2261 = vrot.lane.b32.xlu1 %v6494_v2, %s6154_s6 }
 0x183   : > { %1562 = vrot.lane.b32.xlu0 %v6386_v38, %s6154_s6  ;;  %1560 = vrot.lane.b32.xlu1 %v6449_v37, %s6154_s6  ;;  %v1376_v37 = vrot.slane %v1368_v40, %v6218_v17 }
 0x185   : > { %v1385_v47 = vcombine.high %v1360_v48, %v1376_v37 }
 0x187   : > { %1570 = vrot.lane.b32.xlu0 %v6391_v39, %s6154_s6  ;;  %1568 = vrot.lane.b32.xlu1 %v6458_v44, %s6154_s6  ;;  %v6662_v57 = vrot.slane %v1385_v47, %v6225_v36 }
 0x18b   : > { %2485 = vrot.lane.b32.xlu0 %v6452_v42, %s6157_s9  ;;  %1558 = vrot.lane.b32.xlu1 %v6516_v19, %s6154_s6 }
 0x18f   : > { %2489 = vrot.lane.b32.xlu0 %v6446_v29, %s6157_s9  ;;  %1566 = vrot.lane.b32.xlu1 %v6464_v46, %s6154_s6 }
 0x193   : > { %2493 = vrot.lane.b32.xlu0 %v6461_v45, %s6157_s9  ;;  %2483 = vrot.lane.b32.xlu1 %v6521_v20, %s6157_s9 }
 0x197   : > { %2497 = vrot.lane.b32.xlu0 %v6476_v53, %s6157_s9  ;;  %2487 = vrot.lane.b32.xlu1 %v6598_v12, %s6157_s9 }
 0x19b   : > { %2491 = vrot.lane.b32.xlu1 %v6494_v2, %s6157_s9 }
 0x19f   : > { %2495 = vrot.lane.b32.xlu1 %v6608_v34, %s6157_s9 }
 0x1a5   : > { %v860_v61 = vpop.permute.xlu1 %859 }
 0x1a9   : > { %v864_v24 = vpop.permute.xlu0 %863 }
 0x1ad   : > { %v868_v7 = vpop.permute.xlu1 %867 }
 0x1ae   : > { %v883_v54 = vcombine.low %v860_v61, %v868_v7  ;;  %v884_v52 = vcombine.high %v860_v61, %v868_v7 }
 0x1b0   : > { %v891_v44 = vrot.slane %v883_v54, %v6218_v17 }
 0x1b1   : > { %v872_v13 = vpop.permute.xlu0 %871  ;;  %v1090_v29 = vpop.permute.xlu1 %1089 }
 0x1b2   : > { %v899_v42 = vcombine.low %v864_v24, %v872_v13  ;;  %v900_v19 = vcombine.high %v864_v24, %v872_v13  ;;  %v898_v24 = vrot.slane %v884_v52, %v6218_v17  ;;  %v6679_v52 = vrot.slane %v686_v21, %v6225_v36 }
 0x1b4   : > { %v907_v45 = vrot.slane %v899_v42, %v6218_v17  ;;  %v914_v39 = vrot.slane %v900_v19, %v6218_v17 }
 0x1b5   : > { %v1094_v53 = vpop.permute.xlu0 %1093  ;;  %v1098_v46 = vpop.permute.xlu1 %1097 }
 0x1b6   : > { %v916_v49 = vcombine.high %v891_v44, %v907_v45  ;;  %v1113_v9 = vcombine.low %v1090_v29, %v1098_v46  ;;  %v1114_v63 = vcombine.high %v1090_v29, %v1098_v46  ;;  %v932_v46 = vcombine.high %v898_v24, %v914_v39 }
 0x1b8   : > { %v6659_v62 = vrot.slane %v916_v49, %v6225_v36  ;;  %v1121_v61 = vrot.slane %v1113_v9, %v6218_v17  ;;  %v1128_v7 = vrot.slane %v1114_v63, %v6218_v17  ;;  %v931_v49 = vcombine.low %v898_v24, %v914_v39 }
 0x1b9   : > { %v1102_v38 = vpop.permute.xlu0 %1101  ;;  %v915_v39 = vcombine.low %v891_v44, %v907_v45  ;;  %v6696_v21 = vrot.slane %v932_v46, %v6225_v36 }
 0x1ba   : > { %v1129_v40 = vcombine.low %v1094_v53, %v1102_v38  ;;  %v1130_v54 = vcombine.high %v1094_v53, %v1102_v38  ;;  %v5498_v42 = vpack.i.bf16 %v6662_v57, %v6659_v62 }
 0x1bc   : > { %v1137_v13 = vrot.slane %v1129_v40, %v6218_v17  ;;  %v1144_v29 = vrot.slane %v1130_v54, %v6218_v17  ;;  %5499 = vrot.lane.b32.xlu1 %v5498_v42, %s6148_s28  ;;  %v6691_v40 = vrot.slane %v671_v23, %v6225_v36  ;;  %v6708_v23 = vrot.slane %v1401_v33, %v6225_v36 }
 0x1bd   : > { %v6673_v47 = vpop.permute.xlu0 %865 }
 0x1be   : > { %v1146_v19 = vcombine.high %v1121_v61, %v1137_v13  ;;  %v1161_v53 = vcombine.low %v1128_v7, %v1144_v29  ;;  %v1162_v54 = vcombine.high %v1128_v7, %v1144_v29  ;;  %v6715_v7 = vrot.slane %v1400_v41, %v6225_v36 }
 0x1c0   : > { %v6682_v63 = vrot.slane %v1161_v53, %v6225_v36  ;;  %v6685_v9 = vrot.slane %v1146_v19, %v6225_v36  ;;  %v6701_v19 = vrot.slane %v931_v49, %v6225_v36  ;;  %v1384_v53 = vcombine.low %v1360_v48, %v1376_v37 }
 0x1c1   : > { %v874_v38 = vpop.permute.xlu0 %873  ;;  %v6718_v48 = vrot.slane %v915_v39, %v6225_v36  ;;  %v5518_v37 = vpack.i.bf16 %v6708_v23, %v6696_v21  ;;  %v6723_v29 = vrot.slane %v1162_v54, %v6225_v36 }
 0x1c2   : > { %v5513_v42 = vpack.i.bf16 %v6682_v63, %v6679_v52  ;;  %v5503_v24 = vpack.i.bf16 %v6685_v9, %v6691_v40  ;;  %v5508_v33 = vpack.i.bf16 %v6715_v7, %v6701_v19  ;;  %v967_v46 = vcombine.low %v6673_v47, %v874_v38 }
 0x1c3   : > { %9511 = vst [vmem:[#allocation2_spill] sm:$0xff] %v6718_v48  ;;  %v6736_v30 = vrot.slane %v1384_v53, %v6225_v36  ;;  %v5523_v54 = vpack.i.bf16 %v6723_v29, %v6733_v8 }
 0x1c4   : > { %5514 = vrot.lane.b32.xlu0 %v5513_v42, %s6146_s26  ;;  %5504 = vrot.lane.b32.xlu1 %v5503_v24, %s6148_s28  ;;  %v947_v42 = vcombine.high %v6718_v48, %v9480_v0  ;;  %v1145_v24 = vcombine.low %v1121_v61, %v1137_v13 }
 0x1c5   : > { %v1096_v44 = vpop.permute.xlu0 %1095  ;;  %v862_v45 = vpop.permute.xlu1 %861  ;;  %9512 = vst [vmem:[#allocation3_spill] sm:$0xff] %v6736_v30  ;;  %v1416_v15 = vcombine.high %v6736_v30, %v9480_v0 }
 0x1c6   : > { %v6757_v61 = vrot.slane %v1145_v24, %v6225_v36 }
 0x1c7   : > { %v5528_v28 = vpack.i.bf16 %v1416_v15, %v947_v42  ;;  %v6770_v42 = vrot.slane %v1453_v51, %v6225_v36 }
 0x1c8   : > { %5519 = vrot.lane.b32.xlu0 %v5518_v37, %s6147_s27  ;;  %5509 = vrot.lane.b32.xlu1 %v5508_v33, %s6146_s26  ;;  %v6744_v37 = vrot.slane %v967_v46, %v6218_v17  ;;  %9513 = vst [vmem:[#allocation4_spill] sm:$0xff] %v6757_v61 }
 0x1c9   : > { %v1104_v41 = vpop.permute.xlu0 %1103  ;;  %v870_v49 = vpop.permute.xlu1 %869 }
 0x1ca   : > { %v951_v39 = vcombine.low %v862_v45, %v870_v49  ;;  %v952_v13 = vcombine.high %v862_v45, %v870_v49  ;;  %v1197_v46 = vcombine.low %v1096_v44, %v1104_v41  ;;  %v1198_v50 = vcombine.high %v1096_v44, %v1104_v41 }
 0x1cb   : > { %v1177_v44 = vcombine.high %v6757_v61, %v9480_v0 }
 0x1cc   : > { %v6747_v14 = vrot.slane %v951_v39, %v6218_v17  ;;  %5524 = vrot.lane.b32.xlu0 %v5523_v54, %s6147_s27  ;;  %v968_v54 = vcombine.high %v6673_v47, %v874_v38  ;;  %v966_v47 = vrot.slane %v952_v13, %v6218_v17  ;;  %v6784_v41 = vrot.slane %v1197_v46, %v6218_v17 }
 0x1cd   : > { %v6752_v25 = vpop.permute.xlu0 %1794  ;;  %v1092_v53 = vpop.permute.xlu1 %1091 }
 0x1ce   : > { %v984_v33 = vcombine.high %v6747_v14, %v6744_v37  ;;  %v982_v18 = vrot.slane %v968_v54, %v6218_v17 }
 0x1d0   : > { %5529 = vrot.lane.b32.xlu0 %v5528_v28, %s6150_s30  ;;  %v6761_v39 = vrot.slane %v984_v33, %v6225_v36  ;;  %v6776_v28 = vrot.slane %v670_v22, %v6225_v36  ;;  %v1212_v22 = vrot.slane %v1198_v50, %v6218_v17  ;;  %v999_v13 = vcombine.low %v966_v47, %v982_v18 }
 0x1d1   : > { %v6764_v27 = vpop.permute.xlu0 %1802  ;;  %v1100_v56 = vpop.permute.xlu1 %1099  ;;  %v1417_v50 = vcombine.high %v6662_v57, %v9480_v0 }
 0x1d2   : > { %9514 = vst [vmem:[#allocation5_spill] sm:$0xff] %v6776_v28  ;;  %v1181_v45 = vcombine.low %v1092_v53, %v1100_v56  ;;  %v1182_v49 = vcombine.high %v1092_v53, %v1100_v56  ;;  %v5533_v38 = vpack.i.bf16 %v6770_v42, %v6761_v39  ;;  %v702_v15 = vcombine.high %v6776_v28, %v9480_v0 }
 0x1d3   : > { %v948_v53 = vcombine.high %v6659_v62, %v9480_v0  ;;  %v6817_v62 = vrot.slane %v739_v6, %v6225_v36  ;;  %v6835_v6 = vrot.slane %v754_v31, %v6225_v36 }
 0x1d4   : > { %v6787_v51 = vrot.slane %v1181_v45, %v6218_v17  ;;  %v1196_v16 = vrot.slane %v1182_v49, %v6218_v17  ;;  %5534 = vrot.lane.b32.xlu1 %v5533_v38, %s6148_s28  ;;  %v5538_v54 = vpack.i.bf16 %v1177_v44, %v702_v15  ;;  %v1000_v44 = vcombine.high %v966_v47, %v982_v18 }
 0x1d5   : > { %v6793_v56 = vpop.permute.xlu0 %2259  ;;  %v6795_v24 = vpop.permute.xlu1 %1790  ;;  %v5548_v55 = vpack.i.bf16 %v1417_v50, %v948_v53  ;;  %v6841_v47 = vrot.slane %v1468_v35, %v6225_v36  ;;  %v9515_v18 = vmov 0.0  }
 0x1d6   : > { %v1214_v33 = vcombine.high %v6787_v51, %v6784_v41  ;;  %v1229_v46 = vcombine.low %v1196_v16, %v1212_v22  ;;  %v703_v31 = vcombine.high %v6691_v40, %v9515_v18  ;;  %v949_v40 = vcombine.high %v6701_v19, %v9515_v18 }
 0x1d7   : > { %v1418_v48 = vcombine.high %v6715_v7, %v9515_v18  ;;  %v950_v19 = vcombine.high %v6696_v21, %v9515_v18  ;;  %v1213_v7 = vcombine.low %v6787_v51, %v6784_v41  ;;  %v9519_v41 = vcombine.low %v6506_v10, %v6500_v4 }
 0x1d8   : > { %v6806_v45 = vrot.slane %v1214_v33, %v6225_v36  ;;  %5539 = vrot.lane.b32.xlu1 %v5538_v54, %s6150_s30  ;;  %v1237_v15 = vrot.slane %v1229_v46, %v6225_v36  ;;  %v6823_v33 = vrot.slane %v999_v13, %v6225_v36  ;;  %v6849_v46 = vrot.slane %v1000_v44, %v6225_v36 }
 0x1d9   : > { %v6809_v49 = vpop.permute.xlu0 %2267  ;;  %v6811_v38 = vpop.permute.xlu1 %1798  ;;  %v1179_v44 = vcombine.high %v6682_v63, %v9515_v18  ;;  %v6907_v51 = vrot.slane %v9519_v41, %v6225_v36 }
 0x1da   : > { %v5543_v57 = vpack.i.bf16 %v6806_v45, %v6817_v62  ;;  %v5563_v53 = vpack.i.bf16 %v1237_v15, %v6835_v6  ;;  %v5553_v13 = vpack.i.bf16 %v6841_v47, %v6823_v33 }
 0x1db   : > { %9520 = vst [vmem:[#allocation7_spill] sm:$0xff] %v6907_v51 }
 0x1dc   : > { %5549 = vrot.lane.b32.xlu1 %v5548_v55, %s6149_s29  ;;  %5544 = vrot.lane.b32.xlu0 %v5543_v57, %s6148_s28  ;;  %v1178_v55 = vcombine.high %v6685_v9, %v9515_v18  ;;  %v9516_v9 = vcombine.high %v6556_v32, %v6524_v26  ;;  %v704_v26 = vcombine.high %v6679_v52, %v9515_v18 }
 0x1dd   : > { %v6827_v54 = vpop.permute.xlu0 %1792  ;;  %v6829_v0 = vpop.permute.xlu1 %2255 }
 0x1de   : > { %v6863_v57 = vrot.slane %v9516_v9, %v6225_v36  ;;  %v5558_v61 = vpack.i.bf16 %v1178_v55, %v703_v31  ;;  %v6912_v55 = vrot.slane %v1213_v7, %v6225_v36 }
 0x1e0   : > { %5564 = vrot.lane.b32.xlu1 %v5563_v53, %s6146_s26  ;;  %5554 = vrot.lane.b32.xlu0 %v5553_v13, %s6146_s26  ;;  %v983_v53 = vcombine.low %v6747_v14, %v6744_v37  ;;  %v1230_v13 = vcombine.high %v1196_v16, %v1212_v22  ;;  %v5573_v28 = vpack.i.bf16 %v6863_v57, %v6849_v46 }
 0x1e1   : > { %v6855_v35 = vpop.permute.xlu0 %1800  ;;  %v6857_v50 = vpop.permute.xlu1 %2263  ;;  %v5568_v37 = vpack.i.bf16 %v1418_v48, %v949_v40  ;;  %v5578_v16 = vpack.i.bf16 %v1179_v44, %v704_v26  ;;  %v9518_v48 = vcombine.high %v6497_v3, %v6426_v1  ;;  %9521 = vst [vmem:[#allocation8_spill] sm:$0xff] %v6912_v55  ;;  %v2063_v1 = vcombine.low %v6598_v12, %v6608_v34 }
 0x1e2   : > { %v6886_v14 = vrot.slane %v983_v53, %v6225_v36  ;;  %v1244_v52 = vrot.slane %v1230_v13, %v6225_v36  ;;  %v705_v3 = vcombine.high %v6733_v8, %v9515_v18  ;;  %v9522_v40 = vcombine.low %v6455_v43, %v6423_v58 }
 0x1e3   : > { %v769_v22 = vrot.slane %v9518_v48, %v6225_v36  ;;  %v2345_v8 = vcombine.low %v6829_v0, %v6857_v50  ;;  %v9524_v58 = vcombine.low %v6521_v20, %v6494_v2 }
 0x1e4   : > { %5574 = vrot.lane.b32.xlu1 %v5573_v28, %s6147_s27  ;;  %5559 = vrot.lane.b32.xlu0 %v5558_v61, %s6149_s29  ;;  %9517 = vst [vmem:[#allocation6_spill] sm:$0xff] %v6886_v14  ;;  %v1419_v61 = vcombine.high %v6708_v23, %v9515_v18  ;;  %v1180_v23 = vcombine.high %v6723_v29, %v9515_v18 }
 0x1e5   : > { %v6879_v32 = vpop.permute.xlu0 %2257  ;;  %v6881_v63 = vpop.permute.xlu1 %1788  ;;  %v5583_v9 = vpack.i.bf16 %v1244_v52, %v769_v22  ;;  %v1015_v44 = vcombine.high %v6886_v14, %v9515_v18  ;;  %v1484_v29 = vcombine.high %v6907_v51, %v9515_v18  ;;  %v6932_v53 = vrot.slane %v9522_v40, %v6225_v36 }
 0x1e6   : > { %v5588_v31 = vpack.i.bf16 %v1419_v61, %v950_v19  ;;  %v5593_v13 = vpack.i.bf16 %v1180_v23, %v705_v3  ;;  %v1247_v19 = vcombine.high %v1237_v15, %v9515_v18  ;;  %v6948_v43 = vrot.slane %v9524_v58, %v6218_v17 }
 0x1e7   : > { %9523 = vst [vmem:[#allocation9_spill] sm:$0xff] %v6932_v53  ;;  %v5598_v26 = vpack.i.bf16 %v1484_v29, %v1015_v44  ;;  %v1880_v61 = vcombine.low %v6795_v24, %v6811_v38  ;;  %v2361_v15 = vcombine.low %v6793_v56, %v6809_v49  ;;  %v772_v23 = vcombine.high %v6835_v6, %v9515_v18 }
 0x1e8   : > { %5579 = vrot.lane.b32.xlu1 %v5578_v16, %s6144_s24  ;;  %5569 = vrot.lane.b32.xlu0 %v5568_v37, %s6144_s24  ;;  %v1245_v37 = vcombine.high %v6912_v55, %v9515_v18  ;;  %v6942_v16 = vrot.slane %v2063_v1, %v6218_v17  ;;  %v1485_v44 = vcombine.high %v6770_v42, %v9515_v18 }
 0x1e9   : > { %v6895_v28 = vpop.permute.xlu0 %2265  ;;  %v6897_v21 = vpop.permute.xlu1 %1796  ;;  %v1016_v1 = vcombine.high %v6761_v39, %v9515_v18  ;;  %v1018_v3 = vcombine.high %v6849_v46, %v9515_v18  ;;  %v6973_v29 = vrot.slane %v2345_v8, %v6218_v17  ;;  %v5623_v40 = vpack.i.bf16 %v1247_v19, %v772_v23 }
 0x1ea   : > { %v1487_v42 = vcombine.high %v6863_v57, %v9515_v18  ;;  %v771_v39 = vcombine.high %v6817_v62, %v9515_v18  ;;  %v1486_v46 = vcombine.high %v6841_v47, %v9515_v18  ;;  %v6987_v8 = vrot.slane %v2361_v15, %v6218_v17 }
 0x1eb   : > { %v2293_v58 = vcombine.low %v6879_v32, %v6895_v28  ;;  %v1812_v19 = vcombine.low %v6881_v63, %v6897_v21  ;;  %v1248_v15 = vcombine.high %v1244_v52, %v9515_v18  ;;  %v1828_v23 = vcombine.low %v6827_v54, %v6855_v35 }
 0x1ec   : > { %5589 = vrot.lane.b32.xlu1 %v5588_v31, %s6145_s25  ;;  %5584 = vrot.lane.b32.xlu0 %v5583_v9, %s6147_s27  ;;  %v770_v31 = vcombine.high %v6932_v53, %v9515_v18  ;;  %v1896_v9 = vcombine.low %v6752_v25, %v6764_v27  ;;  %v5628_v47 = vpack.i.bf16 %v1487_v42, %v1018_v3 }
 0x1ed   : > { %v6922_v4 = vpop.permute.xlu0 %1564  ;;  %v6924_v10 = vpop.permute.xlu1 %2253  ;;  %v773_v52 = vcombine.high %v769_v22, %v9515_v18  ;;  %v7020_v3 = vrot.slane %v2293_v58, %v6218_v17  ;;  %v1017_v58 = vcombine.high %v6823_v33, %v9515_v18  ;;  %v1897_v53 = vcombine.high %v6752_v25, %v6764_v27 }
 0x1ee   : > { %v7000_v62 = vrot.slane %v1896_v9, %v6218_v17 }
 0x1f0   : > { %5599 = vrot.lane.b32.xlu1 %v5598_v26, %s6150_s30  ;;  %5594 = vrot.lane.b32.xlu0 %v5593_v13, %s6145_s25  ;;  %v5603_v13 = vpack.i.bf16 %v1245_v37, %v770_v31  ;;  %v6978_v26 = vrot.slane %v1880_v61, %v6218_v17  ;;  %v5608_v61 = vpack.i.bf16 %v1485_v44, %v1016_v1 }
 0x1f1   : > { %v6956_v48 = vpop.permute.xlu0 %1572  ;;  %v6958_v41 = vpop.permute.xlu1 %2261  ;;  %v2378_v31 = vcombine.high %v6973_v29, %v6987_v8  ;;  %v2346_v44 = vcombine.high %v6829_v0, %v6857_v50  ;;  %v2362_v50 = vcombine.high %v6793_v56, %v6809_v49  ;;  %v5633_v1 = vpack.i.bf16 %v1248_v15, %v773_v52 }
 0x1f2   : > { %v2277_v6 = vcombine.low %v6924_v10, %v6958_v41  ;;  %v1913_v9 = vcombine.high %v6978_v26, %v7000_v62  ;;  %v1881_v56 = vcombine.high %v6795_v24, %v6811_v38  ;;  %v2294_v38 = vcombine.high %v6879_v32, %v6895_v28 }
 0x1f3   : > { %v7053_v15 = vrot.slane %v2346_v44, %v6218_v17  ;;  %v7065_v24 = vrot.slane %v2362_v50, %v6218_v17  ;;  %v1829_v28 = vcombine.high %v6827_v54, %v6855_v35 }
 0x1f4   : > { %5624 = vrot.lane.b32.xlu1 %v5623_v40, %s6144_s24  ;;  %5604 = vrot.lane.b32.xlu0 %v5603_v13, %s6150_s30  ;;  %v7008_v40 = vrot.slane %v2277_v6, %v6218_v17  ;;  %v1246_v13 = vcombine.high %v6806_v45, %v9515_v18  ;;  %v7023_v6 = vrot.slane %v1812_v19, %v6218_v17 }
 0x1f5   : > { %v6995_v57 = vpop.permute.xlu0 %1562  ;;  %v6997_v37 = vpop.permute.xlu1 %1560  ;;  %v1666_v45 = vcombine.low %v6922_v4, %v6956_v48  ;;  %v7035_v19 = vrot.slane %v1828_v23, %v6218_v17  ;;  %v7050_v33 = vrot.slane %v1913_v9, %v6225_v36  ;;  %v1813_v9 = vcombine.high %v6881_v63, %v6897_v21 }
 0x1f6   : > { %v2310_v7 = vcombine.high %v7008_v40, %v7020_v3  ;;  %v7084_v32 = vrot.slane %v1881_v56, %v6218_v17  ;;  %v2393_v21 = vcombine.low %v7053_v15, %v7065_v24  ;;  %v2394_v51 = vcombine.high %v7053_v15, %v7065_v24 }
 0x1f7   : > { %v7058_v23 = vrot.slane %v1666_v45, %v6218_v17  ;;  %v7081_v45 = vrot.slane %v1897_v53, %v6218_v17  ;;  %v9530_v15 = vcombine.low %v6576_v60, %v6573_v59 }
 0x1f8   : > { %5629 = vrot.lane.b32.xlu1 %v5628_v47, %s6145_s25  ;;  %5609 = vrot.lane.b32.xlu0 %v5608_v61, %s6149_s29  ;;  %v5613_v47 = vpack.i.bf16 %v1246_v13, %v771_v39  ;;  %v7040_v61 = vrot.slane %v2378_v31, %v6225_v36  ;;  %v1845_v39 = vcombine.high %v7023_v6, %v7035_v19 }
 0x1f9   : > { %v1571_v42 = vpop.permute.xlu0 %1570  ;;  %v1569_v0 = vpop.permute.xlu1 %1568  ;;  %v2278_v31 = vcombine.high %v6924_v10, %v6958_v41  ;;  %v5618_v13 = vpack.i.bf16 %v1486_v46, %v1017_v58  ;;  %v7223_v24 = vrot.slane %v9530_v15, %v6225_v36 }
 0x1fa   : > { %v1650_v22 = vcombine.low %v6997_v37, %v1569_v0  ;;  %v5638_v52 = vpack.i.bf16 %v7040_v61, %v7050_v33  ;;  %v1598_v63 = vcombine.low %v6995_v57, %v1571_v42  ;;  %v1599_v10 = vcombine.high %v6995_v57, %v1571_v42 }
 0x1fb   : > { %v7097_v41 = vrot.slane %v1845_v39, %v6225_v36  ;;  %v2292_v46 = vrot.slane %v2278_v31, %v6218_v17  ;;  %v1651_v54 = vcombine.high %v6997_v37, %v1569_v0  ;;  %v7103_v57 = vrot.slane %v1813_v9, %v6218_v17 }
 0x1fc   : > { %v7047_v49 = vrot.slane %v1650_v22, %v6218_v17  ;;  %5634 = vrot.lane.b32.xlu1 %v5633_v1, %s6145_s25  ;;  %5614 = vrot.lane.b32.xlu0 %v5613_v47, %s6149_s29  ;;  %v7078_v1 = vrot.slane %v2310_v7, %v6225_v36  ;;  %v2308_v22 = vrot.slane %v2294_v38, %v6218_v17 }
 0x1fd   : > { %v7062_v27 = vpop.permute.xlu0 %2485  ;;  %v1559_v25 = vpop.permute.xlu1 %1558  ;;  %9525 = vst [vmem:[#allocation10_spill] sm:$0xff] %v7097_v41  ;;  %v1667_v47 = vcombine.high %v6922_v4, %v6956_v48  ;;  %v7113_v56 = vrot.slane %v1598_v63, %v6218_v17  ;;  %v9526_v39 = vcombine.high %v6521_v20, %v6494_v2  ;;  %v1928_v38 = vcombine.low %v7084_v32, %v7081_v45 }
 0x1fe   : > { %v1683_v44 = vcombine.high %v7047_v49, %v7058_v23  ;;  %v5643_v42 = vpack.i.bf16 %v7078_v1, %v7097_v41  ;;  %v7130_v4 = vrot.slane %v1599_v10, %v6218_v17  ;;  %v1843_v2 = vrot.slane %v1829_v28, %v6218_v17 }
 0x1ff   : > { %v2325_v20 = vcombine.low %v2292_v46, %v2308_v22  ;;  %v9528_v63 = vcombine.high %v6598_v12, %v6608_v34  ;;  %v7160_v28 = vrot.slane %v2393_v21, %v6225_v36  ;;  %v9529_v34 = vcombine.high %v6948_v43, %v6942_v16 }
 0x200   : > { %5619 = vrot.lane.b32.xlu0 %v5618_v13, %s6144_s24  ;;  %5639 = vrot.lane.b32.xlu1 %v5638_v52, %s6148_s28  ;;  %v7108_v58 = vrot.slane %v1683_v44, %v6225_v36  ;;  %v9527_v13 = vcombine.high %v6511_v11, %v6503_v5  ;;  %v7145_v44 = vrot.slane %v1651_v54, %v6218_v17 }
 0x201   : > { %v7094_v7 = vpop.permute.xlu0 %2489  ;;  %v1567_v53 = vpop.permute.xlu1 %1566  ;;  %v7153_v10 = vrot.slane %v9528_v63, %v6218_v17  ;;  %v1860_v54 = vcombine.low %v7103_v57, %v1843_v2  ;;  %v7173_v12 = vrot.slane %v9529_v34, %v6225_v36  ;;  %v7177_v21 = vrot.slane %v1928_v38, %v6225_v36 }
 0x202   : > { %v1582_v35 = vcombine.low %v1559_v25, %v1567_v53  ;;  %v1583_v50 = vcombine.high %v1559_v25, %v1567_v53  ;;  %v7125_v25 = vrot.slane %v9526_v39, %v6218_v17  ;;  %v7141_v9 = vrot.slane %v9527_v13, %v6225_v36 }
 0x203   : > { %v2326_v63 = vcombine.high %v2292_v46, %v2308_v22  ;;  %v7186_v34 = vrot.slane %v2325_v20, %v6225_v36  ;;  %v5653_v14 = vpack.i.bf16 %v7160_v28, %v7177_v21  ;;  %v1929_v46 = vcombine.high %v7084_v32, %v7081_v45 }
 0x204   : > { %v7116_v37 = vrot.slane %v1582_v35, %v6218_v17  ;;  %v7119_v0 = vrot.slane %v1583_v50, %v6218_v17  ;;  %5644 = vrot.lane.b32.xlu1 %v5643_v42, %s6148_s28  ;;  %v5648_v35 = vpack.i.bf16 %v7141_v9, %v7108_v58  ;;  %v7164_v50 = vrot.slane %v1667_v47, %v6218_v17 }
 0x205   : > { %v7133_v48 = vpop.permute.xlu0 %2493  ;;  %v7135_v31 = vpop.permute.xlu1 %2483  ;;  %v2095_v47 = vcombine.low %v7125_v25, %v7153_v10  ;;  %v7198_v22 = vrot.slane %v1860_v54, %v6225_v36  ;;  %v2096_v20 = vcombine.high %v7125_v25, %v7153_v10  ;;  %v1861_v30 = vcombine.high %v7103_v57, %v1843_v2 }
 0x206   : > { %v1615_v52 = vcombine.high %v7116_v37, %v7113_v56  ;;  %v1630_v53 = vcombine.low %v7119_v0, %v7130_v4  ;;  %v7214_v32 = vrot.slane %v2326_v63, %v6225_v36  ;;  %v2377_v54 = vcombine.low %v6973_v29, %v6987_v8 }
 0x207   : > { %v7209_v45 = vrot.slane %v2095_v47, %v6225_v36  ;;  %v7248_v29 = vrot.slane %v1861_v30, %v6225_v36  ;;  %v7251_v8 = vrot.slane %v2394_v51, %v6225_v36  ;;  %v7286_v15 = vrot.slane %v2096_v20, %v6225_v36 }
 0x208   : > { %v7167_v42 = vrot.slane %v1615_v52, %v6225_v36  ;;  %5649 = vrot.lane.b32.xlu1 %v5648_v35, %s6148_s28  ;;  %v1698_v52 = vcombine.low %v7145_v44, %v7164_v50  ;;  %v7192_v38 = vrot.slane %v1630_v53, %v6225_v36  ;;  %v2575_v53 = vcombine.low %v7062_v27, %v7133_v48 }
 0x209   : > { %v2498_v39 = vpop.permute.xlu0 %2497  ;;  %v2488_v13 = vpop.permute.xlu1 %2487  ;;  %v5683_v30 = vpack.i.bf16 %v7214_v32, %v7248_v29  ;;  %v9531_v20 = vcombine.high %v6576_v60, %v6573_v59  ;;  %v1682_v60 = vcombine.low %v7047_v49, %v7058_v23 }
 0x20a   : > { %v5658_v55 = vpack.i.bf16 %v7173_v12, %v7167_v42  ;;  %v2591_v35 = vcombine.low %v7094_v7, %v2498_v39  ;;  %v7217_v25 = vrot.slane %v1698_v52, %v6225_v36  ;;  %v2592_v57 = vcombine.high %v7094_v7, %v2498_v39 }
 0x20b   : > { %v5678_v10 = vpack.i.bf16 %v7209_v45, %v7192_v38  ;;  %v7239_v52 = vrot.slane %v1929_v46, %v6225_v36  ;;  %v1699_v7 = vcombine.high %v7145_v44, %v7164_v50  ;;  %v7351_v23 = vrot.slane %v1682_v60, %v6225_v36 }
 0x20c   : > { %5659 = vrot.lane.b32.xlu0 %v5658_v55, %s6148_s28  ;;  %5654 = vrot.lane.b32.xlu1 %v5653_v14, %s6146_s26  ;;  %v5663_v55 = vpack.i.bf16 %v7186_v34, %v7198_v22  ;;  %v1631_v14 = vcombine.high %v7119_v0, %v7130_v4  ;;  %v7229_v2 = vrot.slane %v2591_v35, %v6218_v17 }
 0x20d   : > { %v2492_v41 = vpop.permute.xlu1 %2491  ;;  %v7244_v0 = vrot.slane %v2575_v53, %v6218_v17  ;;  %v5668_v44 = vpack.i.bf16 %v7223_v24, %v7217_v25  ;;  %v7258_v50 = vrot.slane %v2592_v57, %v6218_v17  ;;  %v1912_v53 = vcombine.low %v6978_v26, %v7000_v62 }
 0x20e   : > { %v2507_v47 = vcombine.low %v7135_v31, %v2492_v41  ;;  %v2508_v63 = vcombine.high %v7135_v31, %v2492_v41  ;;  %v2576_v41 = vcombine.high %v7062_v27, %v7133_v48  ;;  %v7265_v51 = vrot.slane %v1631_v14, %v6225_v36 }
 0x20f   : > { %v2608_v35 = vcombine.high %v7244_v0, %v7229_v2  ;;  %v5673_v14 = vpack.i.bf16 %v7251_v8, %v7239_v52  ;;  %v7298_v62 = vrot.slane %v1699_v7, %v6225_v36 }
 0x210   : > { %5664 = vrot.lane.b32.xlu0 %v5663_v55, %s6146_s26  ;;  %5679 = vrot.lane.b32.xlu1 %v5678_v10, %s6146_s26  ;;  %v7268_v46 = vrot.slane %v2507_v47, %v6218_v17  ;;  %v7271_v27 = vrot.slane %v2508_v63, %v6218_v17  ;;  %v2309_v55 = vcombine.low %v7008_v40, %v7020_v3 }
 0x211   : > { %v2496_v4 = vpop.permute.xlu1 %2495  ;;  %v7291_v57 = vrot.slane %v2576_v41, %v6218_v17  ;;  %v7301_v40 = vrot.slane %v2377_v54, %v6225_v36  ;;  %v5693_v3 = vpack.i.bf16 %v7286_v15, %v7265_v51  ;;  %v7309_v47 = vrot.slane %v9531_v20, %v6225_v36 }
 0x212   : > { %v2523_v31 = vcombine.low %v2488_v13, %v2496_v4  ;;  %v2524_v39 = vcombine.high %v2488_v13, %v2496_v4  ;;  %v1844_v63 = vcombine.low %v7023_v6, %v7035_v19  ;;  %v7320_v7 = vrot.slane %v2608_v35, %v6225_v36 }
 0x213   : > { %v2623_v4 = vcombine.low %v7291_v57, %v7258_v50  ;;  %v7323_v41 = vrot.slane %v1912_v53, %v6225_v36  ;;  %v7326_v59 = vrot.slane %v2309_v55, %v6225_v36  ;;  %v5688_v6 = vpack.i.bf16 %v7309_v47, %v7298_v62 }
 0x214   : > { %v7274_v48 = vrot.slane %v2523_v31, %v6218_v17  ;;  %v7277_v13 = vrot.slane %v2524_v39, %v6218_v17  ;;  %5669 = vrot.lane.b32.xlu0 %v5668_v44, %s6146_s26  ;;  %5684 = vrot.lane.b32.xlu1 %v5683_v30, %s6147_s27  ;;  %v2409_v39 = vcombine.high %v7301_v40, %v9515_v18 }
 0x215   : > { %v7341_v44 = vrot.slane %v1844_v63, %v6225_v36  ;;  %v7345_v35 = vrot.slane %v2623_v4, %v6225_v36  ;;  %v1944_v49 = vcombine.high %v7323_v41, %v9515_v18  ;;  %v2341_v53 = vcombine.high %v7326_v59, %v9515_v18 }
 0x216   : > { %v2540_v10 = vcombine.high %v7268_v46, %v7274_v48  ;;  %v2555_v26 = vcombine.low %v7271_v27, %v7277_v13  ;;  %v2180_v20 = vcombine.high %v7141_v9, %v9515_v18  ;;  %v1614_v63 = vcombine.low %v7116_v37, %v7113_v56 }
 0x217   : > { %v5708_v55 = vpack.i.bf16 %v2409_v39, %v1944_v49  ;;  %v1714_v4 = vcombine.high %v7351_v23, %v9515_v18  ;;  %v1946_v56 = vcombine.high %v7177_v21, %v9515_v18  ;;  %v2112_v21 = vcombine.high %v7173_v12, %v9515_v18 }
 0x218   : > { %5674 = vrot.lane.b32.xlu0 %v5673_v14, %s6147_s27  ;;  %v7317_v54 = vrot.slane %v2540_v10, %v6225_v36  ;;  %5694 = vrot.lane.b32.xlu1 %v5693_v3, %s6147_s27  ;;  %v7336_v31 = vrot.slane %v2555_v26, %v6225_v36  ;;  %v1715_v14 = vcombine.high %v7108_v58, %v9515_v18 }
 0x219   : > { %v1876_v10 = vcombine.high %v7341_v44, %v9515_v18  ;;  %v9532_v26 = vcombine.low %v6511_v11, %v6503_v5  ;;  %v2079_v5 = vcombine.low %v6948_v43, %v6942_v16  ;;  %v7386_v37 = vrot.slane %v1614_v63, %v6225_v36 }
 0x21a   : > { %v5698_v19 = vpack.i.bf16 %v7320_v7, %v7317_v54  ;;  %v5703_v30 = vpack.i.bf16 %v7345_v35, %v7336_v31  ;;  %v5738_v60 = vpack.i.bf16 %v2180_v20, %v1715_v14  ;;  %v1647_v16 = vcombine.high %v7167_v42, %v9515_v18 }
 0x21b   : > { %v7366_v3 = vrot.slane %v9532_v26, %v6225_v36  ;;  %v5713_v58 = vpack.i.bf16 %v2341_v53, %v1876_v10  ;;  %v1945_v43 = vcombine.high %v7050_v33, %v9515_v18  ;;  %v7396_v39 = vrot.slane %v2079_v5, %v6225_v36 }
 0x21c   : > { %5689 = vrot.lane.b32.xlu0 %v5688_v6, %s6147_s27  ;;  %5699 = vrot.lane.b32.xlu1 %v5698_v19, %s6148_s28  ;;  %v2411_v6 = vcombine.high %v7160_v28, %v9515_v18  ;;  %v2410_v28 = vcombine.high %v7040_v61, %v9515_v18  ;;  %v1646_v61 = vcombine.high %v7386_v37, %v9515_v18 }
 0x21d   : > { %v2179_v11 = vcombine.high %v7366_v3, %v9515_v18  ;;  %v2343_v42 = vcombine.high %v7186_v34, %v9515_v18  ;;  %v2111_v33 = vcombine.high %v7396_v39, %v9515_v18  ;;  %v1878_v53 = vcombine.high %v7198_v22, %v9515_v18  ;;  %v9533_v34 = vld [vmem:[#allocation10_spill] sm:$0xff] }
 0x21e   : > { %v5743_v19 = vpack.i.bf16 %v2411_v6, %v1946_v56  ;;  %v5723_v49 = vpack.i.bf16 %v2410_v28, %v1945_v43  ;;  %v2342_v12 = vcombine.high %v7078_v1, %v9515_v18  ;;  %v1648_v10 = vcombine.high %v7192_v38, %v9515_v18 }
 0x21f   : > { %v5718_v9 = vpack.i.bf16 %v2179_v11, %v1714_v4  ;;  %v5753_v14 = vpack.i.bf16 %v2343_v42, %v1878_v53  ;;  %v1877_v26 = vcombine.high %v9533_v34, %v9515_v18  ;;  %v2113_v20 = vcombine.high %v7209_v45, %v9515_v18 }
 0x220   : > { %5704 = vrot.lane.b32.xlu0 %v5703_v30, %s6146_s26  ;;  %5709 = vrot.lane.b32.xlu1 %v5708_v55, %s6150_s30  ;;  %v5748_v30 = vpack.i.bf16 %v2112_v21, %v1647_v16  ;;  %v5728_v55 = vpack.i.bf16 %v2111_v33, %v1646_v61  ;;  %v2539_v22 = vcombine.low %v7268_v46, %v7274_v48 }
 0x221   : > { %v5733_v63 = vpack.i.bf16 %v2342_v12, %v1877_v26  ;;  %v1716_v1 = vcombine.high %v7217_v25, %v9515_v18  ;;  %v2344_v38 = vcombine.high %v7214_v32, %v9515_v18  ;;  %v2607_v4 = vcombine.low %v7244_v0, %v7229_v2 }
 0x222   : > { %v1879_v45 = vcombine.high %v7248_v29, %v9515_v18  ;;  %v7436_v46 = vrot.slane %v2539_v22, %v6225_v36  ;;  %v2412_v32 = vcombine.high %v7251_v8, %v9515_v18  ;;  %v2556_v2 = vcombine.high %v7271_v27, %v7277_v13 }
 0x223   : > { %v2572_v48 = vcombine.high %v7317_v54, %v9515_v18  ;;  %v1947_v29 = vcombine.high %v7239_v52, %v9515_v18  ;;  %v2624_v6 = vcombine.high %v7291_v57, %v7258_v50  ;;  %v2640_v27 = vcombine.high %v7320_v7, %v9515_v18 }
 0x224   : > { %5714 = vrot.lane.b32.xlu0 %v5713_v58, %s6150_s30  ;;  %5739 = vrot.lane.b32.xlu1 %v5738_v60, %s6149_s29  ;;  %v5768_v58 = vpack.i.bf16 %v2113_v20, %v1648_v10  ;;  %v2181_v60 = vcombine.high %v7223_v24, %v9515_v18  ;;  %v5773_v0 = vpack.i.bf16 %v2344_v38, %v1879_v45 }
 0x225   : > { %v7445_v24 = vrot.slane %v2607_v4, %v6225_v36  ;;  %v5763_v13 = vpack.i.bf16 %v2412_v32, %v1947_v29  ;;  %v2571_v54 = vcombine.high %v7436_v46, %v9515_v18  ;;  %v2570_v11 = vrot.slane %v2556_v2, %v6225_v36 }
 0x226   : > { %v5758_v25 = vpack.i.bf16 %v2181_v60, %v1716_v1  ;;  %v5798_v56 = vpack.i.bf16 %v2640_v27, %v2572_v48  ;;  %v2573_v52 = vcombine.high %v7336_v31, %v9515_v18  ;;  %v2638_v57 = vrot.slane %v2624_v6, %v6225_v36 }
 0x227   : > { %v2639_v50 = vcombine.high %v7445_v24, %v9515_v18  ;;  %v2641_v7 = vcombine.high %v7345_v35, %v9515_v18  ;;  %v2574_v43 = vcombine.high %v2570_v11, %v9515_v18  ;;  %v2182_v21 = vcombine.high %v7309_v47, %v9515_v18 }
 0x228   : > { %5719 = vrot.lane.b32.xlu0 %v5718_v9, %s6150_s30  ;;  %5744 = vrot.lane.b32.xlu1 %v5743_v19, %s6144_s24  ;;  %v1717_v19 = vcombine.high %v7298_v62, %v9515_v18  ;;  %v1649_v35 = vcombine.high %v7265_v51, %v9515_v18  ;;  %v2114_v42 = vcombine.high %v7286_v15, %v9515_v18  ;;  %v228_v15 = vld [vmem:[%s9476_s2] sm:$0xf] }
 0x229   : > { %v5778_v28 = vpack.i.bf16 %v2639_v50, %v2571_v54  ;;  %v5803_v31 = vpack.i.bf16 %v2641_v7, %v2573_v52  ;;  %v5793_v51 = vpack.i.bf16 %v2638_v57, %v2570_v11 }
 0x22a   : > { %v5783_v61 = vpack.i.bf16 %v2182_v21, %v1717_v19  ;;  %v5788_v47 = vpack.i.bf16 %v2114_v42, %v1649_v35  ;;  %v9536_v19 = vld [vmem:[#allocation4_spill] sm:$0xff] }
 0x22c   : > { %5724 = vrot.lane.b32.xlu0 %v5723_v49, %s6149_s29  ;;  %5749 = vrot.lane.b32.xlu1 %v5748_v30, %s6149_s29  ;;  %v2642_v49 = vcombine.high %v2638_v57, %v9515_v18 }
 0x22e   : > { %v7452_v5 = vpop.permute.xlu1 %5499  ;;  %v5808_v62 = vpack.i.bf16 %v2642_v49, %v2574_v43 }
 0x22f   : > { %v5502_v60 = vunpack.i.h.bf16 %v7452_v5  ;;  %v5501_v45 = vunpack.i.l.bf16 %v7452_v5  ;;  %v9534_v5 = vld [vmem:[#allocation3_spill] sm:$0xff] }
 0x230   : > { %5729 = vrot.lane.b32.xlu0 %v5728_v55, %s6150_s30  ;;  %5754 = vrot.lane.b32.xlu1 %v5753_v14, %s6144_s24  ;;  %v6158_v55 = vmov 0  }
 0x231   : > { %2800 = vmatprep.mubr.bf16.mxu0 %v6158_v55  ;;  %5813 = vset.pattern.permute.xlu0 %v6158_v55 }
 0x232   : > { %5358 = vmatprep.mubr.bf16.mxu1 %v6158_v55  ;;  %6129 = vset.pattern.permute.xlu1 %v6158_v55 }
 0x234   : > { %5734 = vrot.lane.b32.xlu0 %v5733_v63, %s6149_s29  ;;  %5769 = vrot.lane.b32.xlu1 %v5768_v58, %s6144_s24 }
 0x236   : > { %v7454_v8 = vpop.permute.xlu0 %5514  ;;  %v7468_v9 = vpop.permute.xlu1 %5504 }
 0x237   : > { %v5516_v32 = vunpack.i.l.bf16 %v7454_v8  ;;  %v5507_v48 = vunpack.i.h.bf16 %v7468_v9  ;;  %v5506_v29 = vunpack.i.l.bf16 %v7468_v9 }
 0x238   : > { %5759 = vrot.lane.b32.xlu0 %v5758_v25, %s6144_s24  ;;  %5774 = vrot.lane.b32.xlu1 %v5773_v0, %s6145_s25  ;;  %v5517_v25 = vunpack.i.h.bf16 %v7454_v8 }
 0x23a   : > { %v7475_v16 = vpop.permute.xlu0 %5519  ;;  %v7485_v30 = vpop.permute.xlu1 %5509 }
 0x23b   : > { %v5522_v6 = vunpack.i.h.bf16 %v7475_v16  ;;  %v5521_v27 = vunpack.i.l.bf16 %v7475_v16  ;;  %v5512_v57 = vunpack.i.h.bf16 %v7485_v30  ;;  %v5511_v9 = vunpack.i.l.bf16 %v7485_v30 }
 0x23c   : > { %5764 = vrot.lane.b32.xlu0 %v5763_v13, %s6145_s25  ;;  %5799 = vrot.lane.b32.xlu1 %v5798_v56, %s6149_s29  ;;  %v9535_v56 = vld [vmem:[#allocation2_spill] sm:$0xff] }
 0x23e   : > { %v7490_v33 = vpop.permute.xlu0 %5524 }
 0x23f   : > { %v5527_v7 = vunpack.i.h.bf16 %v7490_v33 }
 0x240   : > { %5779 = vrot.lane.b32.xlu0 %v5778_v28, %s6150_s30  ;;  %5804 = vrot.lane.b32.xlu1 %v5803_v31, %s6144_s24  ;;  %v5526_v28 = vunpack.i.l.bf16 %v7490_v33  ;;  %v9537_v31 = vld [vmem:[#allocation5_spill] sm:$0xff] }
 0x242   : > { %v5530_v12 = vpop.permute.xlu0 %5529 }
 0x243   : > { %v5532_v38 = vunpack.i.h.bf16 %v5530_v12  ;;  %v5531_v4 = vunpack.i.l.bf16 %v5530_v12 }
 0x244   : > { %5784 = vrot.lane.b32.xlu0 %v5783_v61, %s6145_s25  ;;  %5809 = vrot.lane.b32.xlu1 %v5808_v62, %s6145_s25 }
 0x245   : > { %v1544_v11 = vsel %vm830_vm5, %v9534_v5, %v5532_v38  ;;  %v1075_v52 = vsel %vm830_vm5, %v9535_v56, %v5531_v4 }
 0x246   : > { %v7493_v53 = vpop.permute.xlu1 %5534  ;;  %v1076_v62 = vsel %vm832_vm6, %v1075_v52, %v5501_v45  ;;  %v1545_v30 = vsel %vm832_vm6, %v1544_v11, %v5502_v60 }
 0x247   : > { %v5537_v61 = vunpack.i.h.bf16 %v7493_v53  ;;  %v5536_v35 = vunpack.i.l.bf16 %v7493_v53 }
 0x248   : > { %5789 = vrot.lane.b32.xlu0 %v5788_v47, %s6145_s25 }
 0x24a   : > { %v5540_v14 = vpop.permute.xlu1 %5539 }
 0x24b   : > { %v5542_v2 = vunpack.i.h.bf16 %v5540_v14  ;;  %v5541_v0 = vunpack.i.l.bf16 %v5540_v14 }
 0x24c   : > { %5794 = vrot.lane.b32.xlu0 %v5793_v51, %s6147_s27 }
 0x24d   : > { %v1305_v16 = vsel %vm830_vm5, %v9536_v19, %v5542_v2  ;;  %v831_v43 = vsel %vm830_vm5, %v9537_v31, %v5541_v0 }
 0x24e   : > { %v7500_v10 = vpop.permute.xlu0 %5544  ;;  %v5550_v34 = vpop.permute.xlu1 %5549 }
 0x24f   : > { %v5552_v8 = vunpack.i.h.bf16 %v5550_v34  ;;  %v5551_v50 = vunpack.i.l.bf16 %v5550_v34  ;;  %v5547_v14 = vunpack.i.h.bf16 %v7500_v10  ;;  %v833_v34 = vsel %vm832_vm6, %v831_v43, %v5506_v29 }
 0x250   : > { %2754 = vperm.xlu0 %5813, %v228_v15   ;;  %v5546_v15 = vunpack.i.l.bf16 %v7500_v10 }
 0x251   : > { %v1077_v47 = vsel %vm834_vm7, %v1076_v62, %v5551_v50  ;;  %v1546_v55 = vsel %vm834_vm7, %v1545_v30, %v5552_v8 }
 0x252   : > { %v7502_v26 = vpop.permute.xlu0 %5554  ;;  %v7504_v20 = vpop.permute.xlu1 %5564  ;;  %v1078_v0 = vsel %vm836_vm8, %v1077_v47, %v5511_v9  ;;  %v1547_v10 = vsel %vm836_vm8, %v1546_v55, %v5512_v57  ;;  %v9538_v55 = vld [vmem:[#allocation7_spill] sm:$0xff] }
 0x253   : > { %v5557_v2 = vunpack.i.h.bf16 %v7502_v26  ;;  %v5567_v43 = vunpack.i.h.bf16 %v7504_v20 }
 0x256   : > { %v5560_v22 = vpop.permute.xlu0 %5559  ;;  %v7506_v63 = vpop.permute.xlu1 %5574 }
 0x257   : > { %v5562_v21 = vunpack.i.h.bf16 %v5560_v22  ;;  %v5561_v49 = vunpack.i.l.bf16 %v5560_v22  ;;  %v1306_v22 = vsel %vm832_vm6, %v1305_v16, %v5507_v48  ;;  %v5576_v30 = vunpack.i.l.bf16 %v7506_v63 }
 0x259   : > { %v835_v38 = vsel %vm834_vm7, %v833_v34, %v5561_v49  ;;  %v1307_v4 = vsel %vm834_vm7, %v1306_v22, %v5562_v21  ;;  %v5566_v21 = vunpack.i.l.bf16 %v7504_v20  ;;  %v9540_v22 = vld [vmem:[#allocation8_spill] sm:$0xff] }
 0x25a   : > { %v5570_v1 = vpop.permute.xlu0 %5569  ;;  %v7508_v58 = vpop.permute.xlu1 %5579  ;;  %v837_v8 = vsel %vm836_vm8, %v835_v38, %v5516_v32  ;;  %v9541_v38 = vld [vmem:[#allocation9_spill] sm:$0xff] }
 0x25b   : > { %v5572_v51 = vunpack.i.h.bf16 %v5570_v1  ;;  %v5571_v12 = vunpack.i.l.bf16 %v5570_v1  ;;  %v5582_v60 = vunpack.i.h.bf16 %v7508_v58  ;;  %v5581_v45 = vunpack.i.l.bf16 %v7508_v58 }
 0x25c   : > { %v5556_v1 = vunpack.i.l.bf16 %v7502_v26  ;;  %v1308_v58 = vsel %vm836_vm8, %v1307_v4, %v5517_v25  ;;  %v5577_v25 = vunpack.i.h.bf16 %v7506_v63 }
 0x25d   : > { %v1079_v48 = vsel %vm838_vm9, %v1078_v0, %v5571_v12  ;;  %v1548_v11 = vsel %vm838_vm9, %v1547_v10, %v5572_v51  ;;  %v839_v16 = vsel %vm838_vm9, %v837_v8, %v5581_v45  ;;  %v1309_v9 = vsel %vm838_vm9, %v1308_v58, %v5582_v60  ;;  %v9539_v12 = vld [vmem:[#allocation6_spill] sm:$0xff] }
 0x25e   : > { %v7518_v13 = vpop.permute.xlu0 %5584  ;;  %v5590_v54 = vpop.permute.xlu1 %5589  ;;  %v1549_v32 = vsel %vm840_vm10, %v1548_v11, %v5522_v6  ;;  %v841_v34 = vsel %vm840_vm10, %v839_v16, %v5526_v28 }
 0x25f   : > { %v5592_v56 = vunpack.i.h.bf16 %v5590_v54  ;;  %v5591_v52 = vunpack.i.l.bf16 %v5590_v54  ;;  %v1080_v54 = vsel %vm840_vm10, %v1079_v48, %v5521_v27  ;;  %v1310_v27 = vsel %vm840_vm10, %v1309_v9, %v5527_v7 }
 0x260   : > { %v5587_v45 = vunpack.i.h.bf16 %v7518_v13  ;;  %v5586_v0 = vunpack.i.l.bf16 %v7518_v13 }
 0x261   : > { %v1550_v47 = vsel %vm842_vm11, %v1549_v32, %v5592_v56 }
 0x262   : > { %v7536_v42 = vpop.permute.xlu0 %5594  ;;  %v5600_v33 = vpop.permute.xlu1 %5599  ;;  %v2721_v11 = vrot.slane %v1550_v47, 4 }
 0x263   : > { %v5602_v50 = vunpack.i.h.bf16 %v5600_v33  ;;  %v5601_v19 = vunpack.i.l.bf16 %v5600_v33  ;;  %v1081_v33 = vsel %vm842_vm11, %v1080_v54, %v5591_v52  ;;  %v5597_v28 = vunpack.i.h.bf16 %v7536_v42 }
 0x264   : > { %v2715_v48 = vrot.slane %v1081_v33, 4  ;;  %v5596_v7 = vunpack.i.l.bf16 %v7536_v42 }
 0x265   : > { %v1551_v51 = vsel %vm830_vm5, %v9538_v55, %v5602_v50  ;;  %v1082_v20 = vsel %vm830_vm5, %v9539_v12, %v5601_v19  ;;  %v1311_v32 = vsel %vm842_vm11, %v1310_v27, %v5597_v28 }
 0x266   : > { %v5605_v5 = vpop.permute.xlu0 %5604  ;;  %v7552_v29 = vpop.permute.xlu1 %5624  ;;  %v1083_v8 = vsel %vm832_vm6, %v1082_v20, %v5536_v35  ;;  %v1552_v58 = vsel %vm832_vm6, %v1551_v51, %v5537_v61  ;;  %v843_v54 = vsel %vm842_vm11, %v841_v34, %v5596_v7 }
 0x267   : > { %v5607_v57 = vunpack.i.h.bf16 %v5605_v5  ;;  %v5606_v31 = vunpack.i.l.bf16 %v5605_v5  ;;  %v5626_v35 = vunpack.i.l.bf16 %v7552_v29 }
 0x269   : > { %v1312_v6 = vsel %vm830_vm5, %v9540_v22, %v5607_v57  ;;  %v844_v63 = vsel %vm830_vm5, %v9541_v38, %v5606_v31  ;;  %v5627_v57 = vunpack.i.h.bf16 %v7552_v29 }
 0x26a   : > { %v5610_v49 = vpop.permute.xlu0 %5609  ;;  %v5630_v62 = vpop.permute.xlu1 %5629  ;;  %v845_v13 = vsel %vm832_vm6, %v844_v63, %v5546_v15  ;;  %v1313_v50 = vsel %vm832_vm6, %v1312_v6, %v5547_v14 }
 0x26b   : > { %v5612_v4 = vunpack.i.h.bf16 %v5610_v49  ;;  %v5611_v60 = vunpack.i.l.bf16 %v5610_v49  ;;  %v5632_v55 = vunpack.i.h.bf16 %v5630_v62 }
 0x26d   : > { %v1084_v19 = vsel %vm834_vm7, %v1083_v8, %v5611_v60  ;;  %v1553_v16 = vsel %vm834_vm7, %v1552_v58, %v5612_v4 }
 0x26e   : > { %v5615_v10 = vpop.permute.xlu0 %5614  ;;  %v5635_v5 = vpop.permute.xlu1 %5634  ;;  %v1085_v33 = vsel %vm836_vm8, %v1084_v19, %v5556_v1  ;;  %v1554_v29 = vsel %vm836_vm8, %v1553_v16, %v5557_v2 }
 0x26f   : > { %v5617_v56 = vunpack.i.h.bf16 %v5615_v10  ;;  %v5616_v52 = vunpack.i.l.bf16 %v5615_v10  ;;  %v5637_v27 = vunpack.i.h.bf16 %v5635_v5  ;;  %v5636_v22 = vunpack.i.l.bf16 %v5635_v5 }
 0x271   : > { %v846_v42 = vsel %vm834_vm7, %v845_v13, %v5616_v52  ;;  %v1314_v9 = vsel %vm834_vm7, %v1313_v50, %v5617_v56 }
 0x272   : > { %v5620_v31 = vpop.permute.xlu0 %5619  ;;  %v7596_v53 = vpop.permute.xlu1 %5639  ;;  %v847_v61 = vsel %vm836_vm8, %v846_v42, %v5566_v21  ;;  %v1315_v15 = vsel %vm836_vm8, %v1314_v9, %v5567_v43  ;;  %v5631_v43 = vunpack.i.l.bf16 %v5630_v62 }
 0x273   : > { %v5622_v14 = vunpack.i.h.bf16 %v5620_v31  ;;  %v5621_v49 = vunpack.i.l.bf16 %v5620_v31  ;;  %v848_v47 = vsel %vm838_vm9, %v847_v61, %v5626_v35  ;;  %v1316_v21 = vsel %vm838_vm9, %v1315_v15, %v5627_v57 }
 0x274   : > { %v849_v34 = vsel %vm840_vm10, %v848_v47, %v5586_v0  ;;  %v1317_v26 = vsel %vm840_vm10, %v1316_v21, %v5587_v45  ;;  %v2738_v0 = vsel %vm2737_vm12, %v843_v54, %v2715_v48  ;;  %v5642_v61 = vunpack.i.h.bf16 %v7596_v53 }
 0x275   : > { %v1086_v51 = vsel %vm838_vm9, %v1085_v33, %v5621_v49  ;;  %v1555_v12 = vsel %vm838_vm9, %v1554_v29, %v5622_v14  ;;  %v850_v4 = vsel %vm842_vm11, %v849_v34, %v5636_v22  ;;  %v1318_v60 = vsel %vm842_vm11, %v1317_v26, %v5637_v27 }
 0x276   : > { %v7612_v20 = vpop.permute.xlu1 %5644  ;;  %v1087_v1 = vsel %vm840_vm10, %v1086_v51, %v5576_v30  ;;  %v1556_v2 = vsel %vm840_vm10, %v1555_v12, %v5577_v25  ;;  %v2740_v30 = vsel %vm2737_vm12, %v1311_v32, %v2721_v11  ;;  %v5641_v15 = vunpack.i.l.bf16 %v7596_v53 }
 0x277   : > { %v1088_v6 = vsel %vm842_vm11, %v1087_v1, %v5631_v43  ;;  %v1557_v62 = vsel %vm842_vm11, %v1556_v2, %v5632_v55  ;;  %v2746_v28 = vpack.c.bf16 %v2740_v30, %v2738_v0  ;;  %v5647_v14 = vunpack.i.h.bf16 %v7612_v20 }
 0x278   : > { %v2716_v38 = vrot.slane %v1088_v6, 4  ;;  %v2722_v63 = vrot.slane %v1557_v62, 4  ;;  %v5646_v49 = vunpack.i.l.bf16 %v7612_v20 }
 0x27a   : > { %v7624_v10 = vpop.permute.xlu1 %5649  ;;  %v2739_v25 = vsel %vm2737_vm12, %v850_v4, %v2716_v38  ;;  %v2741_v45 = vsel %vm2737_vm12, %v1318_v60, %v2722_v63 }
 0x27b   : > { %v2747_v5 = vpack.c.bf16 %v2741_v45, %v2739_v25  ;;  %v5652_v54 = vunpack.i.h.bf16 %v7624_v10  ;;  %v5651_v32 = vunpack.i.l.bf16 %v7624_v10 }
 0x27d   : > { %2768 = vmatprep.subr.bf16.mxu0 %v2747_v5 }
 0x27e   : > { %v7628_v7 = vpop.permute.xlu0 %5659  ;;  %v7630_v56 = vpop.permute.xlu1 %5654  ;;  %2769 = vmatpush1.bf16.msra.mxu0 %v2746_v28 }
 0x27f   : > { %v5662_v33 = vunpack.i.h.bf16 %v7628_v7  ;;  %v5661_v29 = vunpack.i.l.bf16 %v7628_v7  ;;  %v5657_v47 = vunpack.i.h.bf16 %v7630_v56  ;;  %v5656_v51 = vunpack.i.l.bf16 %v7630_v56 }
 0x282   : > { %v7632_v52 = vpop.permute.xlu0 %5664  ;;  %v7634_v8 = vpop.permute.xlu1 %5679 }
 0x283   : > { %v5667_v53 = vunpack.i.h.bf16 %v7632_v52  ;;  %v5666_v12 = vunpack.i.l.bf16 %v7632_v52  ;;  %v5682_v20 = vunpack.i.h.bf16 %v7634_v8  ;;  %v5681_v1 = vunpack.i.l.bf16 %v7634_v8 }
 0x286   : > { %v7636_v48 = vpop.permute.xlu0 %5669  ;;  %v7638_v11 = vpop.permute.xlu1 %5684 }
 0x287   : > { %v5672_v26 = vunpack.i.h.bf16 %v7636_v48  ;;  %v5671_v22 = vunpack.i.l.bf16 %v7636_v48  ;;  %v5687_v6 = vunpack.i.h.bf16 %v7638_v11  ;;  %v5686_v62 = vunpack.i.l.bf16 %v7638_v11 }
 0x28a   : > { %v7640_v58 = vpop.permute.xlu0 %5674  ;;  %v7642_v13 = vpop.permute.xlu1 %5694 }
 0x28b   : > { %v5677_v38 = vunpack.i.h.bf16 %v7640_v58  ;;  %v5676_v10 = vunpack.i.l.bf16 %v7640_v58 }
 0x28e   : > { %v7644_v50 = vpop.permute.xlu0 %5689  ;;  %v7646_v19 = vpop.permute.xlu1 %5699 }
 0x292   : > { %v7648_v16 = vpop.permute.xlu0 %5704  ;;  %v5710_v42 = vpop.permute.xlu1 %5709 }
 0x293   : > { %v5712_v21 = vunpack.i.h.bf16 %v5710_v42  ;;  %v5711_v55 = vunpack.i.l.bf16 %v5710_v42 }
 0x295   : > { %v2476_v63 = vsel %vm830_vm5, %v7301_v40, %v5712_v21  ;;  %v2011_v4 = vsel %vm830_vm5, %v7323_v41, %v5711_v55  ;;  %v5696_v41 = vunpack.i.l.bf16 %v7642_v13 }
 0x296   : > { %v5715_v9 = vpop.permute.xlu0 %5714  ;;  %v7650_v57 = vpop.permute.xlu1 %5739  ;;  %v2477_v21 = vsel %vm832_vm6, %v2476_v63, %v5642_v61 }
 0x297   : > { %v5717_v60 = vunpack.i.h.bf16 %v5715_v9  ;;  %v5716_v0 = vunpack.i.l.bf16 %v5715_v9  ;;  %v5692_v9 = vunpack.i.h.bf16 %v7644_v50 }
 0x299   : > { %v2469_v55 = vsel %vm830_vm5, %v7326_v59, %v5717_v60  ;;  %v5702_v60 = vunpack.i.h.bf16 %v7646_v19 }
 0x29a   : > { %v5720_v35 = vpop.permute.xlu0 %5719  ;;  %v7652_v31 = vpop.permute.xlu1 %5744 }
 0x29b   : > { %v5722_v2 = vunpack.i.h.bf16 %v5720_v35  ;;  %v5721_v27 = vunpack.i.l.bf16 %v5720_v35  ;;  %v2012_v35 = vsel %vm832_vm6, %v2011_v4, %v5641_v15 }
 0x29d   : > { %v2246_v56 = vsel %vm830_vm5, %v7366_v3, %v5722_v2  ;;  %v1781_v40 = vsel %vm830_vm5, %v7351_v23, %v5721_v27  ;;  %v5742_v3 = vunpack.i.h.bf16 %v7650_v57  ;;  %v5741_v23 = vunpack.i.l.bf16 %v7650_v57 }
 0x29e   : > { %v5725_v43 = vpop.permute.xlu0 %5724  ;;  %v7667_v34 = vpop.permute.xlu1 %5749  ;;  %v1782_v27 = vsel %vm832_vm6, %v1781_v40, %v5651_v32  ;;  %v5691_v57 = vunpack.i.l.bf16 %v7644_v50 }
 0x29f   : > { %v5727_v45 = vunpack.i.h.bf16 %v5725_v43  ;;  %v5726_v5 = vunpack.i.l.bf16 %v5725_v43  ;;  %v2004_v43 = vsel %vm830_vm5, %v7341_v44, %v5716_v0  ;;  %v5747_v0 = vunpack.i.h.bf16 %v7652_v31 }
 0x2a0   : > { %v2005_v32 = vsel %vm832_vm6, %v2004_v43, %v5646_v49 }
 0x2a1   : > { %v2013_v25 = vsel %vm834_vm7, %v2012_v35, %v5726_v5  ;;  %v2478_v15 = vsel %vm834_vm7, %v2477_v21, %v5727_v45  ;;  %v5746_v45 = vunpack.i.l.bf16 %v7652_v31  ;;  %v5752_v31 = vunpack.i.h.bf16 %v7667_v34 }
 0x2a2   : > { %v5730_v30 = vpop.permute.xlu0 %5729  ;;  %v7681_v28 = vpop.permute.xlu1 %5754  ;;  %v2479_v40 = vsel %vm836_vm8, %v2478_v15, %v5657_v47  ;;  %v5707_v47 = vunpack.i.h.bf16 %v7648_v16 }
 0x2a3   : > { %v5732_v48 = vunpack.i.h.bf16 %v5730_v30  ;;  %v5731_v42 = vunpack.i.l.bf16 %v5730_v30  ;;  %v2247_v30 = vsel %vm832_vm6, %v2246_v56, %v5652_v54  ;;  %v2470_v54 = vsel %vm832_vm6, %v2469_v55, %v5647_v14 }
 0x2a4   : > { %v2248_v56 = vsel %vm834_vm7, %v2247_v30, %v5742_v3 }
 0x2a5   : > { %v2239_v59 = vsel %vm830_vm5, %v7396_v39, %v5732_v48  ;;  %v1774_v44 = vsel %vm830_vm5, %v7386_v37, %v5731_v42  ;;  %v1783_v39 = vsel %vm834_vm7, %v1782_v27, %v5741_v23  ;;  %v2014_v37 = vsel %vm836_vm8, %v2013_v25, %v5656_v51 }
 0x2a6   : > { %v5735_v2 = vpop.permute.xlu0 %5734  ;;  %v5770_v61 = vpop.permute.xlu1 %5769  ;;  %v2240_v48 = vsel %vm832_vm6, %v2239_v59, %v5662_v33  ;;  %v1775_v14 = vsel %vm832_vm6, %v1774_v44, %v5661_v29  ;;  %v5751_v42 = vunpack.i.l.bf16 %v7667_v34  ;;  %v5701_v51 = vunpack.i.l.bf16 %v7646_v19 }
 0x2a7   : > { %v5737_v63 = vunpack.i.h.bf16 %v5735_v2  ;;  %v5736_v4 = vunpack.i.l.bf16 %v5735_v2  ;;  %v1784_v25 = vsel %vm836_vm8, %v1783_v39, %v5671_v22  ;;  %v2249_v33 = vsel %vm836_vm8, %v2248_v56, %v5672_v26 }
 0x2a8   : > { %v1776_v7 = vsel %vm834_vm7, %v1775_v14, %v5751_v42  ;;  %v2241_v29 = vsel %vm834_vm7, %v2240_v48, %v5752_v31  ;;  %v2015_v43 = vsel %vm838_vm9, %v2014_v37, %v5746_v45  ;;  %v2480_v34 = vsel %vm838_vm9, %v2479_v40, %v5747_v0 }
 0x2a9   : > { %v2006_v35 = vsel %vm834_vm7, %v2005_v32, %v5736_v4  ;;  %v2471_v21 = vsel %vm834_vm7, %v2470_v54, %v5737_v63  ;;  %v5757_v26 = vunpack.i.h.bf16 %v7681_v28  ;;  %v5756_v27 = vunpack.i.l.bf16 %v7681_v28 }
 0x2aa   : > { %v5760_v5 = vpop.permute.xlu0 %5759  ;;  %v5775_v49 = vpop.permute.xlu1 %5774  ;;  %v2007_v3 = vsel %vm836_vm8, %v2006_v35, %v5666_v12  ;;  %v2472_v23 = vsel %vm836_vm8, %v2471_v21, %v5667_v53  ;;  %v5772_v30 = vunpack.i.h.bf16 %v5770_v61  ;;  %v5771_v15 = vunpack.i.l.bf16 %v5770_v61 }
 0x2ab   : > { %v5762_v22 = vunpack.i.h.bf16 %v5760_v5  ;;  %v5761_v2 = vunpack.i.l.bf16 %v5760_v5  ;;  %v1777_v59 = vsel %vm836_vm8, %v1776_v7, %v5681_v1  ;;  %v2242_v12 = vsel %vm836_vm8, %v2241_v29, %v5682_v20 }
 0x2ac   : > { %v2008_v53 = vsel %vm838_vm9, %v2007_v3, %v5756_v27  ;;  %v2473_v4 = vsel %vm838_vm9, %v2472_v23, %v5757_v26  ;;  %v2016_v28 = vsel %vm840_vm10, %v2015_v43, %v5676_v10  ;;  %v2481_v61 = vsel %vm840_vm10, %v2480_v34, %v5677_v38 }
 0x2ad   : > { %v1785_v8 = vsel %vm838_vm9, %v1784_v25, %v5761_v2  ;;  %v2250_v20 = vsel %vm838_vm9, %v2249_v33, %v5762_v22  ;;  %v1778_v0 = vsel %vm838_vm9, %v1777_v59, %v5771_v15  ;;  %v2243_v45 = vsel %vm838_vm9, %v2242_v12, %v5772_v30 }
 0x2ae   : > { %v5765_v55 = vpop.permute.xlu0 %5764  ;;  %v5800_v63 = vpop.permute.xlu1 %5799  ;;  %v5777_v5 = vunpack.i.h.bf16 %v5775_v49  ;;  %v5776_v39 = vunpack.i.l.bf16 %v5775_v49  ;;  %v2009_v37 = vsel %vm840_vm10, %v2008_v53, %v5686_v62  ;;  %v2474_v40 = vsel %vm840_vm10, %v2473_v4, %v5687_v6 }
 0x2af   : > { %v5767_v44 = vunpack.i.h.bf16 %v5765_v55  ;;  %v5766_v52 = vunpack.i.l.bf16 %v5765_v55  ;;  %v1786_v14 = vsel %vm840_vm10, %v1785_v8, %v5691_v57  ;;  %v2251_v49 = vsel %vm840_vm10, %v2250_v20, %v5692_v9 }
 0x2b0   : > { %v5802_v21 = vunpack.i.h.bf16 %v5800_v63  ;;  %v5801_v6 = vunpack.i.l.bf16 %v5800_v63  ;;  %v2010_v25 = vsel %vm842_vm11, %v2009_v37, %v5776_v39  ;;  %v2475_v57 = vsel %vm842_vm11, %v2474_v40, %v5777_v5  ;;  %v227_v39 = vld [vmem:[%s9475_s1] sm:$0x3] }
 0x2b1   : > { %v2017_v56 = vsel %vm842_vm11, %v2016_v28, %v5766_v52  ;;  %v2482_v10 = vsel %vm842_vm11, %v2481_v61, %v5767_v44  ;;  %v5706_v29 = vunpack.i.l.bf16 %v7648_v16  ;;  %v2727_v3 = vrot.slane %v2010_v25, 4 }
 0x2b2   : > { %v5780_v1 = vpop.permute.xlu0 %5779  ;;  %v5805_v31 = vpop.permute.xlu1 %5804  ;;  %v2728_v35 = vrot.slane %v2017_v56, 4  ;;  %v2734_v11 = vrot.slane %v2482_v10, 4  ;;  %v2733_v23 = vrot.slane %v2475_v57, 4  ;;  %v1779_v22 = vsel %vm840_vm10, %v1778_v0, %v5696_v41 }
 0x2b3   : > { %v5782_v32 = vunpack.i.h.bf16 %v5780_v1  ;;  %v5781_v54 = vunpack.i.l.bf16 %v5780_v1  ;;  %v9542_v2 = vunpack.i.h.bf16 %v7642_v13  ;;  %v5807_v44 = vunpack.i.h.bf16 %v5805_v31 }
 0x2b4   : > { %v5806_v52 = vunpack.i.l.bf16 %v5805_v31 }
 0x2b5   : > { %v2706_v58 = vsel %vm830_vm5, %v7445_v24, %v5782_v32  ;;  %v2699_v38 = vsel %vm830_vm5, %v7436_v46, %v5781_v54  ;;  %v2244_v26 = vsel %vm840_vm10, %v2243_v45, %v9542_v2 }
 0x2b6   : > { %v5785_v48 = vpop.permute.xlu0 %5784  ;;  %v2700_v24 = vsel %vm832_vm6, %v2699_v38, %v5701_v51  ;;  %v2707_v46 = vsel %vm832_vm6, %v2706_v58, %v5702_v60  ;;  %v5810_v15 = vpop.permute.xlu1 %5809 }
 0x2b7   : > { %v5787_v42 = vunpack.i.h.bf16 %v5785_v48  ;;  %v5786_v62 = vunpack.i.l.bf16 %v5785_v48  ;;  %v2701_v51 = vsel %vm834_vm7, %v2700_v24, %v5801_v6  ;;  %v2708_v19 = vsel %vm834_vm7, %v2707_v46, %v5802_v21 }
 0x2b8   : > { %v2702_v27 = vsel %vm836_vm8, %v2701_v51, %v5706_v29  ;;  %v2709_v30 = vsel %vm836_vm8, %v2708_v19, %v5707_v47  ;;  %v5812_v61 = vunpack.i.h.bf16 %v5810_v15  ;;  %v5811_v1 = vunpack.i.l.bf16 %v5810_v15 }
 0x2b9   : > { %v1787_v50 = vsel %vm842_vm11, %v1786_v14, %v5786_v62  ;;  %v2252_v9 = vsel %vm842_vm11, %v2251_v49, %v5787_v42  ;;  %v2703_v16 = vsel %vm838_vm9, %v2702_v27, %v5806_v52  ;;  %v2710_v47 = vsel %vm838_vm9, %v2709_v30, %v5807_v44 }
 0x2ba   : > { %v5790_v60 = vpop.permute.xlu0 %5789  ;;  %v2743_v33 = vsel %vm2737_vm12, %v1787_v50, %v2728_v35  ;;  %v2745_v7 = vsel %vm2737_vm12, %v2252_v9, %v2734_v11 }
 0x2bb   : > { %v5792_v55 = vunpack.i.h.bf16 %v5790_v60  ;;  %v5791_v43 = vunpack.i.l.bf16 %v5790_v60  ;;  %v2749_v34 = vpack.c.bf16 %v2745_v7, %v2743_v33 }
 0x2bd   : > { %2770 = vmatprep.subr.bf16.mxu0 %v2749_v34  ;;  %v1780_v59 = vsel %vm842_vm11, %v1779_v22, %v5791_v43  ;;  %v2245_v12 = vsel %vm842_vm11, %v2244_v26, %v5792_v55 }
 0x2be   : > { %v5795_v63 = vpop.permute.xlu0 %5794  ;;  %v2742_v41 = vsel %vm2737_vm12, %v1780_v59, %v2727_v3  ;;  %v2744_v13 = vsel %vm2737_vm12, %v2245_v12, %v2733_v23 }
 0x2bf   : > { %v5797_v53 = vunpack.i.h.bf16 %v5795_v63  ;;  %v5796_v4 = vunpack.i.l.bf16 %v5795_v63  ;;  %v2748_v28 = vpack.c.bf16 %v2744_v13, %v2742_v41 }
 0x2c1   : > { %v2711_v8 = vsel %vm840_vm10, %v2710_v47, %v5797_v53  ;;  %2771 = vmatpush1.bf16.msra.mxu0 %v2748_v28  ;;  %v2704_v20 = vsel %vm840_vm10, %v2703_v16, %v5796_v4 }
 0x2c2   : > { %v2712_v32 = vsel %vm842_vm11, %v2711_v8, %v5812_v61  ;;  %v2705_v54 = vsel %vm842_vm11, %v2704_v20, %v5811_v1 }
 0x2c3   : > { %v2751_v0 = vpack.c.bf16 %v2712_v32, %v2712_v32  ;;  %v2750_v45 = vpack.c.bf16 %v2705_v54, %v2705_v54 }
 0x2c5   : > { %5467 = vmatprep.subr.msk.bf16.mxu0 %vm2761_vm13, %v2751_v0  ;;  %v2763_v5 = vsel %vm2761_vm13, %v2750_v45, 0 }
 0x2c6   : > { %2773 = vmatpush1.bf16.msra.mxu0 %v2763_v5 }
 0x2c9   : > { %5468 = vmatmul.mubr.msk.bf16.vlgmr.msra.gmra.mrb[0].mxu0 %vm2757_vm14, %v227_v39 }
 0x2cf   : > { %v2755_v56 = vpop.permute.xlu0 %2754 }
 0x39c   : > { %v2802_v10 = vpop.f32.mrb[0].mxu0 }
 0x39d   : > { %v2803_v58 = vadd.f32 %v2802_v10, %v2755_v56  ;;  %v2804_v38 = vpop.f32.mrb[1].mxu0 }
 0x39e   : > { %v2805_v37 = vadd.f32 %v2804_v38, %v2755_v56  ;;  %v2806_v40 = vpop.f32.mrb[2].mxu0 }
 0x39f   : > { %v2814_v48 = vmul.f32 %v2803_v58, %v2803_v58  ;;  %v2807_v14 = vpop.f32.mrb[3].mxu0  ;;  %v2809_v49 = vsel %vm2737_vm12, %v2803_v58, 0.0 }
 0x3a0   : > { %v2815_v24 = vmul.f32 %v2805_v37, %v2805_v37  ;;  %v2810_v46 = vsel %vm2737_vm12, %v2805_v37, 0.0 }
 0x3a1   : > { %v2811_v31 = vadd.f32 %v2810_v46, %v2809_v49  ;;  %v2816_v42 = vsel %vm2737_vm12, %v2814_v48, 0.0 }
 0x3a2   : > { %v2817_v62 = vsel %vm2737_vm12, %v2815_v24, 0.0 }
 0x3a3   : > { %2812 = vadd.xlane.f32.xlu1 %v2811_v31  ;;  %v2818_v35 = vadd.f32 %v2817_v62, %v2816_v42 }
 0x3a5   : > { %2819 = vadd.xlane.f32.xlu0 %v2818_v35 }
 0x430   : > { %v2813_v11 = vpop.xlane.xlu1 %2812 }
 0x431   : > { %v2821_v21 = vmul.f32 0.00390625, %v2813_v11 }
 0x432   : > { %v2820_v6 = vpop.xlane.xlu0 %2819 }
 0x433   : > { %v2822_v25 = vmul.f32 0.00390625, %v2820_v6  ;;  %v2823_v57 = vmul.f32 %v2821_v21, %v2821_v21  ;;  %v2826_v19 = vsub.f32 %v2803_v58, %v2821_v21  ;;  %v2827_v29 = vsub.f32 %v2805_v37, %v2821_v21 }
 0x435   : > { %v2824_v50 = vsub.f32 %v2822_v25, %v2823_v57 }
 0x437   : > { %v2825_v9 = vmax.f32 %v2824_v50, 0.0 }
 0x439   : > { %v2828_v51 = vadd.f32 1e-05, %v2825_v9 }
 0x43b   : > { %6131 = vrsqrt.f32 %v2828_v51 }
 0x445   : > { %v6132_v60 = vpop.eup %6131 }
 0x446   : > { %v2830_v33 = vmul.f32 %v6132_v60, %v2826_v19  ;;  %v2831_v55 = vmul.f32 %v6132_v60, %v2827_v29 }
 0x448   : > { %v2832_v7 = vmax.f32 %v2830_v33, 0.0  ;;  %v2833_v43 = vmax.f32 %v2831_v55, 0.0 }
 0x44a   : > { %2840 = vrot.lane.b32.xlu0 %v2832_v7, %s6147_s27  ;;  %2837 = vrot.lane.b32.xlu1 %v2832_v7, %s6145_s25 }
 0x44e   : > { %2849 = vrot.lane.b32.xlu0 %v2832_v7, %s6149_s29  ;;  %2843 = vrot.lane.b32.xlu1 %v2832_v7, %s6144_s24 }
 0x452   : > { %2855 = vrot.lane.b32.xlu0 %v2832_v7, %s6150_s30  ;;  %2846 = vrot.lane.b32.xlu1 %v2832_v7, %s6146_s26 }
 0x456   : > { %2862 = vrot.lane.b32.xlu0 %v2833_v43, %s6147_s27  ;;  %2852 = vrot.lane.b32.xlu1 %v2832_v7, %s6148_s28 }
 0x45a   : > { %2868 = vrot.lane.b32.xlu0 %v2833_v43, %s6146_s26  ;;  %2859 = vrot.lane.b32.xlu1 %v2833_v43, %s6145_s25 }
 0x45e   : > { %2874 = vrot.lane.b32.xlu0 %v2833_v43, %s6148_s28  ;;  %2865 = vrot.lane.b32.xlu1 %v2833_v43, %s6144_s24 }
 0x462   : > { %2871 = vrot.lane.b32.xlu1 %v2833_v43, %s6149_s29 }
 0x466   : > { %2877 = vrot.lane.b32.xlu1 %v2833_v43, %s6150_s30 }
 0x4bc   : > { %v2841_v34 = vpop.permute.xlu0 %2840  ;;  %v2838_v3 = vpop.permute.xlu1 %2837 }
 0x4bd   : > { %v2880_v41 = vcombine.low %v2832_v7, %v2841_v34 }
 0x4bf   : > { %v2887_v1 = vrot.slane %v2880_v41, %v6218_v17 }
 0x4c0   : > { %v2850_v23 = vpop.permute.xlu0 %2849  ;;  %v2844_v22 = vpop.permute.xlu1 %2843 }
 0x4c1   : > { %v2888_v44 = vcombine.low %v2838_v3, %v2844_v22 }
 0x4c3   : > { %v2895_v4 = vrot.slane %v2888_v44, %v6218_v17 }
 0x4c4   : > { %v2856_v2 = vpop.permute.xlu0 %2855  ;;  %v2847_v26 = vpop.permute.xlu1 %2846 }
 0x4c5   : > { %v2904_v52 = vcombine.low %v2850_v23, %v2856_v2  ;;  %v2912_v54 = vcombine.low %v2887_v1, %v2895_v4  ;;  %v2913_v40 = vcombine.high %v2887_v1, %v2895_v4 }
 0x4c7   : > { %v2911_v28 = vrot.slane %v2904_v52, %v6218_v17  ;;  %v2920_v48 = vrot.slane %v2912_v54, %v6225_v36  ;;  %v2927_v21 = vrot.slane %v2913_v40, %v6225_v36 }
 0x4c8   : > { %v2863_v27 = vpop.permute.xlu0 %2862  ;;  %v2853_v30 = vpop.permute.xlu1 %2852 }
 0x4c9   : > { %v2896_v59 = vcombine.low %v2847_v26, %v2853_v30  ;;  %v2948_v61 = vcombine.low %v2833_v43, %v2863_v27 }
 0x4cb   : > { %v2903_v13 = vrot.slane %v2896_v59, %v6218_v17  ;;  %v2955_v45 = vrot.slane %v2948_v61, %v6218_v17 }
 0x4cc   : > { %v2860_v15 = vpop.permute.xlu1 %2859  ;;  %v2869_v12 = vpop.permute.xlu0 %2868 }
 0x4cd   : > { %v2928_v8 = vcombine.low %v2903_v13, %v2911_v28  ;;  %v2929_v39 = vcombine.high %v2903_v13, %v2911_v28 }
 0x4cf   : > { %v2936_v56 = vrot.slane %v2928_v8, %v6225_v36  ;;  %v2943_v24 = vrot.slane %v2929_v39, %v6225_v36 }
 0x4d0   : > { %v2866_v63 = vpop.permute.xlu1 %2865  ;;  %v2875_v16 = vpop.permute.xlu0 %2874 }
 0x4d1   : > { %v2956_v53 = vcombine.low %v2860_v15, %v2866_v63  ;;  %v2964_v20 = vcombine.low %v2869_v12, %v2875_v16  ;;  %v2944_v46 = vcombine.low %v2920_v48, %v2936_v56  ;;  %v2945_v31 = vcombine.high %v2920_v48, %v2936_v56 }
 0x4d2   : > { %v2946_v9 = vcombine.low %v2927_v21, %v2943_v24  ;;  %v2947_v51 = vcombine.high %v2927_v21, %v2943_v24 }
 0x4d3   : > { %v2963_v32 = vrot.slane %v2956_v53, %v6218_v17  ;;  %v2971_v10 = vrot.slane %v2964_v20, %v6218_v17  ;;  %v3035_v19 = vrot.slane %v2945_v31, 7  ;;  %v3032_v33 = vrot.slane %v2944_v46, 7 }
 0x4d4   : > { %v2872_v47 = vpop.permute.xlu1 %2871  ;;  %v3041_v3 = vrot.slane %v2947_v51, 7  ;;  %v3038_v23 = vrot.slane %v2946_v9, 7  ;;  %v3020_v27 = vrot.slane %v2944_v46, 1  ;;  %v3021_v12 = vrot.slane %v2945_v31, 1 }
 0x4d5   : > { %v2980_v58 = vcombine.low %v2955_v45, %v2963_v32  ;;  %v2981_v38 = vcombine.high %v2955_v45, %v2963_v32  ;;  %v3022_v41 = vrot.slane %v2946_v9, 1  ;;  %v3023_v28 = vrot.slane %v2947_v51, 1 }
 0x4d6   : > { %v3060_v15 = vsel %vm447_vm0, %v3020_v27, %v3032_v33  ;;  %v3061_v52 = vsel %vm447_vm0, %v3021_v12, %v3035_v19 }
 0x4d7   : > { %v2988_v42 = vrot.slane %v2980_v58, %v6225_v36  ;;  %v2995_v62 = vrot.slane %v2981_v38, %v6225_v36  ;;  %v3062_v53 = vsel %vm447_vm0, %v3022_v41, %v3038_v23 }
 0x4d8   : > { %v2878_v0 = vpop.permute.xlu1 %2877 }
 0x4d9   : > { %v2972_v5 = vcombine.low %v2872_v47, %v2878_v0  ;;  %v3063_v47 = vsel %vm447_vm0, %v3023_v28, %v3041_v3 }
 0x4db   : > { %v2979_v37 = vrot.slane %v2972_v5, %v6218_v17 }
 0x4dd   : > { %v2996_v14 = vcombine.low %v2971_v10, %v2979_v37  ;;  %v2997_v49 = vcombine.high %v2971_v10, %v2979_v37 }
 0x4df   : > { %v3004_v35 = vrot.slane %v2996_v14, %v6225_v36  ;;  %v3011_v11 = vrot.slane %v2997_v49, %v6225_v36 }
 0x4e1   : > { %v3012_v6 = vcombine.low %v2988_v42, %v3004_v35  ;;  %v3013_v25 = vcombine.high %v2988_v42, %v3004_v35  ;;  %v3014_v57 = vcombine.low %v2995_v62, %v3011_v11  ;;  %v3015_v50 = vcombine.high %v2995_v62, %v3011_v11 }
 0x4e3   : > { %v3036_v60 = vrot.slane %v3013_v25, 7  ;;  %v3033_v7 = vrot.slane %v3012_v6, 7  ;;  %v3042_v43 = vrot.slane %v3015_v50, 7  ;;  %v3039_v34 = vrot.slane %v3014_v57, 7 }
 0x4e4   : > { %v3052_v26 = vrot.slane %v3012_v6, 5  ;;  %v3053_v59 = vrot.slane %v3013_v25, 5  ;;  %v3054_v63 = vrot.slane %v3014_v57, 5  ;;  %v3055_v4 = vrot.slane %v3015_v50, 5 }
 0x4e5   : > { %v3037_v29 = vsel %vm447_vm0, %v3035_v19, %v3036_v60  ;;  %v3034_v55 = vsel %vm447_vm0, %v3032_v33, %v3033_v7  ;;  %v3043_v22 = vsel %vm447_vm0, %v3041_v3, %v3042_v43  ;;  %v3040_v2 = vsel %vm447_vm0, %v3038_v23, %v3039_v34 }
 0x4e6   : > { %3084 = vrot.lane.b32.xlu1 %v3037_v29, %s6154_s6  ;;  %3078 = vrot.lane.b32.xlu0 %v3034_v55, %s6154_s6  ;;  %v3064_v30 = vsel %vm447_vm0, %v3033_v7, %v3052_v26  ;;  %v3065_v44 = vsel %vm447_vm0, %v3036_v60, %v3053_v59  ;;  %v3066_v13 = vsel %vm447_vm0, %v3039_v34, %v3054_v63 }
 0x4e7   : > { %v3067_v16 = vsel %vm447_vm0, %v3042_v43, %v3055_v4 }
 0x4ea   : > { %3096 = vrot.lane.b32.xlu1 %v3043_v22, %s6154_s6  ;;  %3090 = vrot.lane.b32.xlu0 %v3040_v2, %s6154_s6 }
 0x4ee   : > { %3120 = vrot.lane.b32.xlu1 %v3037_v29, %s6155_s7  ;;  %3114 = vrot.lane.b32.xlu0 %v3034_v55, %s6155_s7 }
 0x4f2   : > { %3132 = vrot.lane.b32.xlu1 %v3043_v22, %s6155_s7  ;;  %3126 = vrot.lane.b32.xlu0 %v3040_v2, %s6155_s7 }
 0x4f6   : > { %3080 = vrot.lane.b32.xlu1 %v3064_v30, %s6154_s6  ;;  %3076 = vrot.lane.b32.xlu0 %v3060_v15, %s6154_s6 }
 0x4fa   : > { %3086 = vrot.lane.b32.xlu1 %v3065_v44, %s6154_s6  ;;  %3082 = vrot.lane.b32.xlu0 %v3061_v52, %s6154_s6 }
 0x4fe   : > { %3092 = vrot.lane.b32.xlu1 %v3066_v13, %s6154_s6  ;;  %3088 = vrot.lane.b32.xlu0 %v3062_v53, %s6154_s6 }
 0x502   : > { %3098 = vrot.lane.b32.xlu1 %v3067_v16, %s6154_s6  ;;  %3094 = vrot.lane.b32.xlu0 %v3063_v47, %s6154_s6 }
 0x506   : > { %3116 = vrot.lane.b32.xlu1 %v3064_v30, %s6155_s7  ;;  %3112 = vrot.lane.b32.xlu0 %v3060_v15, %s6155_s7 }
 0x50a   : > { %3122 = vrot.lane.b32.xlu1 %v3065_v44, %s6155_s7  ;;  %3118 = vrot.lane.b32.xlu0 %v3061_v52, %s6155_s7 }
 0x50e   : > { %3128 = vrot.lane.b32.xlu1 %v3066_v13, %s6155_s7  ;;  %3124 = vrot.lane.b32.xlu0 %v3062_v53, %s6155_s7 }
 0x512   : > { %3134 = vrot.lane.b32.xlu1 %v3067_v16, %s6155_s7  ;;  %3130 = vrot.lane.b32.xlu0 %v3063_v47, %s6155_s7 }
 0x516   : > { %3156 = vrot.lane.b32.xlu1 %v3037_v29, %s6156_s8  ;;  %3150 = vrot.lane.b32.xlu0 %v3034_v55, %s6156_s8 }
 0x51a   : > { %3168 = vrot.lane.b32.xlu1 %v3043_v22, %s6156_s8  ;;  %3162 = vrot.lane.b32.xlu0 %v3040_v2, %s6156_s8 }
 0x51e   : > { %3152 = vrot.lane.b32.xlu1 %v3064_v30, %s6156_s8  ;;  %3148 = vrot.lane.b32.xlu0 %v3060_v15, %s6156_s8 }
 0x522   : > { %3158 = vrot.lane.b32.xlu1 %v3065_v44, %s6156_s8  ;;  %3154 = vrot.lane.b32.xlu0 %v3061_v52, %s6156_s8 }
 0x526   : > { %3164 = vrot.lane.b32.xlu1 %v3066_v13, %s6156_s8  ;;  %3160 = vrot.lane.b32.xlu0 %v3062_v53, %s6156_s8 }
 0x52a   : > { %3170 = vrot.lane.b32.xlu1 %v3067_v16, %s6156_s8  ;;  %3166 = vrot.lane.b32.xlu0 %v3063_v47, %s6156_s8 }
 0x558   : > { %v3085_v61 = vpop.permute.xlu1 %3084  ;;  %v3079_v1 = vpop.permute.xlu0 %3078 }
 0x55c   : > { %v3097_v8 = vpop.permute.xlu1 %3096  ;;  %v3091_v20 = vpop.permute.xlu0 %3090 }
 0x560   : > { %v3121_v32 = vpop.permute.xlu1 %3120  ;;  %v3115_v54 = vpop.permute.xlu0 %3114 }
 0x561   : > { %v3188_v35 = vsel %vm612_vm2, %v3085_v61, %v3121_v32  ;;  %v3185_v11 = vsel %vm612_vm2, %v3079_v1, %v3115_v54 }
 0x564   : > { %v3133_v0 = vpop.permute.xlu1 %3132  ;;  %v3127_v45 = vpop.permute.xlu0 %3126 }
 0x565   : > { %v3194_v50 = vsel %vm612_vm2, %v3097_v8, %v3133_v0  ;;  %v3191_v9 = vsel %vm612_vm2, %v3091_v20, %v3127_v45 }
 0x568   : > { %v3081_v5 = vpop.permute.xlu1 %3080  ;;  %v3077_v39 = vpop.permute.xlu0 %3076 }
 0x56c   : > { %v3087_v56 = vpop.permute.xlu1 %3086  ;;  %v3083_v10 = vpop.permute.xlu0 %3082 }
 0x570   : > { %v3093_v58 = vpop.permute.xlu1 %3092  ;;  %v3089_v38 = vpop.permute.xlu0 %3088 }
 0x574   : > { %v3099_v37 = vpop.permute.xlu1 %3098  ;;  %v3095_v40 = vpop.permute.xlu0 %3094 }
 0x578   : > { %v3117_v48 = vpop.permute.xlu1 %3116  ;;  %v3113_v14 = vpop.permute.xlu0 %3112 }
 0x579   : > { %v3184_v34 = vsel %vm612_vm2, %v3077_v39, %v3113_v14  ;;  %v3186_v52 = vsel %vm612_vm2, %v3081_v5, %v3117_v48 }
 0x57c   : > { %v3123_v49 = vpop.permute.xlu1 %3122  ;;  %v3119_v24 = vpop.permute.xlu0 %3118 }
 0x57d   : > { %v3187_v63 = vsel %vm612_vm2, %v3083_v10, %v3119_v24  ;;  %v3189_v28 = vsel %vm612_vm2, %v3087_v56, %v3123_v49 }
 0x580   : > { %v3129_v46 = vpop.permute.xlu1 %3128  ;;  %v3125_v31 = vpop.permute.xlu0 %3124 }
 0x581   : > { %v3192_v16 = vsel %vm612_vm2, %v3093_v58, %v3129_v46  ;;  %v3190_v47 = vsel %vm612_vm2, %v3089_v38, %v3125_v31 }
 0x584   : > { %v3135_v42 = vpop.permute.xlu1 %3134  ;;  %v3131_v62 = vpop.permute.xlu0 %3130 }
 0x585   : > { %v3195_v61 = vsel %vm612_vm2, %v3099_v37, %v3135_v42  ;;  %v3193_v1 = vsel %vm612_vm2, %v3095_v40, %v3131_v62 }
 0x588   : > { %v3157_v21 = vpop.permute.xlu1 %3156  ;;  %v3151_v6 = vpop.permute.xlu0 %3150 }
 0x589   : > { %v7899_v25 = vsel %vm625_vm1, %v3188_v35, %v3157_v21  ;;  %v7902_v57 = vsel %vm625_vm1, %v3185_v11, %v3151_v6 }
 0x58a   : > { %3428 = vrot.lane.b32.xlu1 %v7899_v25, %s6154_s6  ;;  %3424 = vrot.lane.b32.xlu0 %v7902_v57, %s6154_s6  ;;  %v3887_v5 = vrot.slane %v7902_v57, 1  ;;  %v3892_v38 = vrot.slane %v7899_v25, 1 }
 0x58c   : > { %v3169_v51 = vpop.permute.xlu1 %3168  ;;  %v3163_v19 = vpop.permute.xlu0 %3162 }
 0x58d   : > { %v7911_v60 = vsel %vm625_vm1, %v3194_v50, %v3169_v51  ;;  %v7914_v33 = vsel %vm625_vm1, %v3191_v9, %v3163_v19  ;;  %v4581_v19 = vrot.slane %v7902_v57, 2 }
 0x58e   : > { %v3292_v7 = vcombine.low %v7899_v25, %v7911_v60  ;;  %v3293_v29 = vcombine.high %v7899_v25, %v7911_v60  ;;  %v3276_v55 = vcombine.low %v7902_v57, %v7914_v33  ;;  %v3277_v43 = vcombine.high %v7902_v57, %v7914_v33  ;;  %3436 = vrot.lane.b32.xlu1 %v7911_v60, %s6154_s6 }
 0x58f   : > { %3432 = vrot.lane.b32.xlu0 %v7914_v33, %s6154_s6  ;;  %v3897_v58 = vrot.slane %v7914_v33, 1  ;;  %v3902_v37 = vrot.slane %v7911_v60, 1 }
 0x590   : > { %v7930_v3 = vrot.slane %v3292_v7, %v6218_v17  ;;  %v7933_v23 = vrot.slane %v3293_v29, %v6218_v17  ;;  %v7936_v22 = vrot.slane %v3276_v55, %v6218_v17  ;;  %v7939_v2 = vrot.slane %v3277_v43, %v6218_v17  ;;  %v3153_v26 = vpop.permute.xlu1 %3152  ;;  %v3149_v27 = vpop.permute.xlu0 %3148 }
 0x591   : > { %v7942_v30 = vsel %vm625_vm1, %v3184_v34, %v3149_v27  ;;  %v7957_v53 = vsel %vm625_vm1, %v3186_v52, %v3153_v26  ;;  %v4591_v7 = vrot.slane %v7914_v33, 2  ;;  %v4586_v29 = vrot.slane %v7899_v25, 2 }
 0x592   : > { %v3309_v15 = vcombine.high %v7936_v22, %v7930_v3  ;;  %v3889_v8 = vrot.slane %v7957_v53, 1  ;;  %v3886_v40 = vrot.slane %v7942_v30, 1  ;;  %v4580_v48 = vrot.slane %v7942_v30, 2 }
 0x593   : > { %3422 = vrot.lane.b32.xlu0 %v7942_v30, %s6154_s6  ;;  %v4596_v55 = vrot.slane %v7911_v60, 2 }
 0x594   : > { %v3159_v41 = vpop.permute.xlu1 %3158  ;;  %v3155_v13 = vpop.permute.xlu0 %3154  ;;  %v7994_v46 = vsel %vm1323_vm3, %v3887_v5, %v3889_v8  ;;  %v8031_v26 = vsel %vm1323_vm3, %v3886_v40, %v3887_v5 }
 0x595   : > { %v7960_v4 = vsel %vm625_vm1, %v3187_v63, %v3155_v13  ;;  %v7971_v54 = vsel %vm625_vm1, %v3189_v28, %v3159_v41  ;;  %v8041_v41 = vsel %vm2018_vm4, %v4580_v48, %v4581_v19 }
 0x596   : > { %3426 = vrot.lane.b32.xlu1 %v7960_v4, %s6154_s6  ;;  %v3894_v14 = vrot.slane %v7971_v54, 1  ;;  %v3891_v42 = vrot.slane %v7960_v4, 1  ;;  %v4585_v13 = vrot.slane %v7960_v4, 2 }
 0x598   : > { %v3165_v20 = vpop.permute.xlu1 %3164  ;;  %v3161_v32 = vpop.permute.xlu0 %3160  ;;  %v8025_v43 = vsel %vm1323_vm3, %v3892_v38, %v3894_v14 }
 0x599   : > { %v7974_v0 = vsel %vm625_vm1, %v3192_v16, %v3165_v20  ;;  %v7977_v45 = vsel %vm625_vm1, %v3190_v47, %v3161_v32  ;;  %v8055_v47 = vsel %vm1323_vm3, %v3891_v42, %v3892_v38 }
 0x59a   : > { %v3899_v39 = vrot.slane %v7974_v0, 1  ;;  %v3208_v56 = vcombine.low %v7942_v30, %v7977_v45  ;;  %v3209_v10 = vcombine.high %v7942_v30, %v7977_v45  ;;  %3430 = vrot.lane.b32.xlu0 %v7977_v45, %s6154_s6  ;;  %v3896_v51 = vrot.slane %v7977_v45, 1 }
 0x59b   : > { %v4590_v27 = vrot.slane %v7977_v45, 2 }
 0x59c   : > { %v3171_v49 = vpop.permute.xlu1 %3170  ;;  %v3167_v24 = vpop.permute.xlu0 %3166  ;;  %v7997_v31 = vsel %vm1323_vm3, %v3897_v58, %v3899_v39  ;;  %v8052_v16 = vsel %vm1323_vm3, %v3896_v51, %v3897_v58  ;;  %v8069_v5 = vrot.slane %v3209_v10, %v6218_v17  ;;  %v4587_v51 = vsel %vm2018_vm4, %v4585_v13, %v4586_v29 }
 0x59d   : > { %v8001_v62 = vsel %vm625_vm1, %v3195_v61, %v3171_v49  ;;  %v8004_v35 = vsel %vm625_vm1, %v3193_v1, %v3167_v24  ;;  %v3982_v11 = vcombine.low %v7994_v46, %v7997_v31  ;;  %v3983_v21 = vcombine.high %v7994_v46, %v7997_v31 }
 0x59e   : > { %v3904_v6 = vrot.slane %v8001_v62, 1  ;;  %v3224_v50 = vcombine.low %v7960_v4, %v8004_v35  ;;  %v3225_v9 = vcombine.high %v7960_v4, %v8004_v35  ;;  %3654 = vrot.lane.b32.xlu0 %v7902_v57, %s6157_s9  ;;  %3434 = vrot.lane.b32.xlu1 %v8004_v35, %s6154_s6  ;;  %v3901_v61 = vrot.slane %v8004_v35, 1 }
 0x59f   : > { %v8049_v28 = vrot.slane %v3982_v11, %v6218_v17  ;;  %v3914_v20 = vcombine.low %v8031_v26, %v8052_v16  ;;  %v3915_v32 = vcombine.high %v8031_v26, %v8052_v16  ;;  %v8080_v38 = vsel %vm2018_vm4, %v4590_v27, %v4591_v7 }
 0x5a0   : > { %v8028_v34 = vsel %vm1323_vm3, %v3902_v37, %v3904_v6  ;;  %v8072_v39 = vrot.slane %v3225_v9, %v6218_v17  ;;  %v8075_v58 = vsel %vm1323_vm3, %v3901_v61, %v3902_v37  ;;  %v8083_v40 = vrot.slane %v3224_v50, %v6218_v17 }
 0x5a1   : > { %v3998_v52 = vcombine.low %v8025_v43, %v8028_v34  ;;  %v3999_v63 = vcombine.high %v8025_v43, %v8028_v34  ;;  %v8086_v48 = vrot.slane %v3983_v21, %v6218_v17  ;;  %v3930_v14 = vcombine.low %v8055_v47, %v8075_v58 }
 0x5a2   : > { %3662 = vrot.lane.b32.xlu0 %v7914_v33, %s6157_s9  ;;  %3658 = vrot.lane.b32.xlu1 %v7899_v25, %s6157_s9  ;;  %v8097_v37 = vrot.slane %v3914_v20, %v6218_v17  ;;  %v3931_v49 = vcombine.high %v8055_v47, %v8075_v58  ;;  %v4608_v24 = vcombine.low %v8041_v41, %v8080_v38  ;;  %v4595_v42 = vrot.slane %v8004_v35, 2 }
 0x5a3   : > { %v8059_v1 = vrot.slane %v3998_v52, %v6218_v17  ;;  %v8062_v8 = vrot.slane %v3999_v63, %v6218_v17  ;;  %v8105_v11 = vrot.slane %v3930_v14, %v6218_v17  ;;  %v4609_v21 = vcombine.high %v8041_v41, %v8080_v38 }
 0x5a4   : > { %v8114_v9 = vrot.slane %v3931_v49, %v6218_v17  ;;  %v4597_v27 = vsel %vm2018_vm4, %v4595_v42, %v4596_v55  ;;  %v3256_v52 = vcombine.low %v8069_v5, %v8072_v39  ;;  %v8128_v63 = vrot.slane %v3208_v56, %v6218_v17 }
 0x5a5   : > { %v4015_v6 = vcombine.high %v8049_v28, %v8059_v1  ;;  %v4030_v50 = vcombine.low %v8086_v48, %v8062_v8  ;;  %v4624_v20 = vcombine.low %v4587_v51, %v4597_v27  ;;  %v8137_v13 = vrot.slane %v3915_v32, %v6218_v17 }
 0x5a6   : > { %3652 = vrot.lane.b32.xlu0 %v7942_v30, %s6157_s9  ;;  %3666 = vrot.lane.b32.xlu1 %v7911_v60, %s6157_s9  ;;  %v3947_v14 = vcombine.high %v8097_v37, %v8105_v11  ;;  %v8142_v30 = vrot.slane %v4608_v24, %v6218_v17  ;;  %v4625_v42 = vcombine.high %v4587_v51, %v4597_v27  ;;  %v4583_v61 = vrot.slane %v7957_v53, 2 }
 0x5a7   : > { %v8145_v56 = vrot.slane %v4624_v20, %v6218_v17  ;;  %v8174_v24 = vrot.slane %v4609_v21, %v6218_v17  ;;  %v4588_v53 = vrot.slane %v7971_v54, 2  ;;  %v4593_v20 = vrot.slane %v7974_v0, 2 }
 0x5a8   : > { %9543 = vst [vmem:[#allocation10_spill] sm:$0xff] %v8142_v30  ;;  %v8166_v10 = vrot.slane %v4625_v42, %v6218_v17  ;;  %v8187_v32 = vsel %vm2018_vm4, %v4581_v19, %v4583_v61  ;;  %v4598_v21 = vrot.slane %v8001_v62, 2 }
 0x5a9   : > { %9544 = vst [vmem:[#allocation3_spill] sm:$0xff] %v8145_v56  ;;  %9546 = vst [vmem:[#allocation4_spill] sm:$0xff] %v8174_v24  ;;  %v8197_v42 = vsel %vm2018_vm4, %v4591_v7, %v4593_v20  ;;  %v8202_v57 = vsel %vm2018_vm4, %v4586_v29, %v4588_v53 }
 0x5aa   : > { %3660 = vrot.lane.b32.xlu0 %v7977_v45, %s6157_s9  ;;  %3656 = vrot.lane.b32.xlu1 %v7960_v4, %s6157_s9  ;;  %9545 = vst [vmem:[#allocation2_spill] sm:$0xff] %v8166_v10  ;;  %v8211_v54 = vsel %vm2018_vm4, %v4596_v55, %v4598_v21 }
 0x5ae   : > { %4352 = vrot.lane.b32.xlu0 %v7994_v46, %s6157_s9  ;;  %3664 = vrot.lane.b32.xlu1 %v8004_v35, %s6157_s9 }
 0x5b2   : > { %4360 = vrot.lane.b32.xlu0 %v7997_v31, %s6157_s9  ;;  %4356 = vrot.lane.b32.xlu1 %v8025_v43, %s6157_s9 }
 0x5b6   : > { %4816 = vrot.lane.b32.xlu0 %v8187_v32, %s6154_s6  ;;  %4364 = vrot.lane.b32.xlu1 %v8028_v34, %s6157_s9 }
 0x5ba   : > { %4824 = vrot.lane.b32.xlu0 %v8197_v42, %s6154_s6  ;;  %4820 = vrot.lane.b32.xlu1 %v8202_v57, %s6154_s6 }
 0x5be   : > { %4350 = vrot.lane.b32.xlu0 %v8031_v26, %s6157_s9  ;;  %4828 = vrot.lane.b32.xlu1 %v8211_v54, %s6154_s6 }
 0x5c2   : > { %4358 = vrot.lane.b32.xlu0 %v8052_v16, %s6157_s9  ;;  %4354 = vrot.lane.b32.xlu1 %v8055_v47, %s6157_s9 }
 0x5c6   : > { %4814 = vrot.lane.b32.xlu0 %v8041_v41, %s6154_s6  ;;  %4362 = vrot.lane.b32.xlu1 %v8075_v58, %s6157_s9 }
 0x5ca   : > { %4822 = vrot.lane.b32.xlu0 %v8080_v38, %s6154_s6  ;;  %4818 = vrot.lane.b32.xlu1 %v4587_v51, %s6154_s6 }
 0x5ce   : > { %4122 = vrot.lane.b32.xlu0 %v7994_v46, %s6154_s6  ;;  %4826 = vrot.lane.b32.xlu1 %v4597_v27, %s6154_s6 }
 0x5d2   : > { %4130 = vrot.lane.b32.xlu0 %v7997_v31, %s6154_s6  ;;  %4126 = vrot.lane.b32.xlu1 %v8025_v43, %s6154_s6  ;;  %v8274_v43 = vrot.slane %v4015_v6, %v6225_v36 }
 0x5d6   : > { %4120 = vrot.lane.b32.xlu0 %v8031_v26, %s6154_s6  ;;  %4134 = vrot.lane.b32.xlu1 %v8028_v34, %s6154_s6 }
 0x5da   : > { %4128 = vrot.lane.b32.xlu0 %v8052_v16, %s6154_s6  ;;  %4124 = vrot.lane.b32.xlu1 %v8055_v47, %s6154_s6 }
 0x5de   : > { %5044 = vrot.lane.b32.xlu0 %v8041_v41, %s6157_s9  ;;  %4132 = vrot.lane.b32.xlu1 %v8075_v58, %s6154_s6 }
 0x5e2   : > { %5048 = vrot.lane.b32.xlu0 %v4587_v51, %s6157_s9  ;;  %5046 = vrot.lane.b32.xlu1 %v8187_v32, %s6157_s9 }
 0x5e6   : > { %5052 = vrot.lane.b32.xlu0 %v8080_v38, %s6157_s9  ;;  %5050 = vrot.lane.b32.xlu1 %v8202_v57, %s6157_s9 }
 0x5ea   : > { %5056 = vrot.lane.b32.xlu0 %v4597_v27, %s6157_s9  ;;  %5054 = vrot.lane.b32.xlu1 %v8197_v42, %s6157_s9 }
 0x5ee   : > { %5058 = vrot.lane.b32.xlu1 %v8211_v54, %s6157_s9 }
 0x5fc   : > { %v3429_v25 = vpop.permute.xlu1 %3428  ;;  %v3425_v60 = vpop.permute.xlu0 %3424 }
 0x600   : > { %v3437_v33 = vpop.permute.xlu1 %3436 }
 0x601   : > { %v3530_v0 = vcombine.low %v3429_v25, %v3437_v33  ;;  %v3433_v46 = vpop.permute.xlu0 %3432  ;;  %v3531_v61 = vcombine.high %v3429_v25, %v3437_v33 }
 0x602   : > { %v3514_v31 = vcombine.low %v3425_v60, %v3433_v46  ;;  %v3515_v6 = vcombine.high %v3425_v60, %v3433_v46 }
 0x603   : > { %v8260_v62 = vrot.slane %v3530_v0, %v6218_v17 }
 0x604   : > { %v8263_v19 = vrot.slane %v3514_v31, %v6218_v17  ;;  %v8300_v25 = vrot.slane %v3515_v6, %v6218_v17 }
 0x605   : > { %v3423_v29 = vpop.permute.xlu0 %3422 }
 0x606   : > { %v3547_v7 = vcombine.high %v8263_v19, %v8260_v62 }
 0x608   : > { %v8268_v55 = vrot.slane %v3547_v7, %v6225_v36  ;;  %v3427_v26 = vpop.permute.xlu1 %3426  ;;  %v8294_v7 = vrot.slane %v3947_v14, %v6225_v36 }
 0x60a   : > { %v5814_v34 = vpack.i.bf16 %v8274_v43, %v8268_v55 }
 0x60c   : > { %5815 = vrot.lane.b32.xlu0 %v5814_v34, %s6148_s28  ;;  %v3431_v41 = vpop.permute.xlu0 %3430  ;;  %v8297_v34 = vrot.slane %v3531_v61, %v6218_v17 }
 0x60d   : > { %v3446_v16 = vcombine.low %v3423_v29, %v3431_v41  ;;  %v3447_v12 = vcombine.high %v3423_v29, %v3431_v41 }
 0x60e   : > { %v3562_v14 = vcombine.low %v8300_v25, %v8297_v34 }
 0x60f   : > { %v8280_v51 = vrot.slane %v3446_v16, %v6218_v17 }
 0x610   : > { %v3435_v47 = vpop.permute.xlu1 %3434  ;;  %v3655_v58 = vpop.permute.xlu0 %3654  ;;  %v8328_v45 = vrot.slane %v3562_v14, %v6225_v36 }
 0x611   : > { %v3462_v38 = vcombine.low %v3427_v26, %v3435_v47  ;;  %v3463_v61 = vcombine.high %v3427_v26, %v3435_v47 }
 0x613   : > { %v8283_v27 = vrot.slane %v3462_v38, %v6218_v17 }
 0x614   : > { %v3659_v20 = vpop.permute.xlu1 %3658  ;;  %v3663_v53 = vpop.permute.xlu0 %3662 }
 0x615   : > { %v3479_v21 = vcombine.high %v8280_v51, %v8283_v27  ;;  %v3744_v0 = vcombine.low %v3655_v58, %v3663_v53  ;;  %v3745_v49 = vcombine.high %v3655_v58, %v3663_v53 }
 0x617   : > { %v8288_v31 = vrot.slane %v3479_v21, %v6225_v36  ;;  %v8305_v38 = vrot.slane %v3744_v0, %v6218_v17  ;;  %v8319_v0 = vrot.slane %v3309_v15, %v6225_v36  ;;  %v3461_v15 = vrot.slane %v3447_v12, %v6218_v17 }
 0x618   : > { %v3667_v60 = vpop.permute.xlu1 %3666  ;;  %v3653_v33 = vpop.permute.xlu0 %3652 }
 0x619   : > { %v3760_v46 = vcombine.low %v3659_v20, %v3667_v60  ;;  %v5819_v16 = vpack.i.bf16 %v8294_v7, %v8288_v31  ;;  %v3761_v29 = vcombine.high %v3659_v20, %v3667_v60 }
 0x61b   : > { %v8308_v21 = vrot.slane %v3760_v46, %v6218_v17  ;;  %5820 = vrot.lane.b32.xlu0 %v5819_v16, %s6148_s28  ;;  %v3477_v16 = vrot.slane %v3463_v61, %v6218_v17 }
 0x61c   : > { %v3657_v6 = vpop.permute.xlu1 %3656  ;;  %v3661_v44 = vpop.permute.xlu0 %3660 }
 0x61d   : > { %v3777_v35 = vcombine.high %v8305_v38, %v8308_v21  ;;  %v3676_v59 = vcombine.low %v3653_v33, %v3661_v44  ;;  %v3677_v4 = vcombine.high %v3653_v33, %v3661_v44  ;;  %v3495_v53 = vcombine.high %v3461_v15, %v3477_v16 }
 0x61f   : > { %v8322_v46 = vrot.slane %v3777_v35, %v6225_v36  ;;  %v8337_v35 = vrot.slane %v4030_v50, %v6225_v36  ;;  %v8340_v61 = vrot.slane %v3676_v59, %v6218_v17  ;;  %v3691_v14 = vrot.slane %v3677_v4, %v6218_v17 }
 0x620   : > { %v3665_v26 = vpop.permute.xlu1 %3664  ;;  %v8325_v47 = vpop.permute.xlu0 %4352  ;;  %v3775_v59 = vrot.slane %v3761_v29, %v6218_v17  ;;  %v9549_v29 = vcombine.high %v8128_v63, %v8083_v40 }
 0x621   : > { %v3692_v41 = vcombine.low %v3657_v6, %v3665_v26  ;;  %v3693_v44 = vcombine.high %v3657_v6, %v3665_v26  ;;  %v5824_v33 = vpack.i.bf16 %v8322_v46, %v8319_v0  ;;  %v5829_v50 = vpack.i.bf16 %v8337_v35, %v8328_v45 }
 0x622   : > { %v3494_v26 = vcombine.low %v3461_v15, %v3477_v16  ;;  %v8372_v10 = vrot.slane %v9549_v29, %v6225_v36 }
 0x623   : > { %v8344_v20 = vrot.slane %v3692_v41, %v6218_v17  ;;  %v3707_v60 = vrot.slane %v3693_v44, %v6218_v17  ;;  %5825 = vrot.lane.b32.xlu1 %v5824_v33, %s6148_s28  ;;  %v8361_v41 = vrot.slane %v3256_v52, %v6225_v36  ;;  %v3759_v44 = vrot.slane %v3745_v49, %v6218_v17 }
 0x624   : > { %v8348_v12 = vpop.permute.xlu1 %4356  ;;  %v8350_v58 = vpop.permute.xlu0 %4360  ;;  %v8389_v29 = vrot.slane %v3494_v26, %v6225_v36  ;;  %v3478_v26 = vcombine.low %v8280_v51, %v8283_v27  ;;  %v9553_v51 = vcombine.high %v7939_v2, %v7933_v23  ;;  %v9554_v27 = vcombine.low %v7939_v2, %v7933_v23 }
 0x625   : > { %v3709_v4 = vcombine.high %v8340_v61, %v8344_v20  ;;  %v3724_v6 = vcombine.low %v3691_v14, %v3707_v60  ;;  %9547 = vst [vmem:[#allocation5_spill] sm:$0xff] %v8361_v41  ;;  %v3793_v24 = vcombine.high %v3759_v44, %v3775_v59  ;;  %v3792_v56 = vcombine.low %v3759_v44, %v3775_v59 }
 0x626   : > { %v3725_v44 = vcombine.high %v3691_v14, %v3707_v60  ;;  %v3708_v23 = vcombine.low %v8340_v61, %v8344_v20 }
 0x627   : > { %5830 = vrot.lane.b32.xlu1 %v5829_v50, %s6146_s26  ;;  %v8366_v33 = vrot.slane %v3724_v6, %v6225_v36  ;;  %v8375_v16 = vrot.slane %v3709_v4, %v6225_v36  ;;  %v8386_v6 = vrot.slane %v3495_v53, %v6225_v36  ;;  %v9551_v4 = vcombine.high %v8137_v13, %v8114_v9 }
 0x628   : > { %v8377_v15 = vpop.permute.xlu1 %4364  ;;  %v8379_v52 = vpop.permute.xlu0 %4816  ;;  %v9552_v53 = vcombine.low %v8137_v13, %v8114_v9  ;;  %v8423_v13 = vrot.slane %v3792_v56, %v6225_v36  ;;  %v8441_v56 = vrot.slane %v9554_v27, %v6225_v36  ;;  %v8451_v60 = vrot.slane %v3725_v44, %v6225_v36 }
 0x629   : > { %9548 = vst [vmem:[#allocation7_spill] sm:$0xff] %v8366_v33  ;;  %9550 = vst [vmem:[#allocation6_spill] sm:$0xff] %v8379_v52  ;;  %v5854_v49 = vpack.i.bf16 %v8366_v33, %v8361_v41  ;;  %v5834_v50 = vpack.i.bf16 %v8375_v16, %v8372_v10  ;;  %v8397_v30 = vrot.slane %v9551_v4, %v6225_v36 }
 0x62a   : > { %v8407_v59 = vrot.slane %v9552_v53, %v6225_v36  ;;  %v3546_v4 = vcombine.low %v8263_v19, %v8260_v62  ;;  %v3563_v52 = vcombine.high %v8300_v25, %v8297_v34  ;;  %v8444_v34 = vrot.slane %v3478_v26, %v6225_v36 }
 0x62b   : > { %5855 = vrot.lane.b32.xlu1 %v5854_v49, %s6146_s26  ;;  %5835 = vrot.lane.b32.xlu0 %v5834_v50, %s6148_s28  ;;  %v5859_v49 = vpack.i.bf16 %v8397_v30, %v8386_v6  ;;  %v8414_v50 = vrot.slane %v3793_v24, %v6225_v36  ;;  %v8430_v24 = vrot.slane %v9553_v51, %v6225_v36 }
 0x62c   : > { %v8399_v41 = vpop.permute.xlu1 %4820  ;;  %v8401_v33 = vpop.permute.xlu0 %4824  ;;  %v5839_v9 = vpack.i.bf16 %v8407_v59, %v8389_v29  ;;  %9555 = vst [vmem:[#allocation8_spill] sm:$0xff] %v8444_v34  ;;  %v3776_v25 = vcombine.low %v8305_v38, %v8308_v21  ;;  %v8454_v53 = vrot.slane %v3546_v4, %v6225_v36  ;;  %v5844_v2 = vpack.i.bf16 %v8423_v13, %v8441_v56 }
 0x62d   : > { %v5864_v14 = vpack.i.bf16 %v8414_v50, %v8430_v24  ;;  %v8461_v26 = vrot.slane %v3563_v52, %v6225_v36  ;;  %v9557_v38 = vcombine.high %v8069_v5, %v8072_v39  ;;  %v9558_v44 = vcombine.low %v8097_v37, %v8105_v11 }
 0x62e   : > { %9556 = vst [vmem:[#allocation9_spill] sm:$0xff] %v8454_v53  ;;  %v9560_v52 = vcombine.high %v8086_v48, %v8062_v8  ;;  %v9561_v5 = vcombine.low %v8049_v28, %v8059_v1  ;;  %v8492_v37 = vrot.slane %v3776_v25, %v6225_v36  ;;  %v8499_v51 = vrot.slane %v3708_v23, %v6225_v36 }
 0x62f   : > { %5860 = vrot.lane.b32.xlu1 %v5859_v49, %s6147_s27  ;;  %5840 = vrot.lane.b32.xlu0 %v5839_v9, %s6146_s26  ;;  %v8468_v21 = vrot.slane %v9557_v38, %v6225_v36  ;;  %v8474_v49 = vrot.slane %v9558_v44, %v6225_v36  ;;  %v3510_v9 = vcombine.high %v8444_v34, %v9515_v18 }
 0x630   : > { %v8433_v62 = vpop.permute.xlu1 %4828  ;;  %v8435_v19 = vpop.permute.xlu0 %4350  ;;  %v4045_v4 = vrot.slane %v9560_v52, %v6225_v36  ;;  %v8489_v39 = vrot.slane %v9561_v5, %v6225_v36  ;;  %9563 = vst [vmem:[#allocation13_spill] sm:$0xff] %v8492_v37  ;;  %9564 = vst [vmem:[#allocation14_spill] sm:$0xff] %v8499_v51  ;;  %v3578_v48 = vcombine.high %v8454_v53, %v9515_v18 }
 0x631   : > { %9559 = vst [vmem:[#allocation11_spill] sm:$0xff] %v8474_v49  ;;  %v5869_v11 = vpack.i.bf16 %v8451_v60, %v8468_v21  ;;  %v3978_v28 = vcombine.high %v8474_v49, %v9515_v18  ;;  %v9565_v1 = vcombine.low %v7936_v22, %v7930_v3  ;;  %v3808_v3 = vcombine.high %v8492_v37, %v9515_v18 }
 0x632   : > { %9562 = vst [vmem:[#allocation12_spill] sm:$0xff] %v8489_v39  ;;  %v5849_v8 = vpack.i.bf16 %v4045_v4, %v8461_v26  ;;  %v4046_v23 = vcombine.high %v8489_v39, %v9515_v18  ;;  %v3740_v52 = vcombine.high %v8499_v51, %v9515_v18 }
 0x633   : > { %5865 = vrot.lane.b32.xlu1 %v5864_v14, %s6147_s27  ;;  %5845 = vrot.lane.b32.xlu0 %v5844_v2, %s6146_s26  ;;  %v8511_v27 = vrot.slane %v9565_v1, %v6225_v36  ;;  %v9567_v2 = vcombine.low %v8128_v63, %v8083_v40  ;;  %v5879_v44 = vpack.i.bf16 %v3978_v28, %v3510_v9 }
 0x634   : > { %v8477_v61 = vpop.permute.xlu1 %4354  ;;  %v8479_v20 = vpop.permute.xlu0 %4358  ;;  %v5874_v22 = vpack.i.bf16 %v4046_v23, %v3578_v48  ;;  %v3511_v28 = vcombine.high %v8288_v31, %v9515_v18  ;;  %v4047_v1 = vcombine.high %v8274_v43, %v9515_v18  ;;  %v4677_v31 = vcombine.high %v8187_v32, %v8197_v42 }
 0x635   : > { %9566 = vst [vmem:[#allocation15_spill] sm:$0xff] %v8511_v27  ;;  %v8524_v38 = vrot.slane %v9567_v2, %v6225_v36  ;;  %v3340_v5 = vcombine.high %v8511_v27, %v9515_v18  ;;  %v4692_v43 = vcombine.low %v8202_v57, %v8211_v54 }
 0x637   : > { %5870 = vrot.lane.b32.xlu1 %v5869_v11, %s6147_s27  ;;  %5850 = vrot.lane.b32.xlu0 %v5849_v8, %s6147_s27  ;;  %9568 = vst [vmem:[#allocation16_spill] sm:$0xff] %v8524_v38  ;;  %v3272_v63 = vcombine.high %v8524_v38, %v9515_v18  ;;  %v5884_v9 = vpack.i.bf16 %v3808_v3, %v3340_v5 }
 0x638   : > { %v8514_v25 = vpop.permute.xlu1 %4362  ;;  %v8516_v14 = vpop.permute.xlu0 %4814  ;;  %v3579_v8 = vcombine.high %v8268_v55, %v9515_v18  ;;  %v4676_v55 = vcombine.low %v8187_v32, %v8197_v42 }
 0x639   : > { %v5894_v48 = vpack.i.bf16 %v3740_v52, %v3272_v63  ;;  %v4693_v52 = vcombine.high %v8202_v57, %v8211_v54  ;;  %v3341_v63 = vcombine.high %v8319_v0, %v9515_v18  ;;  %v8578_v57 = vcombine.high %v8430_v24, %v9515_v18 }
 0x63a   : > { %v5889_v3 = vpack.i.bf16 %v4047_v1, %v3579_v8  ;;  %v8581_v54 = vrot.slane %v4676_v55, %v6218_v17  ;;  %v8589_v8 = vrot.slane %v4692_v43, %v6218_v17  ;;  %v3581_v24 = vcombine.high %v8461_v26, %v9515_v18 }
 0x63b   : > { %5880 = vrot.lane.b32.xlu1 %v5879_v44, %s6150_s30  ;;  %5875 = vrot.lane.b32.xlu0 %v5874_v22, %s6150_s30  ;;  %v3979_v44 = vcombine.high %v8294_v7, %v9515_v18  ;;  %v3809_v22 = vcombine.high %v8322_v46, %v9515_v18  ;;  %v3810_v7 = vcombine.high %v8423_v13, %v9515_v18 }
 0x63c   : > { %v8534_v11 = vpop.permute.xlu1 %4818  ;;  %v8536_v40 = vpop.permute.xlu0 %4822  ;;  %v3342_v46 = vcombine.high %v8441_v56, %v9515_v18  ;;  %v8584_v13 = vrot.slane %v4677_v31, %v6218_v17  ;;  %v4048_v1 = vcombine.high %v8337_v35, %v9515_v18  ;;  %v4922_v55 = vcombine.low %v8399_v41, %v8433_v62 }
 0x63d   : > { %v5899_v5 = vpack.i.bf16 %v3979_v44, %v3511_v28  ;;  %v5904_v0 = vpack.i.bf16 %v3809_v22, %v3341_v63  ;;  %v4458_v28 = vcombine.low %v8348_v12, %v8377_v15  ;;  %v3273_v44 = vcombine.high %v8372_v10, %v9515_v18 }
 0x63e   : > { %v5924_v56 = vpack.i.bf16 %v3810_v7, %v3342_v46  ;;  %v3980_v35 = vcombine.high %v8407_v59, %v9515_v18  ;;  %v4442_v10 = vcombine.low %v8325_v47, %v8350_v58  ;;  %v3741_v43 = vcombine.high %v8375_v16, %v9515_v18  ;;  %v9570_v59 = vld [vmem:[#allocation7_spill] sm:$0xff]  ;;  %v9571_v16 = vld [vmem:[#allocation5_spill] sm:$0xff] }
 0x63f   : > { %5885 = vrot.lane.b32.xlu1 %v5884_v9, %s6150_s30  ;;  %5895 = vrot.lane.b32.xlu0 %v5894_v48, %s6150_s30  ;;  %v3580_v9 = vcombine.high %v8328_v45, %v9515_v18  ;;  %v8592_v48 = vrot.slane %v4693_v52, %v6218_v17  ;;  %v4049_v45 = vcombine.high %v4045_v4, %v9515_v18 }
 0x640   : > { %v8548_v23 = vpop.permute.xlu1 %4826  ;;  %v8550_v2 = vpop.permute.xlu0 %4122  ;;  %v3513_v4 = vcombine.high %v8386_v6, %v9515_v18  ;;  %v8623_v52 = vcombine.high %v8414_v50, %v9515_v18  ;;  %v3742_v63 = vcombine.high %v9570_v59, %v9515_v18  ;;  %v3981_v6 = vcombine.high %v8397_v30, %v9515_v18 }
 0x641   : > { %v5909_v22 = vpack.i.bf16 %v4048_v1, %v3580_v9  ;;  %v5929_v7 = vpack.i.bf16 %v4049_v45, %v3581_v24  ;;  %v8632_v46 = vrot.slane %v4458_v28, %v6218_v17  ;;  %v3275_v50 = vcombine.high %v8468_v21, %v9515_v18  ;;  %v9572_v9 = vld [vmem:[#allocation10_spill] sm:$0xff] }
 0x642   : > { %v8646_v45 = vrot.slane %v4922_v55, %v6218_v17  ;;  %v5939_v59 = vpack.i.bf16 %v3981_v6, %v3513_v4  ;;  %v3743_v21 = vcombine.high %v8451_v60, %v9515_v18  ;;  %v5914_v38 = vpack.i.bf16 %v3741_v43, %v3273_v44 }
 0x643   : > { %5890 = vrot.lane.b32.xlu1 %v5889_v3, %s6149_s29  ;;  %5900 = vrot.lane.b32.xlu0 %v5899_v5, %s6149_s29  ;;  %v3512_v3 = vcombine.high %v8389_v29, %v9515_v18  ;;  %v9569_v5 = vld [vmem:[#allocation6_spill] sm:$0xff]  ;;  %v5944_v55 = vpack.i.bf16 %v8623_v52, %v8578_v57  ;;  %v4459_v4 = vcombine.high %v8348_v12, %v8377_v15 }
 0x644   : > { %v8570_v32 = vpop.permute.xlu1 %4126  ;;  %v8572_v42 = vpop.permute.xlu0 %4130  ;;  %v4906_v29 = vcombine.low %v9569_v5, %v8401_v33  ;;  %v4839_v44 = vcombine.high %v8516_v14, %v8536_v40  ;;  %v4838_v12 = vcombine.low %v8516_v14, %v8536_v40  ;;  %v5949_v52 = vpack.i.bf16 %v3743_v21, %v3275_v50 }
 0x645   : > { %v4213_v50 = vcombine.high %v8550_v2, %v8572_v42 }
 0x647   : > { %5905 = vrot.lane.b32.xlu1 %v5904_v0, %s6149_s29  ;;  %5925 = vrot.lane.b32.xlu0 %v5924_v56, %s6144_s24  ;;  %v3274_v0 = vcombine.high %v9571_v16, %v9515_v18  ;;  %v9573_v56 = vld [vmem:[#allocation3_spill] sm:$0xff]  ;;  %v8656_v16 = vrot.slane %v4442_v10, %v6218_v17 }
 0x648   : > { %v8607_v31 = vpop.permute.xlu1 %4134  ;;  %v8609_v26 = vpop.permute.xlu0 %4120  ;;  %v9574_v24 = vcombine.high %v9572_v9, %v9573_v56 }
 0x649   : > { %v5934_v60 = vpack.i.bf16 %v3742_v63, %v3274_v0  ;;  %v4475_v10 = vcombine.high %v8656_v16, %v8632_v46  ;;  %v4229_v63 = vcombine.high %v8570_v32, %v8607_v31  ;;  %v4228_v6 = vcombine.low %v8570_v32, %v8607_v31 }
 0x64a   : > { %v8643_v1 = vrot.slane %v9574_v24, %v6225_v36  ;;  %v4855_v24 = vcombine.high %v8534_v11, %v8548_v23  ;;  %v8709_v0 = vrot.slane %v4839_v44, %v6218_v17  ;;  %v8726_v32 = vrot.slane %v4838_v12, %v6218_v17 }
 0x64b   : > { %5910 = vrot.lane.b32.xlu1 %v5909_v22, %s6144_s24  ;;  %5930 = vrot.lane.b32.xlu0 %v5929_v7, %s6145_s25  ;;  %v5919_v22 = vpack.i.bf16 %v3980_v35, %v3512_v3  ;;  %v8663_v7 = vrot.slane %v4906_v29, %v6218_v17  ;;  %v4391_v3 = vcombine.high %v8477_v61, %v8514_v25 }
 0x64c   : > { %v8649_v30 = vpop.permute.xlu1 %4124  ;;  %v8651_v28 = vpop.permute.xlu0 %4128  ;;  %v4854_v35 = vcombine.low %v8534_v11, %v8548_v23  ;;  %v4390_v11 = vcombine.low %v8477_v61, %v8514_v25  ;;  %v4375_v29 = vcombine.high %v8435_v19, %v8479_v20  ;;  %v4374_v25 = vcombine.low %v8435_v19, %v8479_v20 }
 0x64d   : > { %v4144_v57 = vcombine.low %v8609_v26, %v8651_v28  ;;  %v4939_v43 = vcombine.high %v8663_v7, %v8646_v45  ;;  %v8701_v14 = vrot.slane %v4391_v3, %v6218_v17  ;;  %v4923_v20 = vcombine.high %v8399_v41, %v8433_v62 }
 0x64e   : > { %v8704_v40 = vrot.slane %v4854_v35, %v6218_v17  ;;  %v4212_v31 = vcombine.low %v8550_v2, %v8572_v42  ;;  %v8741_v62 = vrot.slane %v4229_v63, %v6218_v17  ;;  %v8749_v42 = vrot.slane %v4374_v25, %v6218_v17 }
 0x64f   : > { %5915 = vrot.lane.b32.xlu1 %v5914_v38, %s6149_s29  ;;  %5935 = vrot.lane.b32.xlu0 %v5934_v60, %s6144_s24  ;;  %v8692_v38 = vrot.slane %v4855_v24, %v6218_v17  ;;  %v8714_v21 = vrot.slane %v4144_v57, %v6218_v17  ;;  %v8723_v24 = vrot.slane %v4390_v11, %v6218_v17 }
 0x650   : > { %v8685_v15 = vpop.permute.xlu1 %4132  ;;  %v8687_v23 = vpop.permute.xlu0 %5044  ;;  %v8746_v2 = vrot.slane %v4939_v43, %v6225_v36  ;;  %v8754_v44 = vrot.slane %v4228_v6, %v6218_v17  ;;  %v4907_v57 = vcombine.high %v9569_v5, %v8401_v33  ;;  %v8761_v12 = vrot.slane %v4213_v50, %v6218_v17 }
 0x651   : > { %v4160_v61 = vcombine.low %v8649_v30, %v8685_v15  ;;  %v4886_v41 = vcombine.low %v8709_v0, %v8692_v38  ;;  %v8770_v63 = vrot.slane %v4475_v10, %v6225_v36  ;;  %v4407_v33 = vcombine.high %v8749_v42, %v8723_v24 }
 0x652   : > { %v8775_v5 = vrot.slane %v4212_v31, %v6218_v17  ;;  %v4161_v50 = vcombine.high %v8649_v30, %v8685_v15  ;;  %v4473_v31 = vrot.slane %v4459_v4, %v6218_v17  ;;  %v4145_v30 = vcombine.high %v8609_v26, %v8651_v28 }
 0x653   : > { %v8717_v19 = vrot.slane %v4160_v61, %v6218_v17  ;;  %5920 = vrot.lane.b32.xlu1 %v5919_v22, %s6144_s24  ;;  %5940 = vrot.lane.b32.xlu0 %v5939_v59, %s6145_s25  ;;  %v8736_v22 = vrot.slane %v4375_v29, %v6218_v17  ;;  %v4871_v59 = vcombine.high %v8726_v32, %v8704_v40 }
 0x654   : > { %v8731_v3 = vpop.permute.xlu1 %5046  ;;  %v8733_v35 = vpop.permute.xlu0 %5048  ;;  %v4443_v29 = vcombine.high %v8325_v47, %v8350_v58  ;;  %v8784_v6 = vrot.slane %v4886_v41, %v6225_v36  ;;  %v4260_v47 = vcombine.low %v8761_v12, %v8741_v62  ;;  %v4921_v41 = vrot.slane %v4907_v57, %v6218_v17 }
 0x655   : > { %v4177_v60 = vcombine.high %v8714_v21, %v8717_v19  ;;  %v4422_v11 = vcombine.low %v8736_v22, %v8701_v14  ;;  %v8791_v10 = vrot.slane %v4871_v59, %v6225_v36  ;;  %v4724_v59 = vcombine.low %v8584_v13, %v8592_v48 }
 0x656   : > { %v8808_v51 = vrot.slane %v4407_v33, %v6225_v36  ;;  %v4709_v57 = vcombine.high %v8581_v54, %v8589_v8  ;;  %v8821_v27 = vrot.slane %v4260_v47, %v6225_v36  ;;  %v8829_v28 = vrot.slane %v4161_v50, %v6218_v17 }
 0x657   : > { %v8764_v43 = vrot.slane %v4177_v60, %v6225_v36  ;;  %5950 = vrot.lane.b32.xlu1 %v5949_v52, %s6145_s25  ;;  %5945 = vrot.lane.b32.xlu0 %v5944_v55, %s6145_s25  ;;  %v4937_v52 = vrot.slane %v4923_v20, %v6218_v17  ;;  %v4245_v55 = vcombine.high %v8775_v5, %v8754_v44 }
 0x658   : > { %v8778_v61 = vpop.permute.xlu1 %5050  ;;  %v8780_v25 = vpop.permute.xlu0 %5052  ;;  %v5954_v20 = vpack.i.bf16 %v8746_v2, %v8770_v63  ;;  %v8802_v60 = vrot.slane %v4422_v11, %v6225_v36  ;;  %v4457_v11 = vrot.slane %v4443_v29, %v6218_v17  ;;  %v8837_v47 = vrot.slane %v4724_v59, %v6225_v36 }
 0x659   : > { %v5974_v58 = vpack.i.bf16 %v8643_v1, %v8764_v43  ;;  %v4954_v37 = vcombine.low %v4921_v41, %v4937_v52  ;;  %v8826_v26 = vrot.slane %v4245_v55, %v6225_v36  ;;  %v4870_v39 = vcombine.low %v8726_v32, %v8704_v40 }
 0x65a   : > { %9575 = vst [vmem:[#allocation6_spill] sm:$0xff] %v8802_v60  ;;  %v5979_v33 = vpack.i.bf16 %v8784_v6, %v8802_v60  ;;  %v4491_v34 = vcombine.high %v4457_v11, %v4473_v31  ;;  %v4490_v49 = vcombine.low %v4457_v11, %v4473_v31  ;;  %v5069_v31 = vcombine.high %v8687_v23, %v8780_v25 }
 0x65b   : > { %5975 = vrot.lane.b32.xlu1 %v5974_v58, %s6148_s28  ;;  %5955 = vrot.lane.b32.xlu0 %v5954_v20, %s6148_s28  ;;  %v4955_v58 = vcombine.high %v4921_v41, %v4937_v52  ;;  %v5959_v20 = vpack.i.bf16 %v8791_v10, %v8808_v51  ;;  %v4159_v52 = vrot.slane %v4145_v30, %v6218_v17 }
 0x65c   : > { %v8813_v15 = vpop.permute.xlu1 %5054  ;;  %v8815_v4 = vpop.permute.xlu0 %5056  ;;  %v8844_v41 = vrot.slane %v4709_v57, %v6225_v36  ;;  %v5984_v59 = vpack.i.bf16 %v8837_v47, %v8821_v27  ;;  %v8856_v30 = vrot.slane %v4954_v37, %v6225_v36  ;;  %v8872_v37 = vrot.slane %v4490_v49, %v6225_v36 }
 0x65d   : > { %v5085_v29 = vcombine.high %v8733_v35, %v8815_v4  ;;  %v5137_v55 = vcombine.high %v8731_v3, %v8813_v15  ;;  %v8847_v53 = vrot.slane %v4955_v58, %v6225_v36  ;;  %v4192_v11 = vcombine.low %v4159_v52, %v8829_v28 }
 0x65e   : > { %v5964_v58 = vpack.i.bf16 %v8844_v41, %v8826_v26  ;;  %v8889_v49 = vrot.slane %v5069_v31, %v6218_v17  ;;  %v9577_v31 = vld [vmem:[#allocation2_spill] sm:$0xff] }
 0x65f   : > { %5980 = vrot.lane.b32.xlu1 %v5979_v33, %s6146_s26  ;;  %5960 = vrot.lane.b32.xlu0 %v5959_v20, %s6148_s28  ;;  %v4261_v33 = vcombine.high %v8761_v12, %v8741_v62  ;;  %v8863_v20 = vrot.slane %v4491_v34, %v6225_v36  ;;  %v8866_v62 = vrot.slane %v5085_v29, %v6218_v17 }
 0x660   : > { %v5059_v50 = vpop.permute.xlu1 %5058  ;;  %v4725_v12 = vcombine.high %v8584_v13, %v8592_v48  ;;  %v8877_v60 = vrot.slane %v5137_v55, %v6218_v17  ;;  %v4887_v29 = vcombine.high %v8709_v0, %v8692_v38  ;;  %v8894_v48 = vrot.slane %v4192_v11, %v6225_v36 }
 0x661   : > { %v5153_v57 = vcombine.high %v8778_v61, %v5059_v50  ;;  %v5989_v13 = vpack.i.bf16 %v8847_v53, %v8863_v20  ;;  %v5152_v40 = vcombine.low %v8778_v61, %v5059_v50  ;;  %v5969_v38 = vpack.i.bf16 %v8856_v30, %v8872_v37 }
 0x662   : > { %v4406_v0 = vcombine.low %v8749_v42, %v8723_v24  ;;  %v5116_v55 = vcombine.low %v8889_v49, %v8866_v62  ;;  %v8913_v61 = vrot.slane %v4725_v12, %v6225_v36  ;;  %v4423_v50 = vcombine.high %v8736_v22, %v8701_v14 }
 0x663   : > { %5985 = vrot.lane.b32.xlu1 %v5984_v59, %s6146_s26  ;;  %v8880_v34 = vrot.slane %v5153_v57, %v6218_v17  ;;  %5965 = vrot.lane.b32.xlu0 %v5964_v58, %s6148_s28  ;;  %v8886_v59 = vrot.slane %v4261_v33, %v6225_v36  ;;  %v9576_v33 = vld [vmem:[#allocation4_spill] sm:$0xff]  ;;  %v8918_v58 = vrot.slane %v4870_v39, %v6225_v36 }
 0x664   : > { %v9578_v11 = vcombine.low %v9576_v33, %v9577_v31  ;;  %v5136_v24 = vcombine.low %v8731_v3, %v8813_v15  ;;  %v5084_v42 = vcombine.low %v8733_v35, %v8815_v4  ;;  %v4244_v12 = vcombine.low %v8775_v5, %v8754_v44 }
 0x665   : > { %v5184_v32 = vcombine.low %v8877_v60, %v8880_v34  ;;  %v6004_v39 = vpack.i.bf16 %v8913_v61, %v8886_v59  ;;  %v4193_v14 = vcombine.high %v4159_v52, %v8829_v28  ;;  %v5068_v3 = vcombine.low %v8687_v23, %v8780_v25 }
 0x666   : > { %v8910_v57 = vrot.slane %v9578_v11, %v6225_v36  ;;  %v8939_v35 = vrot.slane %v5152_v40, %v6218_v17  ;;  %v4708_v44 = vcombine.low %v8581_v54, %v8589_v8  ;;  %v8946_v5 = vrot.slane %v4406_v0, %v6225_v36 }
 0x667   : > { %5990 = vrot.lane.b32.xlu1 %v5989_v13, %s6147_s27  ;;  %5970 = vrot.lane.b32.xlu0 %v5969_v38, %s6146_s26  ;;  %v8926_v13 = vrot.slane %v4887_v29, %v6225_v36  ;;  %v8931_v11 = vrot.slane %v5184_v32, %v6225_v36  ;;  %v8949_v15 = vrot.slane %v5116_v55, %v6225_v36 }
 0x668   : > { %v5994_v22 = vpack.i.bf16 %v8910_v57, %v8894_v48  ;;  %v8953_v4 = vrot.slane %v4423_v50, %v6225_v36  ;;  %v8956_v23 = vrot.slane %v5136_v24, %v6218_v17  ;;  %v8959_v25 = vrot.slane %v5084_v42, %v6218_v17 }
 0x669   : > { %v4938_v54 = vcombine.low %v8663_v7, %v8646_v45  ;;  %v8965_v8 = vrot.slane %v4244_v12, %v6225_v36  ;;  %v6019_v28 = vpack.i.bf16 %v8931_v11, %v8949_v15  ;;  %v4902_v52 = vcombine.high %v8918_v58, %v9515_v18 }
 0x66a   : > { %v8972_v29 = vrot.slane %v4193_v14, %v6225_v36  ;;  %v8975_v40 = vrot.slane %v5068_v3, %v6218_v17  ;;  %v5169_v32 = vcombine.high %v8956_v23, %v8939_v35  ;;  %v5999_v45 = vpack.i.bf16 %v8926_v13, %v8953_v4 }
 0x66b   : > { %6005 = vrot.lane.b32.xlu1 %v6004_v39, %s6147_s27  ;;  %5995 = vrot.lane.b32.xlu0 %v5994_v22, %s6146_s26  ;;  %v4438_v7 = vcombine.high %v8946_v5, %v9515_v18  ;;  %v8985_v38 = vrot.slane %v4708_v44, %v6225_v36  ;;  %v4474_v0 = vcombine.low %v8656_v16, %v8632_v46 }
 0x66c   : > { %v5101_v17 = vcombine.high %v8975_v40, %v8959_v25  ;;  %v9579_v55 = vcombine.high %v9576_v33, %v9577_v31  ;;  %v4176_v24 = vcombine.low %v8714_v21, %v8717_v19  ;;  %v4276_v12 = vcombine.high %v8965_v8, %v9515_v18 }
 0x66d   : > { %v6029_v42 = vpack.i.bf16 %v4902_v52, %v4438_v7  ;;  %v9003_v46 = vrot.slane %v4938_v54, %v6225_v36  ;;  %v9006_v16 = vrot.slane %v5169_v32, %v6225_v36  ;;  %v4740_v33 = vcombine.high %v8985_v38, %v9515_v18 }
 0x66e   : > { %v8996_v50 = vrot.slane %v9579_v55, %v6225_v36  ;;  %v9014_v21 = vrot.slane %v4474_v0, %v6225_v36  ;;  %v9017_v19 = vrot.slane %v5101_v17, %v6225_v36  ;;  %v9021_v31 = vrot.slane %v4176_v24, %v6225_v36 }
 0x66f   : > { %6020 = vrot.lane.b32.xlu1 %v6019_v28, %s6146_s26  ;;  %6000 = vrot.lane.b32.xlu0 %v5999_v45, %s6147_s27  ;;  %v6034_v14 = vpack.i.bf16 %v4740_v33, %v4276_v12  ;;  %v4971_v3 = vcombine.high %v8746_v2, %v9515_v18  ;;  %v4970_v44 = vcombine.high %v9003_v46, %v9515_v18 }
 0x670   : > { %v6009_v39 = vpack.i.bf16 %v8996_v50, %v8972_v29  ;;  %v6014_v22 = vpack.i.bf16 %v9006_v16, %v9017_v19  ;;  %v4507_v54 = vcombine.high %v8770_v63, %v9515_v18  ;;  %v9580_v28 = vcombine.low %v9572_v9, %v9573_v56 }
 0x671   : > { %v4506_v2 = vcombine.high %v9014_v21, %v9515_v18  ;;  %v4208_v45 = vcombine.high %v9021_v31, %v9515_v18  ;;  %v4277_v0 = vcombine.high %v8826_v26, %v9515_v18  ;;  %v4741_v56 = vcombine.high %v8844_v41, %v9515_v18 }
 0x672   : > { %v9036_v52 = vrot.slane %v9580_v28, %v6225_v36  ;;  %v6039_v32 = vpack.i.bf16 %v4971_v3, %v4507_v54  ;;  %v4903_v17 = vcombine.high %v8791_v10, %v9515_v18  ;;  %v4972_v24 = vcombine.high %v8856_v30, %v9515_v18 }
 0x673   : > { %6030 = vrot.lane.b32.xlu1 %v6029_v42, %s6150_s30  ;;  %6010 = vrot.lane.b32.xlu0 %v6009_v39, %s6147_s27  ;;  %v6024_v7 = vpack.i.bf16 %v4970_v44, %v4506_v2  ;;  %v6054_v55 = vpack.i.bf16 %v4741_v56, %v4277_v0  ;;  %v4439_v26 = vcombine.high %v8808_v51, %v9515_v18 }
 0x674   : > { %v4672_v9 = vcombine.high %v9036_v52, %v9515_v18  ;;  %v4508_v42 = vcombine.high %v8872_v37, %v9515_v18  ;;  %v5168_v41 = vcombine.low %v8956_v23, %v8939_v35  ;;  %v4278_v10 = vcombine.high %v8821_v27, %v9515_v18 }
 0x675   : > { %v6049_v12 = vpack.i.bf16 %v4903_v17, %v4439_v26  ;;  %v4209_v30 = vcombine.high %v8764_v43, %v9515_v18  ;;  %v5100_v33 = vcombine.low %v8975_v40, %v8959_v25  ;;  %v4742_v51 = vcombine.high %v8837_v47, %v9515_v18 }
 0x676   : > { %v6044_v63 = vpack.i.bf16 %v4672_v9, %v4208_v45  ;;  %v6059_v39 = vpack.i.bf16 %v4972_v24, %v4508_v42  ;;  %v4673_v37 = vcombine.high %v8643_v1, %v9515_v18  ;;  %v9076_v35 = vrot.slane %v5168_v41, %v6225_v36  ;;  %v9581_v1 = vld [vmem:[#allocation6_spill] sm:$0xff] }
 0x677   : > { %6035 = vrot.lane.b32.xlu1 %v6034_v14, %s6150_s30  ;;  %6015 = vrot.lane.b32.xlu0 %v6014_v22, %s6148_s28  ;;  %v6074_v27 = vpack.i.bf16 %v4742_v51, %v4278_v10  ;;  %v4973_v43 = vcombine.high %v8847_v53, %v9515_v18  ;;  %v4904_v25 = vcombine.high %v8784_v6, %v9515_v18 }
 0x678   : > { %v6064_v23 = vpack.i.bf16 %v4673_v37, %v4209_v30  ;;  %v9083_v40 = vrot.slane %v5100_v33, %v6225_v36  ;;  %v4509_v47 = vcombine.high %v8863_v20, %v9515_v18  ;;  %v4440_v14 = vcombine.high %v9581_v1, %v9515_v18 }
 0x679   : > { %v5200_v53 = vcombine.high %v9076_v35, %v9515_v18  ;;  %v4210_v6 = vcombine.high %v8894_v48, %v9515_v18  ;;  %v4674_v20 = vcombine.high %v8910_v57, %v9515_v18  ;;  %v4279_v28 = vcombine.high %v8886_v59, %v9515_v18 }
 0x67a   : > { %v6079_v3 = vpack.i.bf16 %v4973_v43, %v4509_v47  ;;  %v6069_v22 = vpack.i.bf16 %v4904_v25, %v4440_v14  ;;  %v5132_v44 = vcombine.high %v9083_v40, %v9515_v18  ;;  %v4743_v48 = vcombine.high %v8913_v61, %v9515_v18 }
 0x67b   : > { %6040 = vrot.lane.b32.xlu1 %v6039_v32, %s6149_s29  ;;  %6025 = vrot.lane.b32.xlu0 %v6024_v7, %s6150_s30  ;;  %v6084_v2 = vpack.i.bf16 %v4674_v20, %v4210_v6  ;;  %v4905_v32 = vcombine.high %v8926_v13, %v9515_v18  ;;  %v4441_v45 = vcombine.high %v8953_v4, %v9515_v18 }
 0x67c   : > { %v6094_v54 = vpack.i.bf16 %v5200_v53, %v5132_v44  ;;  %v5185_v57 = vcombine.high %v8877_v60, %v8880_v34  ;;  %v6099_v7 = vpack.i.bf16 %v4743_v48, %v4279_v28  ;;  %v4211_v59 = vcombine.high %v8972_v29, %v9515_v18 }
 0x67d   : > { %v6089_v0 = vpack.i.bf16 %v4905_v32, %v4441_v45  ;;  %v5201_v13 = vcombine.high %v9006_v16, %v9515_v18  ;;  %v5117_v9 = vcombine.high %v8889_v49, %v8866_v62  ;;  %v4675_v61 = vcombine.high %v8996_v50, %v9515_v18 }
 0x67e   : > { %v5133_v60 = vcombine.high %v9017_v19, %v9515_v18  ;;  %v5199_v34 = vrot.slane %v5185_v57, %v6225_v36  ;;  %v9126_v4 = vpop.permute.xlu0 %5815  ;;  %v5202_v62 = vcombine.high %v8931_v11, %v9515_v18  ;;  %v5134_v50 = vcombine.high %v8949_v15, %v9515_v18  ;;  %v2835_v11 = vld [vmem:[%s9478_s4] sm:$0xf] }
 0x67f   : > { %6045 = vrot.lane.b32.xlu1 %v6044_v63, %s6150_s30  ;;  %6055 = vrot.lane.b32.xlu0 %v6054_v55, %s6149_s29  ;;  %v6104_v16 = vpack.i.bf16 %v4675_v61, %v4211_v59  ;;  %v5131_v49 = vrot.slane %v5117_v9, %v6225_v36  ;;  %v5818_v37 = vunpack.i.h.bf16 %v9126_v4 }
 0x680   : > { %v6114_v56 = vpack.i.bf16 %v5201_v13, %v5133_v60  ;;  %v6119_v55 = vpack.i.bf16 %v5202_v62, %v5134_v50  ;;  %v5203_v24 = vcombine.high %v5199_v34, %v9515_v18 }
 0x681   : > { %v6109_v17 = vpack.i.bf16 %v5199_v34, %v5131_v49  ;;  %v5135_v36 = vcombine.high %v5131_v49, %v9515_v18  ;;  %v9582_v49 = vld [vmem:[#allocation12_spill] sm:$0xff] }
 0x683   : > { %6050 = vrot.lane.b32.xlu1 %v6049_v12, %s6149_s29  ;;  %6060 = vrot.lane.b32.xlu0 %v6059_v39, %s6144_s24  ;;  %v6124_v42 = vpack.i.bf16 %v5203_v24, %v5135_v36  ;;  %v9584_v36 = vld [vmem:[#allocation11_spill] sm:$0xff] }
 0x687   : > { %6075 = vrot.lane.b32.xlu1 %v6074_v27, %s6144_s24  ;;  %6065 = vrot.lane.b32.xlu0 %v6064_v23, %s6149_s29  ;;  %v5817_v27 = vunpack.i.l.bf16 %v9126_v4 }
 0x68b   : > { %6080 = vrot.lane.b32.xlu1 %v6079_v3, %s6145_s25  ;;  %6070 = vrot.lane.b32.xlu0 %v6069_v22, %s6144_s24 }
 0x68d   : > { %v9137_v19 = vpop.permute.xlu0 %5820 }
 0x68e   : > { %v5823_v43 = vunpack.i.h.bf16 %v9137_v19  ;;  %v5822_v23 = vunpack.i.l.bf16 %v9137_v19  ;;  %v9583_v19 = vld [vmem:[#allocation9_spill] sm:$0xff] }
 0x68f   : > { %6095 = vrot.lane.b32.xlu1 %v6094_v54, %s6150_s30  ;;  %6085 = vrot.lane.b32.xlu0 %v6084_v2, %s6144_s24 }
 0x693   : > { %6100 = vrot.lane.b32.xlu1 %v6099_v7, %s6145_s25  ;;  %6090 = vrot.lane.b32.xlu0 %v6089_v0, %s6145_s25 }
 0x695   : > { %v9128_v29 = vpop.permute.xlu1 %5825 }
 0x696   : > { %v5828_v25 = vunpack.i.h.bf16 %v9128_v29  ;;  %v5827_v47 = vunpack.i.l.bf16 %v9128_v29 }
 0x697   : > { %6105 = vrot.lane.b32.xlu1 %v6104_v16, %s6145_s25  ;;  %6115 = vrot.lane.b32.xlu0 %v6114_v56, %s6149_s29 }
 0x699   : > { %v9139_v63 = vpop.permute.xlu1 %5830 }
 0x69a   : > { %v5833_v14 = vunpack.i.h.bf16 %v9139_v63  ;;  %v5832_v3 = vunpack.i.l.bf16 %v9139_v63 }
 0x69b   : > { %6110 = vrot.lane.b32.xlu1 %v6109_v17, %s6147_s27  ;;  %6120 = vrot.lane.b32.xlu0 %v6119_v55, %s6144_s24  ;;  %s224_s24 = scalar_lea.vmem %s9479_s5, %s5473_s20 }
 0x69d   : > { %v9148_v26 = vpop.permute.xlu1 %5855  ;;  %v9150_v15 = vpop.permute.xlu0 %5835 }
 0x69e   : > { %v5858_v53 = vunpack.i.h.bf16 %v9148_v26  ;;  %v5857_v22 = vunpack.i.l.bf16 %v9148_v26  ;;  %v5838_v44 = vunpack.i.h.bf16 %v9150_v15  ;;  %v5837_v20 = vunpack.i.l.bf16 %v9150_v15 }
 0x69f   : > { %5314 = vperm.xlu1 %6129, %v2835_v11   ;;  %6125 = vrot.lane.b32.xlu0 %v6124_v42, %s6145_s25  ;;  %v9585_v42 = vld [vmem:[#allocation8_spill] sm:$0xff] }
 0x6a1   : > { %v9153_v41 = vpop.permute.xlu1 %5860  ;;  %v9155_v12 = vpop.permute.xlu0 %5840 }
 0x6a2   : > { %v5862_v28 = vunpack.i.l.bf16 %v9153_v41  ;;  %v5843_v2 = vunpack.i.h.bf16 %v9155_v12  ;;  %v5842_v32 = vunpack.i.l.bf16 %v9155_v12 }
 0x6a5   : > { %v9157_v10 = vpop.permute.xlu1 %5865  ;;  %v9159_v39 = vpop.permute.xlu0 %5845 }
 0x6a6   : > { %v5868_v9 = vunpack.i.h.bf16 %v9157_v10  ;;  %v5867_v61 = vunpack.i.l.bf16 %v9157_v10  ;;  %v5848_v60 = vunpack.i.h.bf16 %v9159_v39  ;;  %v5847_v34 = vunpack.i.l.bf16 %v9159_v39 }
 0x6a9   : > { %v9161_v18 = vpop.permute.xlu1 %5870  ;;  %v9163_v30 = vpop.permute.xlu0 %5850 }
 0x6aa   : > { %v5853_v56 = vunpack.i.h.bf16 %v9163_v30  ;;  %v5852_v62 = vunpack.i.l.bf16 %v9163_v30  ;;  %v9591_v10 = vunpack.i.l.bf16 %v9161_v18 }
 0x6ad   : > { %v5881_v33 = vpop.permute.xlu1 %5880  ;;  %v5876_v51 = vpop.permute.xlu0 %5875 }
 0x6ae   : > { %v5878_v48 = vunpack.i.h.bf16 %v5876_v51  ;;  %v5877_v45 = vunpack.i.l.bf16 %v5876_v51  ;;  %v5883_v57 = vunpack.i.h.bf16 %v5881_v33  ;;  %v5882_v7 = vunpack.i.l.bf16 %v5881_v33  ;;  %v9586_v33 = vld [vmem:[#allocation13_spill] sm:$0xff] }
 0x6b0   : > { %v4113_v50 = vsel %vm830_vm5, %v9582_v49, %v5878_v48  ;;  %v3645_v17 = vsel %vm830_vm5, %v9583_v19, %v5877_v45  ;;  %v4106_v11 = vsel %vm830_vm5, %v9584_v36, %v5883_v57  ;;  %v3638_v39 = vsel %vm830_vm5, %v9585_v42, %v5882_v7 }
 0x6b1   : > { %v5886_v1 = vpop.permute.xlu1 %5885  ;;  %v5896_v6 = vpop.permute.xlu0 %5895  ;;  %v4114_v19 = vsel %vm832_vm6, %v4113_v50, %v5818_v37  ;;  %v9588_v37 = vld [vmem:[#allocation14_spill] sm:$0xff]  ;;  %v9589_v50 = vld [vmem:[#allocation16_spill] sm:$0xff] }
 0x6b2   : > { %v5888_v59 = vunpack.i.h.bf16 %v5886_v1  ;;  %v5887_v0 = vunpack.i.l.bf16 %v5886_v1  ;;  %v9587_v1 = vld [vmem:[#allocation15_spill] sm:$0xff]  ;;  %v5898_v16 = vunpack.i.h.bf16 %v5896_v6  ;;  %v5897_v48 = vunpack.i.l.bf16 %v5896_v6 }
 0x6b3   : > { %v4107_v6 = vsel %vm832_vm6, %v4106_v11, %v5823_v43 }
 0x6b4   : > { %v3875_v51 = vsel %vm830_vm5, %v9586_v33, %v5888_v59  ;;  %v3407_v30 = vsel %vm830_vm5, %v9587_v1, %v5887_v0  ;;  %v3639_v33 = vsel %vm832_vm6, %v3638_v39, %v5822_v23 }
 0x6b5   : > { %v5891_v13 = vpop.permute.xlu1 %5890  ;;  %v5901_v4 = vpop.permute.xlu0 %5900  ;;  %v3408_v59 = vsel %vm832_vm6, %v3407_v30, %v5827_v47  ;;  %v3876_v0 = vsel %vm832_vm6, %v3875_v51, %v5828_v25 }
 0x6b6   : > { %v5893_v55 = vunpack.i.h.bf16 %v5891_v13  ;;  %v5892_v24 = vunpack.i.l.bf16 %v5891_v13  ;;  %v3646_v13 = vsel %vm832_vm6, %v3645_v17, %v5817_v27  ;;  %v5903_v57 = vunpack.i.h.bf16 %v5901_v4 }
 0x6b7   : > { %v5902_v36 = vunpack.i.l.bf16 %v5901_v4  ;;  %v3868_v4 = vsel %vm830_vm5, %v9588_v37, %v5898_v16 }
 0x6b8   : > { %v3647_v7 = vsel %vm834_vm7, %v3646_v13, %v5892_v24  ;;  %v4115_v42 = vsel %vm834_vm7, %v4114_v19, %v5893_v55  ;;  %v3400_v24 = vsel %vm830_vm5, %v9589_v50, %v5897_v48  ;;  %v4108_v23 = vsel %vm834_vm7, %v4107_v6, %v5903_v57 }
 0x6b9   : > { %v5906_v29 = vpop.permute.xlu1 %5905  ;;  %v5926_v45 = vpop.permute.xlu0 %5925  ;;  %v3640_v25 = vsel %vm834_vm7, %v3639_v33, %v5902_v36  ;;  %v3648_v43 = vsel %vm836_vm8, %v3647_v7, %v5832_v3  ;;  %v3401_v13 = vsel %vm832_vm6, %v3400_v24, %v5837_v20  ;;  %v3869_v63 = vsel %vm832_vm6, %v3868_v4, %v5838_v44 }
 0x6ba   : > { %v5908_v49 = vunpack.i.h.bf16 %v5906_v29  ;;  %v5907_v54 = vunpack.i.l.bf16 %v5906_v29  ;;  %v5928_v30 = vunpack.i.h.bf16 %v5926_v45  ;;  %v5927_v48 = vunpack.i.l.bf16 %v5926_v45 }
 0x6bb   : > { %v4109_v45 = vsel %vm836_vm8, %v4108_v23, %v5843_v2 }
 0x6bc   : > { %v3409_v29 = vsel %vm834_vm7, %v3408_v59, %v5907_v54  ;;  %v3877_v27 = vsel %vm834_vm7, %v3876_v0, %v5908_v49  ;;  %v4116_v54 = vsel %vm836_vm8, %v4115_v42, %v5833_v14 }
 0x6bd   : > { %v5911_v17 = vpop.permute.xlu1 %5910  ;;  %v5931_v47 = vpop.permute.xlu0 %5930  ;;  %v3410_v11 = vsel %vm836_vm8, %v3409_v29, %v5847_v34  ;;  %v3878_v16 = vsel %vm836_vm8, %v3877_v27, %v5848_v60  ;;  %v3641_v60 = vsel %vm836_vm8, %v3640_v25, %v5842_v32 }
 0x6be   : > { %v5913_v55 = vunpack.i.h.bf16 %v5911_v17  ;;  %v5912_v1 = vunpack.i.l.bf16 %v5911_v17  ;;  %v3411_v19 = vsel %vm838_vm9, %v3410_v11, %v5927_v48  ;;  %v3879_v57 = vsel %vm838_vm9, %v3878_v16, %v5928_v30 }
 0x6bf   : > { %v5933_v59 = vunpack.i.h.bf16 %v5931_v47  ;;  %v5932_v32 = vunpack.i.l.bf16 %v5931_v47  ;;  %v3412_v27 = vsel %vm840_vm10, %v3411_v19, %v5867_v61  ;;  %v3880_v26 = vsel %vm840_vm10, %v3879_v57, %v5868_v9 }
 0x6c0   : > { %v3649_v39 = vsel %vm838_vm9, %v3648_v43, %v5912_v1  ;;  %v4117_v51 = vsel %vm838_vm9, %v4116_v54, %v5913_v55  ;;  %v9590_v61 = vunpack.i.h.bf16 %v9153_v41  ;;  %v9592_v47 = vunpack.i.h.bf16 %v9161_v18 }
 0x6c1   : > { %v5916_v49 = vpop.permute.xlu1 %5915  ;;  %v5936_v34 = vpop.permute.xlu0 %5935  ;;  %v3650_v20 = vsel %vm840_vm10, %v3649_v39, %v5852_v62  ;;  %v4118_v15 = vsel %vm840_vm10, %v4117_v51, %v5853_v56 }
 0x6c2   : > { %v5918_v14 = vunpack.i.h.bf16 %v5916_v49  ;;  %v5917_v3 = vunpack.i.l.bf16 %v5916_v49  ;;  %v5938_v7 = vunpack.i.h.bf16 %v5936_v34  ;;  %v5937_v42 = vunpack.i.l.bf16 %v5936_v34 }
 0x6c3   : > { %v3651_v17 = vsel %vm842_vm11, %v3650_v20, %v5932_v32 }
 0x6c4   : > { %v3402_v44 = vsel %vm834_vm7, %v3401_v13, %v5917_v3  ;;  %v3870_v36 = vsel %vm834_vm7, %v3869_v63, %v5918_v14  ;;  %v5277_v30 = vrot.slane %v3651_v17, 4 }
 0x6c5   : > { %v3403_v12 = vsel %vm836_vm8, %v3402_v44, %v5857_v22  ;;  %v3871_v2 = vsel %vm836_vm8, %v3870_v36, %v5858_v53  ;;  %v5921_v0 = vpop.permute.xlu1 %5920  ;;  %v5941_v29 = vpop.permute.xlu0 %5940  ;;  %v4119_v53 = vsel %vm842_vm11, %v4118_v15, %v5933_v59 }
 0x6c6   : > { %v3404_v62 = vsel %vm838_vm9, %v3403_v12, %v5937_v42  ;;  %v3872_v56 = vsel %vm838_vm9, %v3871_v2, %v5938_v7  ;;  %v5923_v33 = vunpack.i.h.bf16 %v5921_v0  ;;  %v5922_v6 = vunpack.i.l.bf16 %v5921_v0 }
 0x6c7   : > { %v5943_v4 = vunpack.i.h.bf16 %v5941_v29  ;;  %v5942_v50 = vunpack.i.l.bf16 %v5941_v29  ;;  %v3405_v9 = vsel %vm840_vm10, %v3404_v62, %v9591_v10  ;;  %v3873_v25 = vsel %vm840_vm10, %v3872_v56, %v9592_v47 }
 0x6c8   : > { %v3642_v22 = vsel %vm838_vm9, %v3641_v60, %v5922_v6  ;;  %v4110_v37 = vsel %vm838_vm9, %v4109_v45, %v5923_v33  ;;  %v5283_v48 = vrot.slane %v4119_v53, 4 }
 0x6c9   : > { %v3643_v24 = vsel %vm840_vm10, %v3642_v22, %v5862_v28  ;;  %v4111_v55 = vsel %vm840_vm10, %v4110_v37, %v9590_v61  ;;  %v5951_v1 = vpop.permute.xlu1 %5950  ;;  %v5946_v28 = vpop.permute.xlu0 %5945 }
 0x6ca   : > { %v3644_v23 = vsel %vm842_vm11, %v3643_v24, %v5942_v50  ;;  %v4112_v43 = vsel %vm842_vm11, %v4111_v55, %v5943_v4  ;;  %v5953_v54 = vunpack.i.h.bf16 %v5951_v1  ;;  %v5952_v11 = vunpack.i.l.bf16 %v5951_v1 }
 0x6cb   : > { %v5276_v16 = vrot.slane %v3644_v23, 4  ;;  %v5282_v41 = vrot.slane %v4112_v43, 4  ;;  %v5948_v39 = vunpack.i.h.bf16 %v5946_v28  ;;  %v5947_v51 = vunpack.i.l.bf16 %v5946_v28 }
 0x6cc   : > { %v3406_v49 = vsel %vm842_vm11, %v3405_v9, %v5952_v11  ;;  %v3874_v13 = vsel %vm842_vm11, %v3873_v25, %v5953_v54 }
 0x6cd   : > { %v9277_v18 = vpop.permute.xlu1 %5975  ;;  %v3413_v63 = vsel %vm842_vm11, %v3412_v27, %v5947_v51  ;;  %v3881_v14 = vsel %vm842_vm11, %v3880_v26, %v5948_v39  ;;  %v5298_v3 = vsel %vm2737_vm12, %v3406_v49, %v5276_v16  ;;  %v5300_v34 = vsel %vm2737_vm12, %v3874_v13, %v5282_v41  ;;  %v5956_v60 = vpop.permute.xlu0 %5955 }
 0x6ce   : > { %v5299_v45 = vsel %vm2737_vm12, %v3413_v63, %v5277_v30  ;;  %v5301_v19 = vsel %vm2737_vm12, %v3881_v14, %v5283_v48  ;;  %v5306_v20 = vpack.c.bf16 %v5300_v34, %v5298_v3  ;;  %v5978_v29 = vunpack.i.h.bf16 %v9277_v18 }
 0x6cf   : > { %v5307_v57 = vpack.c.bf16 %v5301_v19, %v5299_v45  ;;  %v5977_v27 = vunpack.i.l.bf16 %v9277_v18  ;;  %v5958_v17 = vunpack.i.h.bf16 %v5956_v60  ;;  %v5957_v26 = vunpack.i.l.bf16 %v5956_v60 }
 0x6d1   : > { %5326 = vmatprep.subr.bf16.mxu1 %v5307_v57  ;;  %v9285_v15 = vpop.permute.xlu1 %5980  ;;  %v9287_v44 = vpop.permute.xlu0 %5960 }
 0x6d2   : > { %5327 = vmatpush1.bf16.msra.mxu1 %v5306_v20  ;;  %v5983_v53 = vunpack.i.h.bf16 %v9285_v15  ;;  %v5982_v37 = vunpack.i.l.bf16 %v9285_v15  ;;  %v5963_v4 = vunpack.i.h.bf16 %v9287_v44  ;;  %v5962_v50 = vunpack.i.l.bf16 %v9287_v44 }
 0x6d5   : > { %v9289_v36 = vpop.permute.xlu1 %5985  ;;  %v9291_v7 = vpop.permute.xlu0 %5965 }
 0x6d6   : > { %v5988_v24 = vunpack.i.h.bf16 %v9289_v36  ;;  %v5987_v55 = vunpack.i.l.bf16 %v9289_v36  ;;  %v5968_v47 = vunpack.i.h.bf16 %v9291_v7  ;;  %v5967_v25 = vunpack.i.l.bf16 %v9291_v7 }
 0x6d9   : > { %v9293_v42 = vpop.permute.xlu1 %5990  ;;  %v9295_v59 = vpop.permute.xlu0 %5970 }
 0x6da   : > { %v5993_v23 = vunpack.i.h.bf16 %v9293_v42  ;;  %v5992_v43 = vunpack.i.l.bf16 %v9293_v42  ;;  %v5973_v54 = vunpack.i.h.bf16 %v9295_v59  ;;  %v5972_v11 = vunpack.i.l.bf16 %v9295_v59 }
 0x6dd   : > { %v9297_v32 = vpop.permute.xlu1 %6005  ;;  %v9299_v12 = vpop.permute.xlu0 %5995 }
 0x6de   : > { %v6008_v28 = vunpack.i.h.bf16 %v9297_v32  ;;  %v6007_v39 = vunpack.i.l.bf16 %v9297_v32  ;;  %v5998_v13 = vunpack.i.h.bf16 %v9299_v12  ;;  %v5997_v63 = vunpack.i.l.bf16 %v9299_v12 }
 0x6e1   : > { %v9301_v2 = vpop.permute.xlu1 %6020  ;;  %v9303_v0 = vpop.permute.xlu0 %6000 }
 0x6e2   : > { %v6003_v34 = vunpack.i.h.bf16 %v9303_v0  ;;  %v6002_v60 = vunpack.i.l.bf16 %v9303_v0 }
 0x6e5   : > { %v6031_v62 = vpop.permute.xlu1 %6030  ;;  %v9305_v56 = vpop.permute.xlu0 %6010 }
 0x6e6   : > { %v6032_v1 = vunpack.i.l.bf16 %v6031_v62  ;;  %v6033_v16 = vunpack.i.h.bf16 %v6031_v62  ;;  %v6013_v45 = vunpack.i.h.bf16 %v9305_v56 }
 0x6e8   : > { %v4566_v14 = vsel %vm830_vm5, %v8946_v5, %v6032_v1 }
 0x6e9   : > { %v6036_v33 = vpop.permute.xlu1 %6035  ;;  %v9307_v6 = vpop.permute.xlu0 %6015  ;;  %v4567_v62 = vsel %vm832_vm6, %v4566_v14, %v5962_v50 }
 0x6ea   : > { %v6038_v51 = vunpack.i.h.bf16 %v6036_v33  ;;  %v6037_v3 = vunpack.i.l.bf16 %v6036_v33 }
 0x6ec   : > { %v4807_v5 = vsel %vm830_vm5, %v8985_v38, %v6038_v51 }
 0x6ed   : > { %v6041_v22 = vpop.permute.xlu1 %6040  ;;  %v6026_v61 = vpop.permute.xlu0 %6025 }
 0x6ee   : > { %v6028_v10 = vunpack.i.h.bf16 %v6026_v61  ;;  %v6027_v9 = vunpack.i.l.bf16 %v6026_v61  ;;  %v6043_v7 = vunpack.i.h.bf16 %v6041_v22  ;;  %v6042_v59 = vunpack.i.l.bf16 %v6041_v22 }
 0x6ef   : > { %v4343_v61 = vsel %vm830_vm5, %v8965_v8, %v6037_v3  ;;  %v6017_v8 = vunpack.i.l.bf16 %v9307_v6 }
 0x6f0   : > { %v5037_v30 = vsel %vm830_vm5, %v9003_v46, %v6028_v10  ;;  %v4573_v48 = vsel %vm830_vm5, %v9014_v21, %v6027_v9  ;;  %v6012_v46 = vunpack.i.l.bf16 %v9305_v56  ;;  %v5030_v21 = vsel %vm830_vm5, %v8918_v58, %v6033_v16 }
 0x6f1   : > { %v6046_v41 = vpop.permute.xlu1 %6045  ;;  %v6056_v49 = vpop.permute.xlu0 %6055  ;;  %v4574_v19 = vsel %vm832_vm6, %v4573_v48, %v5957_v26  ;;  %v5038_v57 = vsel %vm832_vm6, %v5037_v30, %v5958_v17  ;;  %v6018_v30 = vunpack.i.h.bf16 %v9307_v6  ;;  %v5031_v22 = vsel %vm832_vm6, %v5030_v21, %v5963_v4 }
 0x6f2   : > { %v6047_v20 = vunpack.i.l.bf16 %v6046_v41  ;;  %v6048_v1 = vunpack.i.h.bf16 %v6046_v41  ;;  %v6058_v10 = vunpack.i.h.bf16 %v6056_v49  ;;  %v6057_v58 = vunpack.i.l.bf16 %v6056_v49 }
 0x6f3   : > { %v4575_v17 = vsel %vm834_vm7, %v4574_v19, %v6042_v59  ;;  %v5039_v16 = vsel %vm834_vm7, %v5038_v57, %v6043_v7  ;;  %v4344_v41 = vsel %vm832_vm6, %v4343_v61, %v5967_v25  ;;  %v4808_v48 = vsel %vm832_vm6, %v4807_v5, %v5968_v47 }
 0x6f4   : > { %v4336_v38 = vsel %vm830_vm5, %v9021_v31, %v6047_v20  ;;  %v4800_v3 = vsel %vm830_vm5, %v9036_v52, %v6048_v1  ;;  %v4345_v19 = vsel %vm834_vm7, %v4344_v41, %v6057_v58  ;;  %v4576_v57 = vsel %vm836_vm8, %v4575_v17, %v5972_v11 }
 0x6f5   : > { %v6051_v44 = vpop.permute.xlu1 %6050  ;;  %v6061_v33 = vpop.permute.xlu0 %6060  ;;  %v5040_v31 = vsel %vm836_vm8, %v5039_v16, %v5973_v54  ;;  %v4809_v4 = vsel %vm834_vm7, %v4808_v48, %v6058_v10  ;;  %v4337_v47 = vsel %vm832_vm6, %v4336_v38, %v5977_v27  ;;  %v4801_v27 = vsel %vm832_vm6, %v4800_v3, %v5978_v29 }
 0x6f6   : > { %v6053_v9 = vunpack.i.h.bf16 %v6051_v44  ;;  %v6052_v26 = vunpack.i.l.bf16 %v6051_v44  ;;  %v6062_v50 = vunpack.i.l.bf16 %v6061_v33  ;;  %v6063_v49 = vunpack.i.h.bf16 %v6061_v33 }
 0x6f7   : > { %v4810_v58 = vsel %vm836_vm8, %v4809_v4, %v5988_v24 }
 0x6f8   : > { %v4568_v21 = vsel %vm834_vm7, %v4567_v62, %v6052_v26  ;;  %v5032_v20 = vsel %vm834_vm7, %v5031_v22, %v6053_v9  ;;  %v4577_v25 = vsel %vm838_vm9, %v4576_v57, %v6062_v50  ;;  %v5041_v11 = vsel %vm838_vm9, %v5040_v31, %v6063_v49 }
 0x6f9   : > { %v6076_v51 = vpop.permute.xlu1 %6075  ;;  %v6066_v14 = vpop.permute.xlu0 %6065  ;;  %v4346_v62 = vsel %vm836_vm8, %v4345_v19, %v5987_v55  ;;  %v4578_v9 = vsel %vm840_vm10, %v4577_v25, %v5992_v43  ;;  %v4569_v26 = vsel %vm836_vm8, %v4568_v21, %v5982_v37  ;;  %v5033_v18 = vsel %vm836_vm8, %v5032_v20, %v5983_v53 }
 0x6fa   : > { %v6078_v44 = vunpack.i.h.bf16 %v6076_v51  ;;  %v6077_v52 = vunpack.i.l.bf16 %v6076_v51  ;;  %v6067_v5 = vunpack.i.l.bf16 %v6066_v14  ;;  %v6068_v59 = vunpack.i.h.bf16 %v6066_v14 }
 0x6fb   : > { %v5042_v24 = vsel %vm840_vm10, %v5041_v11, %v5993_v23 }
 0x6fc   : > { %v4347_v29 = vsel %vm838_vm9, %v4346_v62, %v6077_v52  ;;  %v4811_v55 = vsel %vm838_vm9, %v4810_v58, %v6078_v44  ;;  %v4338_v36 = vsel %vm834_vm7, %v4337_v47, %v6067_v5  ;;  %v4802_v43 = vsel %vm834_vm7, %v4801_v27, %v6068_v59 }
 0x6fd   : > { %v6081_v7 = vpop.permute.xlu1 %6080  ;;  %v6071_v61 = vpop.permute.xlu0 %6070  ;;  %v4339_v42 = vsel %vm836_vm8, %v4338_v36, %v5997_v63  ;;  %v4348_v23 = vsel %vm840_vm10, %v4347_v29, %v6007_v39  ;;  %v4812_v48 = vsel %vm840_vm10, %v4811_v55, %v6008_v28  ;;  %v4803_v19 = vsel %vm836_vm8, %v4802_v43, %v5998_v13 }
 0x6fe   : > { %v6083_v54 = vunpack.i.h.bf16 %v6081_v7  ;;  %v6082_v33 = vunpack.i.l.bf16 %v6081_v7  ;;  %v6073_v1 = vunpack.i.h.bf16 %v6071_v61  ;;  %v6072_v10 = vunpack.i.l.bf16 %v6071_v61 }
 0x6ff   : > { %v6022_v29 = vunpack.i.l.bf16 %v9301_v2 }
 0x700   : > { %v4579_v16 = vsel %vm842_vm11, %v4578_v9, %v6082_v33  ;;  %v5043_v37 = vsel %vm842_vm11, %v5042_v24, %v6083_v54  ;;  %v4570_v15 = vsel %vm838_vm9, %v4569_v26, %v6072_v10  ;;  %v5034_v38 = vsel %vm838_vm9, %v5033_v18, %v6073_v1 }
 0x701   : > { %v6096_v17 = vpop.permute.xlu1 %6095  ;;  %v6086_v53 = vpop.permute.xlu0 %6085  ;;  %v5289_v49 = vrot.slane %v4579_v16, 4  ;;  %v5295_v14 = vrot.slane %v5043_v37, 4  ;;  %v4571_v39 = vsel %vm840_vm10, %v4570_v15, %v6002_v60  ;;  %v5035_v32 = vsel %vm840_vm10, %v5034_v38, %v6003_v34 }
 0x702   : > { %v6098_v22 = vunpack.i.h.bf16 %v6096_v17  ;;  %v6088_v50 = vunpack.i.h.bf16 %v6086_v53  ;;  %v6087_v51 = vunpack.i.l.bf16 %v6086_v53  ;;  %v6097_v41 = vunpack.i.l.bf16 %v6096_v17 }
 0x703   : > { %v6023_v18 = vunpack.i.h.bf16 %v9301_v2 }
 0x704   : > { %v4340_v3 = vsel %vm838_vm9, %v4339_v42, %v6087_v51  ;;  %v5267_v28 = vsel %vm830_vm5, %v9076_v35, %v6098_v22  ;;  %v4804_v21 = vsel %vm838_vm9, %v4803_v19, %v6088_v50  ;;  %v5260_v13 = vsel %vm830_vm5, %v9083_v40, %v6097_v41 }
 0x705   : > { %v6101_v57 = vpop.permute.xlu1 %6100  ;;  %v6091_v63 = vpop.permute.xlu0 %6090  ;;  %v4341_v0 = vsel %vm840_vm10, %v4340_v3, %v6012_v46  ;;  %v4805_v11 = vsel %vm840_vm10, %v4804_v21, %v6013_v45  ;;  %v5261_v1 = vsel %vm832_vm6, %v5260_v13, %v6017_v8  ;;  %v5268_v10 = vsel %vm832_vm6, %v5267_v28, %v6018_v30 }
 0x706   : > { %v6103_v31 = vunpack.i.h.bf16 %v6101_v57  ;;  %v6102_v4 = vunpack.i.l.bf16 %v6101_v57  ;;  %v6093_v12 = vunpack.i.h.bf16 %v6091_v63  ;;  %v6092_v20 = vunpack.i.l.bf16 %v6091_v63 }
 0x708   : > { %v4349_v47 = vsel %vm842_vm11, %v4348_v23, %v6102_v4  ;;  %v4813_v25 = vsel %vm842_vm11, %v4812_v48, %v6103_v31  ;;  %v4572_v34 = vsel %vm842_vm11, %v4571_v39, %v6092_v20  ;;  %v5036_v60 = vsel %vm842_vm11, %v5035_v32, %v6093_v12  ;;  %v2834_v48 = vld [vmem:[%s9477_s3] sm:$0x3] }
 0x709   : > { %v6106_v35 = vpop.permute.xlu1 %6105  ;;  %v5303_v44 = vsel %vm2737_vm12, %v4349_v47, %v5289_v49  ;;  %v5305_v52 = vsel %vm2737_vm12, %v4813_v25, %v5295_v14  ;;  %v5288_v5 = vrot.slane %v4572_v34, 4  ;;  %v6116_v59 = vpop.permute.xlu0 %6115  ;;  %v5294_v54 = vrot.slane %v5036_v60, 4 }
 0x70a   : > { %v6108_v7 = vunpack.i.h.bf16 %v6106_v35  ;;  %v6107_v40 = vunpack.i.l.bf16 %v6106_v35  ;;  %v6118_v33 = vunpack.i.h.bf16 %v6116_v59  ;;  %v6117_v46 = vunpack.i.l.bf16 %v6116_v59 }
 0x70b   : > { %v5309_v61 = vpack.c.bf16 %v5305_v52, %v5303_v44 }
 0x70c   : > { %v4342_v62 = vsel %vm842_vm11, %v4341_v0, %v6107_v40  ;;  %v4806_v27 = vsel %vm842_vm11, %v4805_v11, %v6108_v7  ;;  %v5262_v56 = vsel %vm834_vm7, %v5261_v1, %v6117_v46  ;;  %v5269_v45 = vsel %vm834_vm7, %v5268_v10, %v6118_v33  ;;  %v6135_v40 = vld [vmem:[%s6205_s23] sm:$0xff] }
 0x70d   : > { %5328 = vmatprep.subr.bf16.mxu1 %v5309_v61  ;;  %v6111_v58 = vpop.permute.xlu1 %6110  ;;  %v5302_v9 = vsel %vm2737_vm12, %v4342_v62, %v5288_v5  ;;  %v5304_v26 = vsel %vm2737_vm12, %v4806_v27, %v5294_v54  ;;  %v6121_v55 = vpop.permute.xlu0 %6120  ;;  %v5263_v17 = vsel %vm836_vm8, %v5262_v56, %v6022_v29  ;;  %v5270_v43 = vsel %vm836_vm8, %v5269_v45, %v6023_v18 }
 0x70e   : > { %v6123_v8 = vunpack.i.h.bf16 %v6121_v55  ;;  %v6122_v36 = vunpack.i.l.bf16 %v6121_v55  ;;  %v5308_v6 = vpack.c.bf16 %v5304_v26, %v5302_v9  ;;  %v6113_v24 = vunpack.i.h.bf16 %v6111_v58 }
 0x70f   : > { %v6112_v30 = vunpack.i.l.bf16 %v6111_v58  ;;  %v5390_v11 = vcombine.high %v6135_v40, %v6135_v40 }
 0x710   : > { %v5264_v16 = vsel %vm838_vm9, %v5263_v17, %v6122_v36  ;;  %v5271_v37 = vsel %vm838_vm9, %v5270_v43, %v6123_v8  ;;  %5329 = vmatpush1.bf16.msra.mxu1 %v5308_v6 }
 0x711   : > { %v6126_v15 = vpop.permute.xlu0 %6125  ;;  %v5272_v2 = vsel %vm840_vm10, %v5271_v37, %v6113_v24  ;;  %v5265_v22 = vsel %vm840_vm10, %v5264_v16, %v6112_v30 }
 0x712   : > { %v6128_v53 = vunpack.i.h.bf16 %v6126_v15  ;;  %v6127_v38 = vunpack.i.l.bf16 %v6126_v15 }
 0x714   : > { %v5273_v50 = vsel %vm842_vm11, %v5272_v2, %v6128_v53  ;;  %v5266_v51 = vsel %vm842_vm11, %v5265_v22, %v6127_v38 }
 0x715   : > { %v5311_v41 = vpack.c.bf16 %v5273_v50, %v5273_v50  ;;  %v5310_v42 = vpack.c.bf16 %v5266_v51, %v5266_v51 }
 0x717   : > { %5469 = vmatprep.subr.msk.bf16.mxu1 %vm2761_vm13, %v5311_v41  ;;  %v5321_v23 = vsel %vm2761_vm13, %v5310_v42, 0 }
 0x718   : > { %5331 = vmatpush1.bf16.msra.mxu1 %v5321_v23 }
 0x71b   : > { %5470 = vmatmul.mubr.msk.bf16.vlgmr.msra.gmra.mrb[0].mxu1 %vm2757_vm14, %v2834_v48 }
 0x71e   : > { %v5315_v49 = vpop.permute.xlu1 %5314 }
 0x7ee   : > { %v5360_v14 = vpop.f32.mrb[0].mxu1 }
 0x7ef   : > { %v5361_v3 = vadd.f32 %v5360_v14, %v5315_v49  ;;  %v5362_v19 = vpop.f32.mrb[1].mxu1 }
 0x7f0   : > { %v5363_v57 = vadd.f32 %v5362_v19, %v5315_v49  ;;  %v5364_v31 = vpop.f32.mrb[2].mxu1 }
 0x7f1   : > { %v5372_v4 = vmul.f32 %v5361_v3, %v5361_v3  ;;  %v5365_v63 = vpop.f32.mrb[3].mxu1  ;;  %v5367_v39 = vsel %vm2737_vm12, %v5361_v3, 0.0 }
 0x7f2   : > { %v5373_v32 = vmul.f32 %v5363_v57, %v5363_v57  ;;  %v5368_v28 = vsel %vm2737_vm12, %v5363_v57, 0.0 }
 0x7f3   : > { %v5369_v21 = vadd.f32 %v5368_v28, %v5367_v39  ;;  %v5374_v12 = vsel %vm2737_vm12, %v5372_v4, 0.0 }
 0x7f4   : > { %v5375_v20 = vsel %vm2737_vm12, %v5373_v32, 0.0 }
 0x7f5   : > { %5370 = vadd.xlane.f32.xlu0 %v5369_v21  ;;  %v5376_v13 = vadd.f32 %v5375_v20, %v5374_v12 }
 0x7f7   : > { %5377 = vadd.xlane.f32.xlu1 %v5376_v13 }
 0x882   : > { %v5371_v47 = vpop.xlane.xlu0 %5370 }
 0x883   : > { %v5379_v25 = vmul.f32 0.00390625, %v5371_v47 }
 0x884   : > { %v5378_v0 = vpop.xlane.xlu1 %5377 }
 0x885   : > { %v5380_v34 = vmul.f32 0.00390625, %v5378_v0  ;;  %v5381_v60 = vmul.f32 %v5379_v25, %v5379_v25  ;;  %v5384_v5 = vsub.f32 %v5361_v3, %v5379_v25  ;;  %v5385_v7 = vsub.f32 %v5363_v57, %v5379_v25 }
 0x887   : > { %v5382_v35 = vsub.f32 %v5380_v34, %v5381_v60 }
 0x889   : > { %v5383_v44 = vmax.f32 %v5382_v35, 0.0 }
 0x88b   : > { %v5386_v52 = vadd.f32 1e-05, %v5383_v44 }
 0x88d   : > { %6133 = vrsqrt.f32 %v5386_v52 }
 0x897   : > { %v6134_v59 = vpop.eup %6133 }
 0x898   : > { %v5388_v54 = vmul.f32 %v6134_v59, %v5384_v5  ;;  %v5389_v33 = vmul.f32 %v6134_v59, %v5385_v7 }
 0x89a   : > { %v5392_v46 = vadd.f32 %v6135_v40, %v5388_v54  ;;  %v5393_v61 = vadd.f32 %v5390_v11, %v5389_v33 }
 0x89c   : > { %v5396_v62 = vcombine.low %v5392_v46, %v5393_v61 }
 0x89e   : > { %5398 = vst [vmem:[%s224_s24] sm:$0xff] %v5396_v62 }
 0x89f PF: > { %s15_s18 = sadd.s32 1, %s6142_s18  }
 0x8a0   : > { %p12_p4 = scmp.ge.s32.totalorder %s15_s18, 4  }
 0x8a2   :  { %14 = sbr.rel (!%p12_p4) target bundleno = 1 (0x1), region = 70 }

</bundles_post_ra>
